<compile_context>
chip_gen: v5e
topology: v5e:2x2
jax: 0.10.0
libtpu: 0.0.40
codegen_flags: <defaults>
</compile_context>

<pallas_src>
import functools

import jax
import jax.numpy as jnp
from jax.experimental import pallas as pl
from jax.experimental.pallas import tpu as pltpu


def _gdfn_kernel(x_ref, w_in_ref, k_ref, b_ref, w_out_ref, o_ref, *, tile_h):
    # x_ref   : (H+2, W+2, C)     halo/zero-padded NHWC image for this batch element
    # w_in_ref: (C, 2*hidden)     project_in  (1x1 conv as matmul)
    # k_ref   : (9, 2*hidden)     depthwise 3x3 weights, row = dh*3+dw
    # b_ref   : (1, 2*hidden)     depthwise bias
    # w_out_ref: (hidden, C)      project_out (1x1 conv as matmul)
    # o_ref   : (tile_h, W, C)    output row tile
    i = pl.program_id(1)
    th = tile_h
    Hp, Wp, C = x_ref.shape
    W = Wp - 2
    two_h = w_in_ref.shape[1]
    h = two_h // 2

    # Rows [i*th, i*th + th + 2) of the padded image cover this output tile + halo.
    start = pl.multiple_of(i * th, th)
    xs = x_ref[pl.ds(start, th + 2), :, :]                       # (th+2, W+2, C)
    x32 = xs.astype(jnp.float32).reshape((th + 2) * Wp, C)

    # project_in: 1x1 conv == matmul over channels (MXU).
    w_in = w_in_ref[...].astype(jnp.float32)                     # (C, 2h)
    y = jnp.dot(x32, w_in, preferred_element_type=jnp.float32)   # ((th+2)*(W+2), 2h)
    y = y.reshape(th + 2, Wp, two_h)

    # depthwise 3x3 conv (padding already baked into xs/y as zero rows/cols).
    k = k_ref[...].astype(jnp.float32)                           # (9, 2h)
    acc = jnp.zeros((th, W, two_h), jnp.float32)
    for dh in range(3):
        for dw in range(3):
            tap = dh * 3 + dw
            acc = acc + y[dh:dh + th, dw:dw + W, :] * k[tap:tap + 1, :]
    acc = acc + b_ref[...].astype(jnp.float32)                   # (1, 2h) broadcasts

    # gating: GELU(x1) * x2   (tanh-approx GELU; see TODO above)
    y1 = acc[..., :h]
    y2 = acc[..., h:]
    c = 0.7978845608028654  # sqrt(2/pi)
    g = 0.5 * y1 * (1.0 + jnp.tanh(c * (y1 + 0.044715 * y1 * y1 * y1))) * y2

    # project_out: 1x1 conv == matmul over channels (MXU).
    w_out = w_out_ref[...].astype(jnp.float32)                   # (h, C)
    out = jnp.dot(g.reshape(th * W, h), w_out,
                  preferred_element_type=jnp.float32)
    o_ref[...] = out.reshape(th, W, C).astype(o_ref.dtype)


@functools.partial(jax.jit, static_argnames=("tile_h",))
def gated_dconv_feedforward(x, w_in, dw_w, dw_b, w_out, *, tile_h=None):
    """Gated_Dconv_FeedForward forward pass.

    x:     (B, C, H, W)            NCHW, PyTorch layout.
    w_in:  (2*hidden, C, 1, 1)     project_in Conv2d weight (no bias).
    dw_w:  (2*hidden, 1, 3, 3)     depthwise Conv2d weight.
    dw_b:  (2*hidden,)             depthwise Conv2d bias.
    w_out: (C, hidden, 1, 1)       project_out Conv2d weight (no bias).
    """
    B, C, H, W = x.shape
    two_h = w_in.shape[0]
    hidden = two_h // 2

    if tile_h is None:
        tile_h = H
        for cand in (128, 64, 32, 16, 8):
            if H % cand == 0:
                tile_h = cand
                break
    assert H % tile_h == 0, "tile_h must divide H"
    n_h = H // tile_h

    # NCHW -> NHWC and zero-pad spatially by 1 (provides the dwconv halo; stays zero
    # through the bias-free project_in).
    xt = jnp.transpose(x, (0, 2, 3, 1))
    xp = jnp.pad(xt, ((0, 0), (1, 1), (1, 1), (0, 0)))
    Hp, Wp = H + 2, W + 2

    # PyTorch conv weights -> matmul / per-channel-tap layouts.
    wi = w_in.reshape(two_h, C).T                # (C, 2h)
    k = dw_w.reshape(two_h, 9).T                 # (9, 2h), row = dh*3+dw
    b2 = dw_b.reshape(1, two_h)                  # (1, 2h)
    wo = w_out.reshape(C, hidden).T              # (h, C)

    kernel = functools.partial(_gdfn_kernel, tile_h=tile_h)

    out_nhwc = pl.pallas_call(
        kernel,
        out_shape=jax.ShapeDtypeStruct((B, H, W, C), x.dtype),
        grid_spec=pltpu.PrefetchScalarGridSpec(
            num_scalar_prefetch=0,
            grid=(B, n_h),
            in_specs=[
                # Full padded image; block index constant along the row-tile axis so it
                # stays resident in VMEM across the inner grid loop.
                pl.BlockSpec((None, Hp, Wp, C), lambda b, i: (b, 0, 0, 0)),
                pl.BlockSpec((C, two_h), lambda b, i: (0, 0)),
                pl.BlockSpec((9, two_h), lambda b, i: (0, 0)),
                pl.BlockSpec((1, two_h), lambda b, i: (0, 0)),
                pl.BlockSpec((hidden, C), lambda b, i: (0, 0)),
            ],
            out_specs=pl.BlockSpec((None, tile_h, W, C), lambda b, i: (b, i, 0, 0)),
        ),
        compiler_params=pltpu.CompilerParams(
            dimension_semantics=("parallel", "arbitrary")),
        # Per-step live VMEM ~ (tile_h+2)*(W+2)*2*hidden*4B; raise vmem_limit_bytes
        # here if large images / channel counts exceed the scoped default.
    )(xp, wi, k, b2, wo)

    return jnp.transpose(out_nhwc, (0, 3, 1, 2))


def _reference(x, w_in, dw_w, dw_b, w_out):
    """Plain-JAX GDFN reference (NCHW), same tanh-approx GELU as the kernel."""
    B, C, H, W = x.shape
    two_h = w_in.shape[0]
    hidden = two_h // 2
    hp = jax.lax.Precision.HIGHEST

    y = jnp.einsum("bchw,oc->bohw", x.astype(jnp.float32),
                   w_in.reshape(two_h, C).astype(jnp.float32), precision=hp)
    yp = jnp.pad(y, ((0, 0), (0, 0), (1, 1), (1, 1)))
    k = dw_w.reshape(two_h, 3, 3).astype(jnp.float32)
    acc = jnp.zeros_like(y)
    for dh in range(3):
        for dw in range(3):
            acc = acc + yp[:, :, dh:dh + H, dw:dw + W] * k[:, dh, dw][None, :, None, None]
    acc = acc + dw_b.astype(jnp.float32)[None, :, None, None]
    x1, x2 = acc[:, :hidden], acc[:, hidden:]
    g = jax.nn.gelu(x1, approximate=True) * x2
    out = jnp.einsum("bchw,oc->bohw", g,
                     w_out.reshape(C, hidden).astype(jnp.float32), precision=hp)
    return out.astype(x.dtype)


if __name__ == "__main__":
    key = jax.random.PRNGKey(0)
    B, C, H, W = 2, 4, 16, 16
    hidden = int(C * 2.66)          # 10, matches PyTorch int(dim * ffn_expansion_factor)
    two_h = 2 * hidden

    ks = jax.random.split(key, 5)
    x = jax.random.normal(ks[0], (B, C, H, W), dtype=jnp.float32)
    w_in = 0.5 * jax.random.normal(ks[1], (two_h, C, 1, 1), dtype=jnp.float32)
    dw_w = 0.5 * jax.random.normal(ks[2], (two_h, 1, 3, 3), dtype=jnp.float32)
    dw_b = 0.5 * jax.random.normal(ks[3], (two_h,), dtype=jnp.float32)
    w_out = 0.5 * jax.random.normal(ks[4], (C, hidden, 1, 1), dtype=jnp.float32)

    out = gated_dconv_feedforward(x, w_in, dw_w, dw_b, w_out, tile_h=8)
    jax.block_until_ready(out)

    ref = _reference(x, w_in, dw_w, dw_b, w_out)
    assert out.shape == x.shape and out.dtype == x.dtype
    max_err = float(jnp.max(jnp.abs(out - ref)))
    assert jnp.allclose(out, ref, atol=2e-2, rtol=2e-2), f"mismatch vs reference, max abs err={max_err}"
    print("KERNEL_OK")
</pallas_src>

<mosaic_0001>
module attributes {stable_mosaic.version = 11 : i64} {
  func.func @_gdfn_kernel(%arg0: i32, %arg1: i32, %arg2: memref<1x18x18x4xf32, #tpu.memory_space<vmem>>, %arg3: memref<4x20xf32, #tpu.memory_space<vmem>>, %arg4: memref<9x20xf32, #tpu.memory_space<vmem>>, %arg5: memref<1x20xf32, #tpu.memory_space<vmem>>, %arg6: memref<10x4xf32, #tpu.memory_space<vmem>>, %arg7: memref<1x8x16x4xf32, #tpu.memory_space<vmem>>) attributes {dimension_semantics = [#tpu.dimension_semantics<parallel>, #tpu.dimension_semantics<arbitrary>], iteration_bounds = array<i64: 2, 2>, scalar_prefetch = 0 : i64, scratch_operands = 0 : i64, tpu.core_type = #tpu.core_type<tc>, window_params = [{transform_indices = @transform_0, window_bounds = array<i64: 1, 18, 18, 4>}, {pipeline_mode = #tpu.pipeline_mode<synchronous>, transform_indices = @transform_1, window_bounds = array<i64: 4, 20>}, {pipeline_mode = #tpu.pipeline_mode<synchronous>, transform_indices = @transform_2, window_bounds = array<i64: 9, 20>}, {pipeline_mode = #tpu.pipeline_mode<synchronous>, transform_indices = @transform_3, window_bounds = array<i64: 1, 20>}, {pipeline_mode = #tpu.pipeline_mode<synchronous>, transform_indices = @transform_4, window_bounds = array<i64: 10, 4>}, {transform_indices = @transform_5, window_bounds = array<i64: 1, 8, 16, 4>}]} {
    %c8_i32 = arith.constant 8 : i32
    %0 = arith.muli %arg1, %c8_i32 : i32
    %1 = tpu.assume_multiple %0, 8 : i32
    %c0 = arith.constant 0 : index
    %2 = arith.index_cast %1 : i32 to index
    %c0_0 = arith.constant 0 : index
    %c0_1 = arith.constant 0 : index
    %3 = vector.load %arg2[%c0, %2, %c0_0, %c0_1] : memref<1x18x18x4xf32, #tpu.memory_space<vmem>>, vector<1x10x18x4xf32>
    %4 = vector.shape_cast %3 : vector<1x10x18x4xf32> to vector<10x18x4xf32>
    %5 = vector.shape_cast %4 : vector<10x18x4xf32> to vector<180x4xf32>
    %c0_2 = arith.constant 0 : index
    %c0_3 = arith.constant 0 : index
    %6 = vector.load %arg3[%c0_2, %c0_3] : memref<4x20xf32, #tpu.memory_space<vmem>>, vector<4x20xf32>
    %cst = arith.constant dense<0.000000e+00> : vector<180x20xf32>
    %7 = tpu.matmul %5, %6, %cst {dimension_numbers = #tpu.dot_dimension_numbers<[1], [0], [0], [1], [0, 0, 1, 1], [], []>} : vector<180x4xf32>, vector<4x20xf32>, vector<180x20xf32> -> vector<180x20xf32>
    %8 = vector.shape_cast %7 : vector<180x20xf32> to vector<10x18x20xf32>
    %c0_4 = arith.constant 0 : index
    %c0_5 = arith.constant 0 : index
    %9 = vector.load %arg4[%c0_4, %c0_5] : memref<9x20xf32, #tpu.memory_space<vmem>>, vector<9x20xf32>
    %cst_6 = arith.constant 0.000000e+00 : f32
    %10 = vector.broadcast %cst_6 : f32 to vector<8x16x20xf32>
    %11 = vector.extract_strided_slice %8 {offsets = [0, 0, 0], sizes = [8, 16, 20], strides = [1, 1, 1]} : vector<10x18x20xf32> to vector<8x16x20xf32>
    %12 = vector.extract_strided_slice %9 {offsets = [0, 0], sizes = [1, 20], strides = [1, 1]} : vector<9x20xf32> to vector<1x20xf32>
    %13 = vector.shape_cast %12 : vector<1x20xf32> to vector<1x1x20xf32>
    %14 = vector.broadcast %13 : vector<1x1x20xf32> to vector<8x16x20xf32>
    %15 = arith.mulf %11, %14 : vector<8x16x20xf32>
    %16 = arith.addf %10, %15 : vector<8x16x20xf32>
    %17 = vector.extract_strided_slice %8 {offsets = [0, 1, 0], sizes = [8, 16, 20], strides = [1, 1, 1]} : vector<10x18x20xf32> to vector<8x16x20xf32>
    %18 = vector.extract_strided_slice %9 {offsets = [1, 0], sizes = [1, 20], strides = [1, 1]} : vector<9x20xf32> to vector<1x20xf32>
    %19 = vector.shape_cast %18 : vector<1x20xf32> to vector<1x1x20xf32>
    %20 = vector.broadcast %19 : vector<1x1x20xf32> to vector<8x16x20xf32>
    %21 = arith.mulf %17, %20 : vector<8x16x20xf32>
    %22 = arith.addf %16, %21 : vector<8x16x20xf32>
    %23 = vector.extract_strided_slice %8 {offsets = [0, 2, 0], sizes = [8, 16, 20], strides = [1, 1, 1]} : vector<10x18x20xf32> to vector<8x16x20xf32>
    %24 = vector.extract_strided_slice %9 {offsets = [2, 0], sizes = [1, 20], strides = [1, 1]} : vector<9x20xf32> to vector<1x20xf32>
    %25 = vector.shape_cast %24 : vector<1x20xf32> to vector<1x1x20xf32>
    %26 = vector.broadcast %25 : vector<1x1x20xf32> to vector<8x16x20xf32>
    %27 = arith.mulf %23, %26 : vector<8x16x20xf32>
    %28 = arith.addf %22, %27 : vector<8x16x20xf32>
    %29 = vector.extract_strided_slice %8 {offsets = [1, 0, 0], sizes = [8, 16, 20], strides = [1, 1, 1]} : vector<10x18x20xf32> to vector<8x16x20xf32>
    %30 = vector.extract_strided_slice %9 {offsets = [3, 0], sizes = [1, 20], strides = [1, 1]} : vector<9x20xf32> to vector<1x20xf32>
    %31 = vector.shape_cast %30 : vector<1x20xf32> to vector<1x1x20xf32>
    %32 = vector.broadcast %31 : vector<1x1x20xf32> to vector<8x16x20xf32>
    %33 = arith.mulf %29, %32 : vector<8x16x20xf32>
    %34 = arith.addf %28, %33 : vector<8x16x20xf32>
    %35 = vector.extract_strided_slice %8 {offsets = [1, 1, 0], sizes = [8, 16, 20], strides = [1, 1, 1]} : vector<10x18x20xf32> to vector<8x16x20xf32>
    %36 = vector.extract_strided_slice %9 {offsets = [4, 0], sizes = [1, 20], strides = [1, 1]} : vector<9x20xf32> to vector<1x20xf32>
    %37 = vector.shape_cast %36 : vector<1x20xf32> to vector<1x1x20xf32>
    %38 = vector.broadcast %37 : vector<1x1x20xf32> to vector<8x16x20xf32>
    %39 = arith.mulf %35, %38 : vector<8x16x20xf32>
    %40 = arith.addf %34, %39 : vector<8x16x20xf32>
    %41 = vector.extract_strided_slice %8 {offsets = [1, 2, 0], sizes = [8, 16, 20], strides = [1, 1, 1]} : vector<10x18x20xf32> to vector<8x16x20xf32>
    %42 = vector.extract_strided_slice %9 {offsets = [5, 0], sizes = [1, 20], strides = [1, 1]} : vector<9x20xf32> to vector<1x20xf32>
    %43 = vector.shape_cast %42 : vector<1x20xf32> to vector<1x1x20xf32>
    %44 = vector.broadcast %43 : vector<1x1x20xf32> to vector<8x16x20xf32>
    %45 = arith.mulf %41, %44 : vector<8x16x20xf32>
    %46 = arith.addf %40, %45 : vector<8x16x20xf32>
    %47 = vector.extract_strided_slice %8 {offsets = [2, 0, 0], sizes = [8, 16, 20], strides = [1, 1, 1]} : vector<10x18x20xf32> to vector<8x16x20xf32>
    %48 = vector.extract_strided_slice %9 {offsets = [6, 0], sizes = [1, 20], strides = [1, 1]} : vector<9x20xf32> to vector<1x20xf32>
    %49 = vector.shape_cast %48 : vector<1x20xf32> to vector<1x1x20xf32>
    %50 = vector.broadcast %49 : vector<1x1x20xf32> to vector<8x16x20xf32>
    %51 = arith.mulf %47, %50 : vector<8x16x20xf32>
    %52 = arith.addf %46, %51 : vector<8x16x20xf32>
    %53 = vector.extract_strided_slice %8 {offsets = [2, 1, 0], sizes = [8, 16, 20], strides = [1, 1, 1]} : vector<10x18x20xf32> to vector<8x16x20xf32>
    %54 = vector.extract_strided_slice %9 {offsets = [7, 0], sizes = [1, 20], strides = [1, 1]} : vector<9x20xf32> to vector<1x20xf32>
    %55 = vector.shape_cast %54 : vector<1x20xf32> to vector<1x1x20xf32>
    %56 = vector.broadcast %55 : vector<1x1x20xf32> to vector<8x16x20xf32>
    %57 = arith.mulf %53, %56 : vector<8x16x20xf32>
    %58 = arith.addf %52, %57 : vector<8x16x20xf32>
    %59 = vector.extract_strided_slice %8 {offsets = [2, 2, 0], sizes = [8, 16, 20], strides = [1, 1, 1]} : vector<10x18x20xf32> to vector<8x16x20xf32>
    %60 = vector.extract_strided_slice %9 {offsets = [8, 0], sizes = [1, 20], strides = [1, 1]} : vector<9x20xf32> to vector<1x20xf32>
    %61 = vector.shape_cast %60 : vector<1x20xf32> to vector<1x1x20xf32>
    %62 = vector.broadcast %61 : vector<1x1x20xf32> to vector<8x16x20xf32>
    %63 = arith.mulf %59, %62 : vector<8x16x20xf32>
    %64 = arith.addf %58, %63 : vector<8x16x20xf32>
    %c0_7 = arith.constant 0 : index
    %c0_8 = arith.constant 0 : index
    %65 = vector.load %arg5[%c0_7, %c0_8] : memref<1x20xf32, #tpu.memory_space<vmem>>, vector<1x20xf32>
    %66 = vector.shape_cast %65 : vector<1x20xf32> to vector<1x1x20xf32>
    %67 = vector.broadcast %66 : vector<1x1x20xf32> to vector<8x16x20xf32>
    %68 = arith.addf %64, %67 : vector<8x16x20xf32>
    %69 = vector.extract_strided_slice %68 {offsets = [0, 0, 0], sizes = [8, 16, 10], strides = [1, 1, 1]} : vector<8x16x20xf32> to vector<8x16x10xf32>
    %70 = vector.extract_strided_slice %68 {offsets = [0, 0, 10], sizes = [8, 16, 10], strides = [1, 1, 1]} : vector<8x16x20xf32> to vector<8x16x10xf32>
    %cst_9 = arith.constant 5.000000e-01 : f32
    %71 = vector.broadcast %cst_9 : f32 to vector<8x16x10xf32>
    %72 = arith.mulf %71, %69 : vector<8x16x10xf32>
    %cst_10 = arith.constant 4.471500e-02 : f32
    %73 = vector.broadcast %cst_10 : f32 to vector<8x16x10xf32>
    %74 = arith.mulf %73, %69 : vector<8x16x10xf32>
    %75 = arith.mulf %74, %69 : vector<8x16x10xf32>
    %76 = arith.mulf %75, %69 : vector<8x16x10xf32>
    %77 = arith.addf %69, %76 : vector<8x16x10xf32>
    %cst_11 = arith.constant 0.797884583 : f32
    %78 = vector.broadcast %cst_11 : f32 to vector<8x16x10xf32>
    %79 = arith.mulf %78, %77 : vector<8x16x10xf32>
    %80 = math.tanh %79 : vector<8x16x10xf32>
    %cst_12 = arith.constant 1.000000e+00 : f32
    %81 = vector.broadcast %cst_12 : f32 to vector<8x16x10xf32>
    %82 = arith.addf %81, %80 : vector<8x16x10xf32>
    %83 = arith.mulf %72, %82 : vector<8x16x10xf32>
    %84 = arith.mulf %83, %70 : vector<8x16x10xf32>
    %c0_13 = arith.constant 0 : index
    %c0_14 = arith.constant 0 : index
    %85 = vector.load %arg6[%c0_13, %c0_14] : memref<10x4xf32, #tpu.memory_space<vmem>>, vector<10x4xf32>
    %86 = vector.shape_cast %84 : vector<8x16x10xf32> to vector<128x10xf32>
    %cst_15 = arith.constant dense<0.000000e+00> : vector<128x4xf32>
    %87 = tpu.matmul %86, %85, %cst_15 {dimension_numbers = #tpu.dot_dimension_numbers<[1], [0], [0], [1], [0, 0, 1, 1], [], []>} : vector<128x10xf32>, vector<10x4xf32>, vector<128x4xf32> -> vector<128x4xf32>
    %88 = vector.shape_cast %87 : vector<128x4xf32> to vector<8x16x4xf32>
    %c0_16 = arith.constant 0 : index
    %c0_17 = arith.constant 0 : index
    %c0_18 = arith.constant 0 : index
    %c0_19 = arith.constant 0 : index
    %89 = vector.load %arg7[%c0_16, %c0_17, %c0_18, %c0_19] : memref<1x8x16x4xf32, #tpu.memory_space<vmem>>, vector<1x8x16x4xf32>
    %90 = vector.shape_cast %89 : vector<1x8x16x4xf32> to vector<8x16x4xf32>
    %91 = vector.shape_cast %88 : vector<8x16x4xf32> to vector<1x8x16x4xf32>
    tpu.vector_store %arg7[%c0_16, %c0_17, %c0_18, %c0_19], %91 {strides = array<i32>} : memref<1x8x16x4xf32, #tpu.memory_space<vmem>>, vector<1x8x16x4xf32>,
    return
  }
  func.func @transform_0(%arg0: i32, %arg1: i32) -> (i32, i32, i32, i32) {
    %c0_i32 = arith.constant 0 : i32
    %c0_i32_0 = arith.constant 0 : i32
    %c0_i32_1 = arith.constant 0 : i32
    %c0_i32_2 = arith.constant 0 : i32
    return %arg0, %c0_i32, %c0_i32_0, %c0_i32_1 : i32, i32, i32, i32
  }
  func.func @transform_1(%arg0: i32, %arg1: i32) -> (i32, i32) {
    %c0_i32 = arith.constant 0 : i32
    %c0_i32_0 = arith.constant 0 : i32
    %c0_i32_1 = arith.constant 0 : i32
    return %c0_i32, %c0_i32_0 : i32, i32
  }
  func.func @transform_2(%arg0: i32, %arg1: i32) -> (i32, i32) {
    %c0_i32 = arith.constant 0 : i32
    %c0_i32_0 = arith.constant 0 : i32
    %c0_i32_1 = arith.constant 0 : i32
    return %c0_i32, %c0_i32_0 : i32, i32
  }
  func.func @transform_3(%arg0: i32, %arg1: i32) -> (i32, i32) {
    %c0_i32 = arith.constant 0 : i32
    %c0_i32_0 = arith.constant 0 : i32
    %c0_i32_1 = arith.constant 0 : i32
    return %c0_i32, %c0_i32_0 : i32, i32
  }
  func.func @transform_4(%arg0: i32, %arg1: i32) -> (i32, i32) {
    %c0_i32 = arith.constant 0 : i32
    %c0_i32_0 = arith.constant 0 : i32
    %c0_i32_1 = arith.constant 0 : i32
    return %c0_i32, %c0_i32_0 : i32, i32
  }
  func.func @transform_5(%arg0: i32, %arg1: i32) -> (i32, i32, i32, i32) {
    %c0_i32 = arith.constant 0 : i32
    %c0_i32_0 = arith.constant 0 : i32
    %c0_i32_1 = arith.constant 0 : i32
    return %arg0, %arg1, %c0_i32, %c0_i32_0 : i32, i32, i32, i32
  }
}

</mosaic_0001>

<bundles_post_ra>
// kernel: gated_dconv_feedforward.1
= control target key start
LH: loop header
LB: loop body
LE: loop exit
PB: predicated region body
PF: predicated region fallthrough
CT: control target
= control target key end

     0   :  { %s4763_s18 = smov 0   ;;  %s4765_s19 = smov 0   ;;  %s8631_s0 = inlined_call_operand.vmem [shape: f32[2,18,18,4], index: 0, kind: input, shape index: {}]   ;;  %s8632_s1 = inlined_call_operand.vmem [shape: f32[4,20], index: 1, kind: input, shape index: {}]   ;;  %s8633_s2 = inlined_call_operand.vmem [shape: f32[9,20], index: 2, kind: input, shape index: {}]   ;;  %s8634_s3 = inlined_call_operand.vmem [shape: f32[1,20], index: 3, kind: input, shape index: {}]   ;;  %s8635_s4 = inlined_call_operand.vmem [shape: f32[10,4], index: 4, kind: input, shape index: {}]   ;;  %s8636_s5 = inlined_call_operand.vmem [shape: f32[2,16,16,4], index: 5, kind: output, shape index: {}]  }
   0x1   :  { %s4767_s20 = smov 0   ;;  %s4769_s21 = smov 0  }
   0x2   :  { %s4771_s22 = smov 0  }
   0x3 LB: > { %s24_s23 = sadd.s32 1, %s4722_s20  ;;  %s27_s24 = sadd.s32 1, %s4726_s21  ;;  %s4730_s22 = sphi %s4771_s22, %s15_s22   ;;  %s4726_s21 = sphi %s4769_s21, %s9977_s21   ;;  %s4722_s20 = sphi %s4767_s20, %s9976_s20   ;;  %s4718_s19 = sphi %s4765_s19, %s9975_s19   ;;  %s4714_s18 = sphi %s4763_s18, %s9974_s18  }
   0x4   : > { %p25_p0 = scmp.ge.s32.totalorder %s24_s23, 2  ;;  %p4435_p1 = scmp.ge.s32.totalorder %s4730_s22, 1 }
   0x5   : > { %p201_p2 = scmp.lt.s32.totalorder %s4730_s22, 5 }
   0x6   : > { %s9979_s23 = smov (%p25_p0, %s24_s23), 0  ;;  %s9981_s24 = smov (!%p25_p0, %s27_s24), %s4726_s21 }
   0x7   : > { %p202_p3 = pnand %p4435_p1, %p201_p2  ;;  %p29_p4 = scmp.ge.s32.totalorder %s9981_s24, 2 }
   0x9   : > { %s9983_s24 = smov (%p29_p4, %s9981_s24), 0  ;;  %205 = sbr.rel (%p202_p3) target bundleno = 971 (0x3cb), region = 40 }
   0xe   : > { %v373_v0 = vld [vmem:[%s8632_s1] sm:$0xf]  ;;  %vm541_vm0 = vcmask 1043456   ;;  %p234_p5 = scmp.lt.s32.totalorder %s4718_s19, 1  ;;  %s4442_s27 = smul.u32 192, %s4714_s18  ;;  %vm494_vm1 = vcmask 31744  }
   0xf   : > { %4443 = vmatpush.msk.msra.mxu0 %vm541_vm0, %v373_v0  ;;  %4510 = vmatpush.msk.msra.mxu2 %vm541_vm0, %v373_v0  ;;  %vm931_vm2 = vcmask 1040384   ;;  %vm932_vm3 = vcmask 1042434   ;;  %vm934_vm5 = vcmask 1044484   ;;  %vm936_vm7 = vcmask 1046534   ;;  %s4732_s14 = smov 118   ;;  %s4437_s13 = sshll.u32 %s4714_s18, 3 }
  0x10   : > { %s9985_s19 = smov (!%p234_p5, %s4718_s19), 1  ;;  %4511 = vmatpush.msk.msra.mxu3 %vm541_vm0, %v373_v0  ;;  %vm933_vm4 = vmor %vm931_vm2, %vm932_vm3  ;;  %vm4254_vm9 = vcmask 1041408   ;;  %vm4221_vm10 = vcmask 80896   ;;  %p8449_p6 = scmp.lt.s32.totalorder %s4437_s13, 15 }
  0x11   : > { %s4514_s28 = smul.u32 432, %s9985_s19  ;;  %vm935_vm6 = vmor %vm933_vm4, %vm934_vm5  ;;  %s4439_s15 = sshll.u32 %s9985_s19, 5 }
  0x12   : > { %vm4871_vm8 = vmor %vm935_vm6, %vm936_vm7  ;;  %s9987_s13 = smov (!%p8449_p6, %s4437_s13), 15 }
  0x13   : > { %s238_s6 = scalar_lea.vmem %s8631_s0, %s4514_s28  ;;  %s4438_s18 = sshll.u32 %s9987_s13, 1 }
  0x14   : > { %s4805_s7 = scalar_lea.vmem %s238_s6, %s4442_s27  ;;  %s8499_s16 = sadd.s32 %s4439_s15, %s4438_s18 }
  0x15   : > { %v253_v1 = vld [vmem:[%s4805_s7] sm:$0xff]  ;;  %v254_v2 = vld [vmem:[%s4805_s7 + $0x8] sm:$0xff]  ;;  %v256_v9 = vld [vmem:[%s4805_s7 + $0x18] sm:$0xff]  ;;  %s4440_s19 = sshll.u32 %s8499_s16, 3 }
  0x16   : > { %v313_v3 = vrot.slane %v253_v1, 2  ;;  %v314_v4 = vrot.slane %v253_v1, 4  ;;  %v315_v5 = vrot.slane %v253_v1, 6  ;;  %374 = vst [vmem:[#allocation1] ss:$4 sm:$0xff] %v253_v1  ;;  %v316_v6 = vrot.slane %v254_v2, 2  ;;  %s8527_s26 = scalar_lea.vmem %s8636_s5, %s4440_s19 }
  0x17   : > { %382 = vst [vmem:[#allocation1 + $0x20] ss:$4 sm:$0xff] %v254_v2  ;;  %v317_v7 = vrot.slane %v254_v2, 4  ;;  %v318_v8 = vrot.slane %v254_v2, 6  ;;  %v255_v10 = vld [vmem:[%s4805_s7 + $0x10] sm:$0x3] }
  0x18   : > { %376 = vst [vmem:[#allocation1 + $0x1] ss:$4 sm:$0xff] %v313_v3  ;;  %v319_v11 = vrot.slane %v256_v9, 2  ;;  %v320_v13 = vrot.slane %v256_v9, 4  ;;  %v257_v14 = vld [vmem:[%s4805_s7 + $0x20] sm:$0xff]  ;;  %v321_v15 = vrot.slane %v256_v9, 6 }
  0x19   : > { %378 = vst [vmem:[#allocation1 + $0x2] ss:$4 sm:$0xff] %v314_v4  ;;  %v322_v17 = vrot.slane %v257_v14, 2  ;;  %v323_v18 = vrot.slane %v257_v14, 4  ;;  %v259_v19 = vld [vmem:[%s4805_s7 + $0x30] sm:$0xff]  ;;  %v324_v20 = vrot.slane %v257_v14, 6 }
  0x1a   : > { %380 = vst [vmem:[#allocation1 + $0x3] ss:$4 sm:$0xff] %v315_v5  ;;  %v258_v21 = vld [vmem:[%s4805_s7 + $0x28] sm:$0x3]  ;;  %v325_v23 = vrot.slane %v259_v19, 2  ;;  %v260_v24 = vld [vmem:[%s4805_s7 + $0x38] sm:$0xff] }
  0x1b   : > { %384 = vst [vmem:[#allocation1 + $0x21] ss:$4 sm:$0xff] %v316_v6  ;;  %v326_v25 = vrot.slane %v259_v19, 4  ;;  %v327_v26 = vrot.slane %v259_v19, 6  ;;  %v328_v28 = vrot.slane %v260_v24, 2  ;;  %v329_v29 = vrot.slane %v260_v24, 4 }
  0x1c   : > { %386 = vst [vmem:[#allocation1 + $0x22] ss:$4 sm:$0xff] %v317_v7  ;;  %v330_v30 = vrot.slane %v260_v24, 6  ;;  %v261_v32 = vld [vmem:[%s4805_s7 + $0x40] sm:$0x3]  ;;  %v262_v33 = vld [vmem:[%s4805_s7 + $0x48] sm:$0xff] }
  0x1d   : > { %388 = vst [vmem:[#allocation1 + $0x23] ss:$4 sm:$0xff] %v318_v8  ;;  %v331_v34 = vrot.slane %v262_v33, 2  ;;  %v263_v35 = vld [vmem:[%s4805_s7 + $0x50] sm:$0xff]  ;;  %v332_v36 = vrot.slane %v262_v33, 4  ;;  %v333_v38 = vrot.slane %v262_v33, 6 }
  0x1e   : > { %v334_v39 = vrot.slane %v263_v35, 2  ;;  %v335_v40 = vrot.slane %v263_v35, 4  ;;  %v336_v41 = vrot.slane %v263_v35, 6  ;;  %v265_v42 = vld [vmem:[%s4805_s7 + $0x60] sm:$0xff]  ;;  %v264_v44 = vld [vmem:[%s4805_s7 + $0x58] sm:$0x3] }
  0x1f   : > { %v337_v45 = vrot.slane %v265_v42, 2  ;;  %v338_v46 = vrot.slane %v265_v42, 4  ;;  %v339_v47 = vrot.slane %v265_v42, 6  ;;  %v266_v49 = vld [vmem:[%s4805_s7 + $0x68] sm:$0xff]  ;;  %v268_v54 = vld [vmem:[%s4805_s7 + $0x78] sm:$0xff]  ;;  %v269_v59 = vld [vmem:[%s4805_s7 + $0x80] sm:$0xff] }
  0x20   : > { %v340_v50 = vrot.slane %v266_v49, 2  ;;  %v341_v51 = vrot.slane %v266_v49, 4  ;;  %v342_v52 = vrot.slane %v266_v49, 6  ;;  %v267_v55 = vld [vmem:[%s4805_s7 + $0x70] sm:$0x3]  ;;  %v343_v56 = vrot.slane %v268_v54, 2 }
  0x21   : > { %v389_v12 = vld.sshfl [vmem:[#allocation1] sm:$0xff pattern:$0x73625140]  ;;  %v344_v57 = vrot.slane %v268_v54, 4  ;;  %v345_v60 = vrot.slane %v268_v54, 6  ;;  %v346_v61 = vrot.slane %v269_v59, 2 }
  0x22   : > { %4444 = vmatmul.msk.f32.vlgmr.msra.gmra.mxu0 %vm494_vm1, %v389_v12  ;;  %391 = vst [vmem:[#allocation1] ss:$4 sm:$0xff] %v255_v10  ;;  %v347_v63 = vrot.slane %v269_v59, 4  ;;  %v271_v0 = vld [vmem:[%s4805_s7 + $0x90] sm:$0xff]  ;;  %v348_v1 = vrot.slane %v269_v59, 6  ;;  %v272_v5 = vld [vmem:[%s4805_s7 + $0x98] sm:$0xff] }
  0x23   : > { %392 = vst [vmem:[#allocation1 + $0x1] ss:$4 sm:$0xff] %v256_v9  ;;  %v270_v2 = vld [vmem:[%s4805_s7 + $0x88] sm:$0x3]  ;;  %v349_v4 = vrot.slane %v271_v0, 2  ;;  %v350_v6 = vrot.slane %v271_v0, 4 }
  0x24   : > { %v390_v16 = vld.sshfl [vmem:[#allocation1 + $0x20] sm:$0xff pattern:$0x73625140]  ;;  %393 = vst [vmem:[#allocation1 + $0x2] ss:$4 sm:$0xff] %v319_v11  ;;  %v351_v7 = vrot.slane %v271_v0, 6 }
  0x25   : > { %394 = vst [vmem:[#allocation1 + $0x3] ss:$4 sm:$0xff] %v320_v13  ;;  %v352_v9 = vrot.slane %v272_v5, 2  ;;  %v353_v10 = vrot.slane %v272_v5, 4  ;;  %v354_v11 = vrot.slane %v272_v5, 6 }
  0x26   : > { %395 = vst [vmem:[#allocation1 + $0x20] ss:$4 sm:$0xff] %v321_v15  ;;  %v273_v12 = vld [vmem:[%s4805_s7 + $0xa0] sm:$0x3] }
  0x27   : > { %396 = vst [vmem:[#allocation1 + $0x21] ss:$4 sm:$0xff] %v257_v14  ;;  %v274_v14 = vld [vmem:[%s4805_s7 + $0xa8] sm:$0xff] }
  0x28   : > { %397 = vst [vmem:[#allocation1 + $0x22] ss:$4 sm:$0xff] %v322_v17  ;;  %v355_v15 = vrot.slane %v274_v14, 2  ;;  %v357_v17 = vrot.slane %v274_v14, 6 }
  0x29   : > { %398 = vst [vmem:[#allocation1 + $0x23] ss:$4 sm:$0xff] %v323_v18 }
  0x2a   : > { %4445 = vmatmul.msk.f32.gmra.mxu0 %vm494_vm1, %v390_v16  ;;  %v356_v16 = vrot.slane %v274_v14, 4 }
  0x2c   : > { %v399_v22 = vld.sshfl [vmem:[#allocation1] sm:$0xff pattern:$0x73625140] }
  0x2d   : > { %401 = vst [vmem:[#allocation1] ss:$4 sm:$0xff] %v324_v20 }
  0x2e   : > { %402 = vst [vmem:[#allocation1 + $0x1] ss:$4 sm:$0xff] %v258_v21 }
  0x2f   : > { %403 = vst [vmem:[#allocation1 + $0x2] ss:$4 sm:$0xff] %v259_v19  ;;  %v275_v19 = vld [vmem:[%s4805_s7 + $0xb0] sm:$0xff] }
  0x30   : > { %v400_v27 = vld.sshfl [vmem:[#allocation1 + $0x20] sm:$0xff pattern:$0x73625140]  ;;  %404 = vst [vmem:[#allocation1 + $0x3] ss:$4 sm:$0xff] %v325_v23  ;;  %v358_v20 = vrot.slane %v275_v19, 2 }
  0x31   : > { %405 = vst [vmem:[#allocation1 + $0x20] ss:$4 sm:$0xff] %v326_v25  ;;  %v359_v21 = vrot.slane %v275_v19, 4  ;;  %v277_v25 = vld [vmem:[%s4805_s7 + $0xc0] sm:$0xff] }
  0x32   : > { %4446 = vmatmul.msk.f32.gmra.mxu0 %vm494_vm1, %v399_v22  ;;  %406 = vst [vmem:[#allocation1 + $0x21] ss:$4 sm:$0xff] %v327_v26  ;;  %v360_v22 = vrot.slane %v275_v19, 6  ;;  %v361_v26 = vrot.slane %v277_v25, 2 }
  0x33   : > { %407 = vst [vmem:[#allocation1 + $0x22] ss:$4 sm:$0xff] %v260_v24  ;;  %v276_v24 = vld [vmem:[%s4805_s7 + $0xb8] sm:$0x3] }
  0x34   : > { %408 = vst [vmem:[#allocation1 + $0x23] ss:$4 sm:$0xff] %v328_v28  ;;  %v278_v28 = vld [vmem:[%s4805_s7 + $0xc8] sm:$0xff] }
  0x37   : > { %v409_v31 = vld.sshfl [vmem:[#allocation1] sm:$0xff pattern:$0x73625140] }
  0x38   : > { %411 = vst [vmem:[#allocation1] ss:$4 sm:$0xff] %v329_v29 }
  0x39   : > { %412 = vst [vmem:[#allocation1 + $0x1] ss:$4 sm:$0xff] %v330_v30  ;;  %v363_v30 = vrot.slane %v277_v25, 6 }
  0x3a   : > { %4447 = vmatmul.msk.f32.gmra.mxu0 %vm494_vm1, %v400_v27  ;;  %413 = vst [vmem:[#allocation1 + $0x2] ss:$4 sm:$0xff] %v261_v32  ;;  %v362_v27 = vrot.slane %v277_v25, 4  ;;  %v365_v32 = vrot.slane %v278_v28, 4 }
  0x3b   : > { %v410_v37 = vld.sshfl [vmem:[#allocation1 + $0x20] sm:$0xff pattern:$0x73625140]  ;;  %414 = vst [vmem:[#allocation1 + $0x3] ss:$4 sm:$0xff] %v262_v33 }
  0x3c   : > { %418 = vst [vmem:[#allocation1 + $0x23] ss:$4 sm:$0xff] %v263_v35  ;;  %v280_v35 = vld [vmem:[%s4805_s7 + $0xd8] sm:$0xff] }
  0x3d   : > { %415 = vst [vmem:[#allocation1 + $0x20] ss:$4 sm:$0xff] %v331_v34  ;;  %v366_v34 = vrot.slane %v278_v28, 6 }
  0x3e   : > { %416 = vst [vmem:[#allocation1 + $0x21] ss:$4 sm:$0xff] %v332_v36  ;;  %v279_v36 = vld [vmem:[%s4805_s7 + $0xd0] sm:$0x3] }
  0x3f   : > { %417 = vst [vmem:[#allocation1 + $0x22] ss:$4 sm:$0xff] %v333_v38 }
  0x42   : > { %4448 = vmatmul.msk.f32.gmra.mxu0 %vm494_vm1, %v409_v31  ;;  %v419_v43 = vld.sshfl [vmem:[#allocation1] sm:$0xff pattern:$0x73625140]  ;;  %v364_v31 = vrot.slane %v278_v28, 2 }
  0x43   : > { %421 = vst [vmem:[#allocation1] ss:$4 sm:$0xff] %v334_v39  ;;  %v368_v39 = vrot.slane %v280_v35, 4 }
  0x44   : > { %422 = vst [vmem:[#allocation1 + $0x1] ss:$4 sm:$0xff] %v335_v40  ;;  %v281_v40 = vld [vmem:[%s4805_s7 + $0xe0] sm:$0xff] }
  0x45   : > { %423 = vst [vmem:[#allocation1 + $0x2] ss:$4 sm:$0xff] %v336_v41  ;;  %v369_v41 = vrot.slane %v280_v35, 6 }
  0x46   : > { %424 = vst [vmem:[#allocation1 + $0x3] ss:$4 sm:$0xff] %v264_v44  ;;  %v420_v48 = vld.sshfl [vmem:[#allocation1 + $0x20] sm:$0xff pattern:$0x73625140]  ;;  %v371_v44 = vrot.slane %v281_v40, 4 }
  0x47   : > { %425 = vst [vmem:[#allocation1 + $0x20] ss:$4 sm:$0xff] %v265_v42 }
  0x48   : > { %426 = vst [vmem:[#allocation1 + $0x21] ss:$4 sm:$0xff] %v337_v45  ;;  %v4856_v45 = vld [vmem:[%s8633_s2] sm:$0xff] }
  0x49   : > { %427 = vst [vmem:[#allocation1 + $0x22] ss:$4 sm:$0xff] %v338_v46  ;;  %v372_v46 = vrot.slane %v281_v40, 6 }
  0x4a   : > { %4449 = vmatmul.msk.f32.gmra.mxu0 %vm494_vm1, %v410_v37  ;;  %428 = vst [vmem:[#allocation1 + $0x23] ss:$4 sm:$0xff] %v339_v47  ;;  %v367_v37 = vrot.slane %v280_v35, 2  ;;  %v926_v47 = vperm.slane %v4856_v45, 1 }
  0x4d   : > { %v429_v53 = vld.sshfl [vmem:[#allocation1] sm:$0xff pattern:$0x73625140] }
  0x4e   : > { %431 = vst [vmem:[#allocation1] ss:$4 sm:$0xff] %v266_v49  ;;  %v282_v49 = vld [vmem:[%s4805_s7 + $0xe8] sm:$0x3] }
  0x4f   : > { %432 = vst [vmem:[#allocation1 + $0x1] ss:$4 sm:$0xff] %v340_v50  ;;  %v928_v50 = vrot.slane %v926_v47, 2 }
  0x50   : > { %433 = vst [vmem:[#allocation1 + $0x2] ss:$4 sm:$0xff] %v341_v51  ;;  %v929_v51 = vrot.slane %v926_v47, 4 }
  0x51   : > { %434 = vst [vmem:[#allocation1 + $0x3] ss:$4 sm:$0xff] %v342_v52  ;;  %v430_v58 = vld.sshfl [vmem:[#allocation1 + $0x20] sm:$0xff pattern:$0x73625140]  ;;  %v4862_v52 = vrot.slane %v926_v47, 7 }
  0x52   : > { %4450 = vmatmul.msk.f32.gmra.mxu0 %vm494_vm1, %v419_v43  ;;  %435 = vst [vmem:[#allocation1 + $0x20] ss:$4 sm:$0xff] %v267_v55  ;;  %v370_v43 = vrot.slane %v281_v40, 2  ;;  %v930_v55 = vrot.slane %v926_v47, 6 }
  0x53   : > { %436 = vst [vmem:[#allocation1 + $0x21] ss:$4 sm:$0xff] %v268_v54  ;;  %v940_v54 = vrot.slane %v928_v50, 7 }
  0x54   : > { %437 = vst [vmem:[#allocation1 + $0x22] ss:$4 sm:$0xff] %v343_v56  ;;  %v943_v56 = vrot.slane %v929_v51, 7 }
  0x55   : > { %438 = vst [vmem:[#allocation1 + $0x23] ss:$4 sm:$0xff] %v344_v57  ;;  %v4865_v57 = vperm.slane %v4856_v45, 0 }
  0x56   : > { %9157 = vst [vmem:[#allocation2_spill] sm:$0xff] %v4862_v52 }
  0x57   : > { %9158 = vst [vmem:[#allocation3_spill] sm:$0xff] %v4865_v57 }
  0x58   : > { %v439_v62 = vld.sshfl [vmem:[#allocation1] sm:$0xff pattern:$0x73625140] }
  0x59   : > { %4454 = vmatmul.msk.f32.vlgmr.msra.gmra.mxu2 %vm494_vm1, %v439_v62  ;;  %441 = vst [vmem:[#allocation1] ss:$4 sm:$0xff] %v345_v60 }
  0x5a   : > { %4451 = vmatmul.msk.f32.gmra.mxu0 %vm494_vm1, %v420_v48  ;;  %442 = vst [vmem:[#allocation1 + $0x1] ss:$4 sm:$0xff] %v269_v59  ;;  %v939_v59 = vrot.slane %v4862_v52, 2 }
  0x5b   : > { %443 = vst [vmem:[#allocation1 + $0x2] ss:$4 sm:$0xff] %v346_v61  ;;  %v942_v61 = vrot.slane %v940_v54, 2 }
  0x5c   : > { %v440_v3 = vld.sshfl [vmem:[#allocation1 + $0x20] sm:$0xff pattern:$0x73625140]  ;;  %444 = vst [vmem:[#allocation1 + $0x3] ss:$4 sm:$0xff] %v347_v63  ;;  %v945_v63 = vrot.slane %v943_v56, 2 }
  0x5d   : > { %445 = vst [vmem:[#allocation1 + $0x20] ss:$4 sm:$0xff] %v348_v1  ;;  %v4876_v1 = vperm.slane %v4856_v45, 2 }
  0x5e   : > { %446 = vst [vmem:[#allocation1 + $0x21] ss:$4 sm:$0xff] %v270_v2  ;;  %v4879_v2 = vrot.slane %v4865_v57, 2 }
  0x5f   : > { %447 = vst [vmem:[#allocation1 + $0x22] ss:$4 sm:$0xff] %v271_v0  ;;  %v946_v0 = vrot.slane %v930_v55, 7 }
  0x60   : > { %448 = vst [vmem:[#allocation1 + $0x23] ss:$4 sm:$0xff] %v349_v4  ;;  %v4885_v4 = vrot.slane %v4865_v57, 6 }
  0x61   : > { %4455 = vmatmul.msk.f32.gmra.mxu2 %vm494_vm1, %v440_v3  ;;  %9161 = vst [vmem:[#allocation4_spill] sm:$0xff] %v4876_v1  ;;  %v4882_v3 = vrot.slane %v4865_v57, 4 }
  0x62   : > { %4452 = vmatmul.msk.f32.gmra.mxu0 %vm494_vm1, %v429_v53  ;;  %9162 = vst [vmem:[#allocation5_spill] sm:$0xff] %v4879_v2 }
  0x63   : > { %v449_v8 = vld.sshfl [vmem:[#allocation1] sm:$0xff pattern:$0x73625140]  ;;  %9163 = vst [vmem:[#allocation6_spill] sm:$0xff] %v4882_v3 }
  0x64   : > { %451 = vst [vmem:[#allocation1] ss:$4 sm:$0xff] %v350_v6 }
  0x65   : > { %452 = vst [vmem:[#allocation1 + $0x1] ss:$4 sm:$0xff] %v351_v7 }
  0x66   : > { %453 = vst [vmem:[#allocation1 + $0x2] ss:$4 sm:$0xff] %v272_v5  ;;  %v4889_v5 = vsel %vm4871_vm8, %v939_v59, %v940_v54 }
  0x67   : > { %v450_v13 = vld.sshfl [vmem:[#allocation1 + $0x20] sm:$0xff pattern:$0x73625140]  ;;  %454 = vst [vmem:[#allocation1 + $0x3] ss:$4 sm:$0xff] %v352_v9  ;;  %v4897_v9 = vrot.slane %v946_v0, 2 }
  0x68   : > { %455 = vst [vmem:[#allocation1 + $0x20] ss:$4 sm:$0xff] %v353_v10 }
  0x69   : > { %4456 = vmatmul.msk.f32.gmra.mxu2 %vm494_vm1, %v449_v8  ;;  %456 = vst [vmem:[#allocation1 + $0x21] ss:$4 sm:$0xff] %v354_v11  ;;  %v4895_v8 = vsel %vm4871_vm8, %v942_v61, %v943_v56 }
  0x6a   : > { %4453 = vmatmul.msk.f32.gmra.mxu0 %vm494_vm1, %v430_v58  ;;  %457 = vst [vmem:[#allocation1 + $0x22] ss:$4 sm:$0xff] %v273_v12  ;;  %v1700_v58 = vperm.slane %v4856_v45, 4 }
  0x6b   : > { %458 = vst [vmem:[#allocation1 + $0x23] ss:$4 sm:$0xff] %v274_v14  ;;  %v4904_v14 = vrot.slane %v4876_v1, 2 }
  0x6c   : > { %v1702_v62 = vrot.slane %v1700_v58, 2  ;;  %9164 = vst [vmem:[#allocation7_spill] sm:$0xff] %v4885_v4  ;;  %v4891_v7 = vrot.slane %v1700_v58, 7  ;;  %v1703_v10 = vrot.slane %v1700_v58, 4 }
  0x6d   : > { %9165 = vst [vmem:[#allocation8_spill] sm:$0xff] %v4889_v5 }
  0x6e   : > { %v459_v18 = vld.sshfl [vmem:[#allocation1] sm:$0xff pattern:$0x73625140]  ;;  %9166 = vst [vmem:[#allocation9_spill] sm:$0xff] %v4891_v7  ;;  %v1707_v11 = vrot.slane %v1702_v62, 7 }
  0x6f   : > { %461 = vst [vmem:[#allocation1] ss:$4 sm:$0xff] %v355_v15  ;;  %v4907_v15 = vperm.slane %v4856_v45, 3 }
  0x70   : > { %462 = vst [vmem:[#allocation1 + $0x1] ss:$4 sm:$0xff] %v356_v16  ;;  %v4910_v16 = vperm.slane %v4856_v45, 5 }
  0x71   : > { %4457 = vmatmul.msk.f32.gmra.mxu2 %vm494_vm1, %v450_v13  ;;  %463 = vst [vmem:[#allocation1 + $0x2] ss:$4 sm:$0xff] %v357_v17  ;;  %v4901_v13 = vsel %vm4871_vm8, %v945_v63, %v946_v0 }
  0x72   : > { %v460_v23 = vld.sshfl [vmem:[#allocation1 + $0x20] sm:$0xff pattern:$0x73625140]  ;;  %464 = vst [vmem:[#allocation1 + $0x3] ss:$4 sm:$0xff] %v275_v19 }
  0x73   : > { %465 = vst [vmem:[#allocation1 + $0x20] ss:$4 sm:$0xff] %v358_v20  ;;  %v1704_v20 = vrot.slane %v1700_v58, 6 }
  0x74   : > { %466 = vst [vmem:[#allocation1 + $0x21] ss:$4 sm:$0xff] %v359_v21 }
  0x75   : > { %467 = vst [vmem:[#allocation1 + $0x22] ss:$4 sm:$0xff] %v360_v22  ;;  %v4916_v22 = vrot.slane %v4876_v1, 4 }
  0x76   : > { %468 = vst [vmem:[#allocation1 + $0x23] ss:$4 sm:$0xff] %v276_v24  ;;  %v1706_v24 = vrot.slane %v4891_v7, 2 }
  0x77   : > { %9167 = vst [vmem:[#allocation10_spill] sm:$0xff] %v4895_v8 }
  0x78   : > { %9168 = vst [vmem:[#allocation11_spill] sm:$0xff] %v4897_v9 }
  0x79   : > { %4458 = vmatmul.msk.f32.gmra.mxu2 %vm494_vm1, %v459_v18  ;;  %v469_v29 = vld.sshfl [vmem:[#allocation1] sm:$0xff pattern:$0x73625140]  ;;  %9169 = vst [vmem:[#allocation12_spill] sm:$0xff] %v4901_v13 }
  0x7a   : > { %471 = vst [vmem:[#allocation1] ss:$4 sm:$0xff] %v277_v25 }
  0x7b   : > { %472 = vst [vmem:[#allocation1 + $0x1] ss:$4 sm:$0xff] %v361_v26  ;;  %v4927_v26 = vsel %vm4871_vm8, %v4897_v9, %v4862_v52 }
  0x7c   : > { %473 = vst [vmem:[#allocation1 + $0x2] ss:$4 sm:$0xff] %v362_v27  ;;  %v1709_v27 = vrot.slane %v1707_v11, 2 }
  0x7d   : > { %v470_v33 = vld.sshfl [vmem:[#allocation1 + $0x20] sm:$0xff pattern:$0x73625140]  ;;  %474 = vst [vmem:[#allocation1 + $0x3] ss:$4 sm:$0xff] %v363_v30  ;;  %v4931_v30 = vrot.slane %v4876_v1, 6 }
  0x7e   : > { %475 = vst [vmem:[#allocation1 + $0x20] ss:$4 sm:$0xff] %v278_v28  ;;  %v1710_v28 = vrot.slane %v1703_v10, 7 }
  0x7f   : > { %476 = vst [vmem:[#allocation1 + $0x21] ss:$4 sm:$0xff] %v364_v31  ;;  %v4934_v31 = vrot.slane %v4907_v15, 2 }
  0x80   : > { %477 = vst [vmem:[#allocation1 + $0x22] ss:$4 sm:$0xff] %v365_v32  ;;  %v4937_v32 = vrot.slane %v4907_v15, 4 }
  0x81   : > { %4459 = vmatmul.msk.f32.gmra.mxu2 %vm494_vm1, %v460_v23  ;;  %478 = vst [vmem:[#allocation1 + $0x23] ss:$4 sm:$0xff] %v366_v34  ;;  %v4919_v23 = vperm.slane %v4856_v45, 6 }
  0x82   : > { %9170 = vst [vmem:[#allocation13_spill] sm:$0xff] %v4904_v14 }
  0x83   : > { %9171 = vst [vmem:[#allocation14_spill] sm:$0xff] %v4907_v15 }
  0x84   : > { %v479_v38 = vld.sshfl [vmem:[#allocation1] sm:$0xff pattern:$0x73625140]  ;;  %9172 = vst [vmem:[#allocation15_spill] sm:$0xff] %v4910_v16 }
  0x85   : > { %481 = vst [vmem:[#allocation1] ss:$4 sm:$0xff] %v279_v36  ;;  %v4941_v36 = vrot.slane %v4910_v16, 2 }
  0x86   : > { %482 = vst [vmem:[#allocation1 + $0x1] ss:$4 sm:$0xff] %v280_v35  ;;  %v1713_v35 = vrot.slane %v1704_v20, 7 }
  0x87   : > { %483 = vst [vmem:[#allocation1 + $0x2] ss:$4 sm:$0xff] %v367_v37 }
  0x88   : > { %v480_v42 = vld.sshfl [vmem:[#allocation1 + $0x20] sm:$0xff pattern:$0x73625140]  ;;  %484 = vst [vmem:[#allocation1 + $0x3] ss:$4 sm:$0xff] %v368_v39 }
  0x89   : > { %4460 = vmatmul.msk.f32.gmra.mxu2 %vm494_vm1, %v469_v29  ;;  %485 = vst [vmem:[#allocation1 + $0x20] ss:$4 sm:$0xff] %v369_v41 }
  0x8a   : > { %486 = vst [vmem:[#allocation1 + $0x21] ss:$4 sm:$0xff] %v281_v40  ;;  %v4946_v40 = vsel %vm4871_vm8, %v1706_v24, %v1707_v11 }
  0x8b   : > { %487 = vst [vmem:[#allocation1 + $0x22] ss:$4 sm:$0xff] %v370_v43  ;;  %v4951_v43 = vsel %vm4871_vm8, %v1709_v27, %v1710_v28 }
  0x8c   : > { %488 = vst [vmem:[#allocation1 + $0x23] ss:$4 sm:$0xff] %v371_v44  ;;  %v1712_v44 = vrot.slane %v1710_v28, 2 }
  0x8d   : > { %9173 = vst [vmem:[#allocation16_spill] sm:$0xff] %v4916_v22 }
  0x8e   : > { %9174 = vst [vmem:[#allocation17_spill] sm:$0xff] %v4919_v23 }
  0x8f   : > { %v489_v48 = vld.sshfl [vmem:[#allocation1] sm:$0xff pattern:$0x73625140]  ;;  %9175 = vst [vmem:[#allocation18_spill] sm:$0xff] %v4927_v26 }
  0x90   : > { %4464 = vmatmul.msk.f32.vlgmr.msra.gmra.mxu3 %vm494_vm1, %v489_v48  ;;  %491 = vst [vmem:[#allocation1] ss:$4 sm:$0xff] %v372_v46 }
  0x91   : > { %4461 = vmatmul.msk.f32.gmra.mxu2 %vm494_vm1, %v470_v33  ;;  %492 = vst [vmem:[#allocation1 + $0x1] ss:$4 sm:$0xff] %v282_v49 }
  0x92   : > { %9176 = vst [vmem:[#allocation19_spill] sm:$0xff] %v4931_v30 }
  0x93   : > { %v490_v53 = vld.sshfl [vmem:[#allocation1 + $0x20] sm:$0xff pattern:$0x73625140]  ;;  %9177 = vst [vmem:[#allocation20_spill] sm:$0xff] %v4934_v31 }
  0x94   : > { %9178 = vst [vmem:[#allocation21_spill] sm:$0xff] %v4937_v32 }
  0x95   : > { %9179 = vst [vmem:[#allocation22_spill] sm:$0xff] %v4941_v36 }
  0x96   : > { %9180 = vst [vmem:[#allocation23_spill] sm:$0xff] %v4946_v40 }
  0x97   : > { %9181 = vst [vmem:[#allocation24_spill] sm:$0xff] %v4951_v43 }
  0x98   : > { %4465 = vmatmul.msk.f32.gmra.mxu3 %vm494_vm1, %v490_v53  ;;  %v493_v6 = vld.sshfl [vmem:[#allocation1] sm:$0xff pattern:$0x73625140] }
  0x99   : > { %4462 = vmatmul.msk.f32.gmra.mxu2 %vm494_vm1, %v479_v38 }
  0x9f   : > { %v562_v12 = vpop.f32.mrf.mxu0 }
  0xa0   : > { %v654_v17 = vrot.slane %v562_v12, 2  ;;  %v655_v18 = vrot.slane %v562_v12, 4  ;;  %v656_v19 = vrot.slane %v562_v12, 6  ;;  %4466 = vmatmul.msk.f32.gmra.mxu3 %vm494_vm1, %v493_v6  ;;  %v956_v21 = vmul.f32 %v4862_v52, %v562_v12 }
  0xa1   : > { %4463 = vmatmul.msk.f32.gmra.mxu2 %vm494_vm1, %v480_v42  ;;  %v798_v37 = vmul.f32 %v4865_v57, %v562_v12  ;;  %v4967_v6 = vsel %vm4871_vm8, %v1712_v44, %v1713_v35  ;;  %v4972_v12 = vrot.slane %v4907_v15, 6 }
  0xa2   : > { %v957_v25 = vmul.f32 %v4889_v5, %v654_v17  ;;  %v958_v29 = vmul.f32 %v4895_v8, %v655_v18  ;;  %v959_v33 = vmul.f32 %v4901_v13, %v656_v19  ;;  %v4467_v38 = vrot.slane %v956_v21, 9  ;;  %9182 = vst [vmem:[#allocation25_spill] sm:$0xff] %v4967_v6 }
  0xa3   : > { %v799_v41 = vmul.f32 %v4879_v2, %v654_v17  ;;  %v800_v46 = vmul.f32 %v4882_v3, %v655_v18  ;;  %v801_v47 = vmul.f32 %v4885_v4, %v656_v19  ;;  %v1436_v53 = vmul.f32 %v4876_v1, %v654_v17  ;;  %9183 = vst [vmem:[#allocation26_spill] sm:$0xff] %v4972_v12 }
  0xa4   : > { %v1102_v34 = vrot.slane %v957_v25, 7  ;;  %v1105_v39 = vrot.slane %v958_v29, 7  ;;  %v1108_v51 = vrot.slane %v959_v33, 7  ;;  %v1437_v58 = vmul.f32 %v4904_v14, %v655_v18 }
  0xa5   : > { %v1438_v59 = vmul.f32 %v4916_v22, %v656_v19  ;;  %v4975_v17 = vrot.slane %v4910_v16, 4  ;;  %v4977_v21 = vrot.slane %v1713_v35, 2 }
  0xa6   : > { %v1104_v42 = vrot.slane %v1102_v34, 2  ;;  %v1103_v48 = vsel %vm4871_vm8, %v4467_v38, %v1102_v34  ;;  %v1107_v49 = vrot.slane %v1105_v39, 2  ;;  %v1110_v18 = vrot.slane %v1108_v51, 2 }
  0xa7   : > { %v565_v50 = vpop.f32.mrf.mxu0  ;;  %v1364_v63 = vadd.f32 %v1103_v48, %v798_v37  ;;  %9184 = vst [vmem:[#allocation27_spill] sm:$0xff] %v4975_v17 }
  0xa8   : > { %v657_v54 = vrot.slane %v565_v50, 2  ;;  %v658_v55 = vrot.slane %v565_v50, 4  ;;  %v1106_v56 = vsel %vm4871_vm8, %v1104_v42, %v1105_v39  ;;  %v659_v61 = vrot.slane %v565_v50, 6  ;;  %9185 = vst [vmem:[#allocation28_spill] sm:$0xff] %v4977_v21 }
  0xa9   : > { %v1109_v62 = vsel %vm4871_vm8, %v1107_v49, %v1108_v51  ;;  %v960_v0 = vmul.f32 %v4927_v26, %v565_v50  ;;  %v1365_v19 = vadd.f32 %v1106_v56, %v799_v41  ;;  %v4980_v29 = vadd.f32 %v1436_v53, %v1364_v63 }
  0xaa   : > { %v961_v10 = vmul.f32 %v4889_v5, %v657_v54  ;;  %v962_v11 = vmul.f32 %v4895_v8, %v658_v55  ;;  %v1366_v24 = vadd.f32 %v1109_v62, %v800_v46  ;;  %v963_v25 = vmul.f32 %v4901_v13, %v659_v61 }
  0xab   : > { %v1111_v20 = vrot.slane %v960_v0, 7  ;;  %v802_v33 = vmul.f32 %v4865_v57, %v565_v50  ;;  %v803_v34 = vmul.f32 %v4879_v2, %v657_v54  ;;  %v804_v38 = vmul.f32 %v4882_v3, %v658_v55 }
  0xac   : > { %v1114_v27 = vrot.slane %v961_v10, 7  ;;  %v1117_v28 = vrot.slane %v962_v11, 7  ;;  %v1501_v51 = vadd.f32 %v1437_v58, %v1365_v19  ;;  %v1502_v53 = vadd.f32 %v1438_v59, %v1366_v24 }
  0xad   : > { %v1113_v37 = vrot.slane %v1111_v20, 2  ;;  %v1112_v39 = vsel %vm4871_vm8, %v1110_v18, %v1111_v20  ;;  %v1120_v56 = vrot.slane %v963_v25, 7  ;;  %v1439_v62 = vmul.f32 %v4931_v30, %v565_v50 }
  0xae   : > { %v1116_v41 = vrot.slane %v1114_v27, 2  ;;  %v1119_v35 = vrot.slane %v1117_v28, 2  ;;  %v1367_v0 = vadd.f32 %v1112_v39, %v801_v47  ;;  %v1440_v10 = vmul.f32 %v4876_v1, %v657_v54 }
  0xaf   : > { %v568_v42 = vpop.f32.mrf.mxu0  ;;  %v1115_v44 = vsel %vm4871_vm8, %v1113_v37, %v1114_v27  ;;  %v1441_v11 = vmul.f32 %v4904_v14, %v658_v55  ;;  %v1442_v59 = vmul.f32 %v4916_v22, %v659_v61  ;;  %v805_v50 = vmul.f32 %v4885_v4, %v659_v61 }
  0xb0   : > { %v660_v46 = vrot.slane %v568_v42, 2  ;;  %v661_v48 = vrot.slane %v568_v42, 4  ;;  %v4989_v49 = vrot.slane %v568_v42, 6  ;;  %v1118_v63 = vsel %vm4871_vm8, %v1116_v41, %v1117_v28 }
  0xb1   : > { %v1121_v18 = vsel %vm4871_vm8, %v1119_v35, %v1120_v56  ;;  %v1368_v20 = vadd.f32 %v1115_v44, %v802_v33  ;;  %v964_v27 = vmul.f32 %v4897_v9, %v568_v42  ;;  %v1369_v54 = vadd.f32 %v1118_v63, %v803_v34 }
  0xb2   : > { %v965_v58 = vmul.f32 %v4862_v52, %v660_v46  ;;  %v966_v19 = vmul.f32 %v4889_v5, %v661_v48  ;;  %v967_v47 = vmul.f32 %v4895_v8, %v4989_v49  ;;  %v1122_v24 = vrot.slane %v1120_v56, 2 }
  0xb3   : > { %v1123_v55 = vrot.slane %v964_v27, 7  ;;  %v1370_v28 = vadd.f32 %v1121_v18, %v804_v38  ;;  %v5005_v37 = vadd.f32 %v1439_v62, %v1367_v0  ;;  %v806_v33 = vmul.f32 %v4865_v57, %v660_v46 }
  0xb4   : > { %v4468_v25 = vrot.slane %v965_v58, 9  ;;  %v1127_v39 = vrot.slane %v966_v19, 7  ;;  %v5008_v41 = vadd.f32 %v1440_v10, %v1368_v20  ;;  %v807_v35 = vmul.f32 %v4879_v2, %v661_v48 }
  0xb5   : > { %v1124_v61 = vsel %vm4871_vm8, %v1122_v24, %v1123_v55  ;;  %v1723_v44 = vmul.f32 %v4891_v7, %v660_v46  ;;  %v808_v34 = vmul.f32 %v4882_v3, %v4989_v49  ;;  %v1130_v62 = vrot.slane %v967_v47, 7 }
  0xb6   : > { %v1128_v38 = vsel %vm4871_vm8, %v4468_v25, %v1127_v39  ;;  %v1129_v56 = vrot.slane %v1127_v39, 2  ;;  %v5018_v63 = vadd.f32 %v1441_v11, %v1369_v54  ;;  %v1572_v0 = vmul.f32 %v4907_v15, %v660_v46 }
  0xb7   : > { %v571_v5 = vpop.f32.mrf.mxu0  ;;  %v1573_v10 = vmul.f32 %v4934_v31, %v661_v48  ;;  %v1574_v18 = vmul.f32 %v4937_v32, %v4989_v49  ;;  %v1371_v27 = vadd.f32 %v1124_v61, %v805_v50  ;;  %v1372_v58 = vadd.f32 %v1128_v38, %v806_v33 }
  0xb8   : > { %v1131_v20 = vsel %vm4871_vm8, %v1129_v56, %v1130_v62  ;;  %v1724_v19 = vmul.f32 %v4946_v40, %v661_v48  ;;  %v5027_v24 = vadd.f32 %v1442_v59, %v1370_v28  ;;  %v1443_v47 = vmul.f32 %v4931_v30, %v568_v42 }
  0xb9   : > { %v5032_v11 = vmul.f32 %v4951_v43, %v4989_v49  ;;  %v4475_v46 = vrot.slane %v1723_v44, 9  ;;  %v1373_v54 = vadd.f32 %v1131_v20, %v807_v35  ;;  %v1444_v55 = vmul.f32 %v4876_v1, %v661_v48 }
  0xba   : > { %v1869_v25 = vrot.slane %v1724_v19, 7  ;;  %v5035_v39 = vrot.slane %v571_v5, 2  ;;  %v1132_v56 = vrot.slane %v1130_v62, 2  ;;  %v1445_v50 = vmul.f32 %v4904_v14, %v4989_v49 }
  0xbb   : > { %v1636_v59 = vadd.f32 %v1572_v0, %v4980_v29  ;;  %v5040_v28 = vadd.f32 %v1573_v10, %v1501_v51  ;;  %v1507_v42 = vadd.f32 %v1443_v47, %v1371_v27  ;;  %v5042_v33 = vadd.f32 %v1444_v55, %v1372_v58 }
  0xbc   : > { %9186 = vst [vmem:[#allocation29_spill] sm:$0xff] %v5035_v39  ;;  %v5044_v61 = vadd.f32 %v1574_v18, %v1502_v53  ;;  %v968_v35 = vmul.f32 %v4901_v13, %v571_v5  ;;  %v1870_v44 = vsel %vm4871_vm8, %v4475_v46, %v1869_v25  ;;  %v8639_v38 = vrot.slane %v5032_v11, 7 }
  0xbd   : > { %9187 = vst [vmem:[#allocation30_spill] sm:$0xff] %v5042_v33  ;;  %v2203_v62 = vmul.f32 %v4910_v16, %v661_v48  ;;  %v969_v20 = vmul.f32 %v4927_v26, %v5035_v39  ;;  %v5053_v51 = vadd.f32 %v1445_v50, %v1373_v54  ;;  %v5057_v0 = vmul.f32 %v4941_v36, %v4989_v49 }
  0xbe   : > { %v5059_v53 = vrot.slane %v571_v5, 6  ;;  %v1133_v10 = vrot.slane %v968_v35, 7  ;;  %v5061_v18 = vrot.slane %v571_v5, 4  ;;  %v809_v27 = vmul.f32 %v4885_v4, %v571_v5 }
  0xbf   : > { %v574_v29 = vpop.f32.mrf.mxu0  ;;  %9188 = vst [vmem:[#allocation31_spill] sm:$0xff] %v5053_v51  ;;  %v1136_v58 = vrot.slane %v969_v20, 7  ;;  %v5065_v48 = vmul.f32 %v4967_v6, %v571_v5  ;;  %v2131_v19 = vadd.f32 %v1870_v44, %v1636_v59  ;;  %v1871_v49 = vrot.slane %v1869_v25, 2 }
  0xc0   : > { %v1134_v47 = vsel %vm4871_vm8, %v1132_v56, %v1133_v10  ;;  %v1135_v46 = vrot.slane %v1133_v10, 2  ;;  %v5069_v54 = vrot.slane %v574_v29, 2  ;;  %v5073_v55 = vrot.slane %v8639_v38, 2 }
  0xc1   : > { %v1374_v50 = vadd.f32 %v1134_v47, %v808_v34  ;;  %v1446_v35 = vmul.f32 %v4916_v22, %v571_v5  ;;  %v1447_v59 = vmul.f32 %v4931_v30, %v5035_v39  ;;  %v1575_v44 = vmul.f32 %v4972_v12, %v571_v5 }
  0xc2   : > { %v1137_v20 = vsel %vm4871_vm8, %v1135_v46, %v1136_v58  ;;  %v5083_v56 = vmul.f32 %v4895_v8, %v5059_v53  ;;  %v1875_v38 = vrot.slane %v5065_v48, 7  ;;  %v972_v34 = vmul.f32 %v4901_v13, %v574_v29 }
  0xc3   : > { %v1375_v25 = vadd.f32 %v1137_v20, %v809_v27  ;;  %v5085_v10 = vadd.f32 %v1446_v35, %v1374_v50  ;;  %v2267_v47 = vadd.f32 %v2203_v62, %v2131_v19  ;;  %v5090_v26 = vmul.f32 %v4975_v17, %v571_v5 }
  0xc4   : > { %9189 = vst [vmem:[#allocation32_spill] sm:$0xff] %v5083_v56  ;;  %v973_v46 = vmul.f32 %v4897_v9, %v5069_v54  ;;  %v8648_v14 = vrot.slane %v5083_v56, 7  ;;  %v5097_v1 = vrot.slane %v574_v29, 4  ;;  %v1145_v27 = vrot.slane %v972_v34, 7 }
  0xc5   : > { %9190 = vst [vmem:[#allocation33_spill] sm:$0xff] %v5085_v10  ;;  %v5095_v2 = vadd.f32 %v1447_v59, %v1375_v25  ;;  %v1579_v50 = vmul.f32 %v4972_v12, %v574_v29  ;;  %v5100_v35 = vrot.slane %v1136_v58, 2  ;;  %v5103_v48 = vadd.f32 %v1575_v44, %v5005_v37 }
  0xc6   : > { %9192 = vst [vmem:[#allocation35_spill] sm:$0xff] %v5097_v1  ;;  %v1144_v5 = vrot.slane %v8648_v14, 2  ;;  %v5108_v62 = vmul.f32 %v4967_v6, %v574_v29  ;;  %v5110_v19 = vrot.slane %v1875_v38, 2  ;;  %v5112_v20 = vrot.slane %v574_v29, 6 }
  0xc7   : > { %9191 = vst [vmem:[#allocation34_spill] sm:$0xff] %v5095_v2  ;;  %v812_v59 = vmul.f32 %v4882_v3, %v5059_v53  ;;  %v813_v25 = vmul.f32 %v4885_v4, %v574_v29  ;;  %v1147_v37 = vrot.slane %v1145_v27, 2  ;;  %v1148_v44 = vrot.slane %v973_v46, 7  ;;  %v5119_v34 = vpop.f32.mrf.mxu0 }
  0xc8   : > { %9193 = vst [vmem:[#allocation36_spill] sm:$0xff] %v5100_v35  ;;  %v1146_v58 = vsel %vm4871_vm8, %v1144_v5, %v1145_v27  ;;  %v2467_v14 = vperm.slane %v4856_v45, 7  ;;  %v1450_v2 = vmul.f32 %v4916_v22, %v574_v29  ;;  %v1451_v12 = vmul.f32 %v4931_v30, %v5069_v54 }
  0xc9   : > { %9194 = vst [vmem:[#allocation37_spill] sm:$0xff] %v5112_v20  ;;  %v1378_v56 = vadd.f32 %v1146_v58, %v812_v59  ;;  %v5125_v35 = vadd.f32 %v1579_v50, %v1507_v42  ;;  %v5129_v3 = vmul.f32 %v4977_v21, %v5069_v54  ;;  %v5135_v45 = vmul.f32 %v4975_v17, %v574_v29 }
  0xca   : > { %9195 = vst [vmem:[#allocation38_spill] sm:$0xff] %v5119_v34  ;;  %v2469_v27 = vrot.slane %v2467_v14, 2  ;;  %v2470_v46 = vrot.slane %v2467_v14, 4  ;;  %v5138_v59 = vrot.slane %v5119_v34, 2  ;;  %v5140_v58 = vrot.slane %v2467_v14, 7 }
  0xcb   : > { %9196 = vst [vmem:[#allocation39_spill] sm:$0xff] %v5125_v35  ;;  %v5132_v10 = vadd.f32 %v1450_v2, %v1378_v56  ;;  %v1149_v42 = vsel %vm4871_vm8, %v1147_v37, %v1148_v44  ;;  %v9200_v6 = vrot.slane %v5032_v11, 7  ;;  %v2339_v2 = vmul.f32 %v4919_v23, %v5097_v1  ;;  %v5156_v37 = vld [vmem:[%s8633_s2 + $0x8] ss:$0 sm:$0xff] }
  0xcc   : > { %9198 = vst [vmem:[#allocation41_spill] sm:$0xff] %v5138_v59  ;;  %v2474_v50 = vrot.slane %v2469_v27, 7  ;;  %v2477_v22 = vrot.slane %v2470_v46, 7  ;;  %v2471_v29 = vrot.slane %v2467_v14, 6  ;;  %v2473_v56 = vrot.slane %v5140_v58, 2 }
  0xcd   : > { %9197 = vst [vmem:[#allocation40_spill] sm:$0xff] %v5132_v10  ;;  %v1873_v5 = vsel %vm4871_vm8, %v1871_v49, %v9200_v6  ;;  %v2490_v10 = vmul.f32 %v5140_v58, %v5097_v1  ;;  %v9202_v44 = vrot.slane %v5108_v62, 7  ;;  %v5163_v6 = vrot.slane %v5119_v34, 4 }
  0xce   : > { %9199 = vst [vmem:[#allocation42_spill] sm:$0xff] %v5140_v58  ;;  %v5166_v49 = vrot.slane %v5119_v34, 6  ;;  %v2476_v14 = vrot.slane %v2474_v50, 2  ;;  %v1379_v27 = vadd.f32 %v1149_v42, %v813_v25  ;;  %v5170_v46 = vsel %vm4871_vm8, %v2473_v56, %v2474_v50 }
  0xcf   : > { %9201 = vst [vmem:[#allocation43_spill] sm:$0xff] %v5156_v37  ;;  %v5160_v11 = vrot.slane %v9202_v44, 2  ;;  %v2132_v17 = vadd.f32 %v1873_v5, %v5040_v28  ;;  %v5174_v8 = vrot.slane %v4919_v23, 2  ;;  %v2491_v44 = vmul.f32 %v5170_v46, %v5112_v20 }
  0xd0   : > { %9203 = vst [vmem:[#allocation44_spill] sm:$0xff] %v5170_v46  ;;  %v4483_v57 = vrot.slane %v2490_v10, 9  ;;  %v5180_v52 = vsel %vm4871_vm8, %v2476_v14, %v2477_v22  ;;  %v1876_v25 = vsel %vm4871_vm8, %v5073_v55, %v1875_v38  ;;  %v2403_v42 = vadd.f32 %v2339_v2, %v2267_v47 }
  0xd1   : > { %9204 = vst [vmem:[#allocation45_spill] sm:$0xff] %v5174_v8  ;;  %v2480_v50 = vrot.slane %v2471_v29, 7  ;;  %v2970_v28 = vmul.f32 %v5156_v37, %v5112_v20  ;;  %v2492_v5 = vmul.f32 %v5180_v52, %v5119_v34  ;;  %v2636_v56 = vrot.slane %v2491_v44, 7 }
  0xd2   : > { %9205 = vst [vmem:[#allocation46_spill] sm:$0xff] %v5180_v52  ;;  %v2133_v33 = vadd.f32 %v1876_v25, %v5044_v61  ;;  %v5191_v10 = vrot.slane %v4919_v23, 4  ;;  %v2479_v14 = vrot.slane %v2477_v22, 2  ;;  %v5193_v1 = vadd.f32 %v1451_v12, %v1379_v27  ;;  %v5209_v12 = vld [vmem:[%s8634_s3] ss:$0 sm:$0xff] }
  0xd3   : > { %v2268_v51 = vadd.f32 %v5057_v0, %v2132_v17  ;;  %v2340_v38 = vmul.f32 %v5174_v8, %v5112_v20  ;;  %v2639_v55 = vrot.slane %v2492_v5, 7  ;;  %v2637_v47 = vsel %vm4871_vm8, %v4483_v57, %v2636_v56 }
  0xd4   : > { %9206 = vst [vmem:[#allocation47_spill] sm:$0xff] %v5191_v10  ;;  %v2638_v2 = vrot.slane %v2636_v56, 2  ;;  %v2341_v29 = vmul.f32 %v5191_v10, %v5119_v34  ;;  %v5204_v61 = vsel %vm4871_vm8, %v2479_v14, %v2480_v50  ;;  %v2898_v22 = vadd.f32 %v2637_v47, %v2403_v42  ;;  %v5224_v56 = vpop.f32.mrf.mxu0 }
  0xd5   : > { %9207 = vst [vmem:[#allocation48_spill] sm:$0xff] %v5193_v1  ;;  %v5212_v17 = vrot.slane %v5156_v37, 2  ;;  %v2493_v57 = vmul.f32 %v5204_v61, %v5138_v59  ;;  %v2641_v0 = vrot.slane %v2639_v55, 2  ;;  %v2269_v44 = vadd.f32 %v5090_v26, %v2133_v33 }
  0xd6   : > { %9208 = vst [vmem:[#allocation49_spill] sm:$0xff] %v5204_v61  ;;  %v2640_v27 = vsel %vm4871_vm8, %v2638_v2, %v2639_v55  ;;  %v5220_v25 = vrot.slane %v5156_v37, 4  ;;  %v5222_v42 = vrot.slane %v2480_v50, 2  ;;  %v3034_v5 = vadd.f32 %v2970_v28, %v2898_v22 }
  0xd7   : > { %9209 = vst [vmem:[#allocation50_spill] sm:$0xff] %v5212_v17  ;;  %v2404_v14 = vadd.f32 %v2340_v38, %v2268_v51  ;;  %v2642_v47 = vrot.slane %v2493_v57, 7  ;;  %v5230_v1 = vsel %vm4871_vm8, %v4977_v21, %v4891_v7  ;;  %v2405_v35 = vadd.f32 %v2341_v29, %v2269_v44 }
  0xd8   : > { %9210 = vst [vmem:[#allocation51_spill] sm:$0xff] %v5220_v25  ;;  %v5233_v55 = vrot.slane %v5209_v12, 4  ;;  %v1727_v26 = vmul.f32 %v5230_v1, %v5035_v39  ;;  %v5239_v33 = vmul.f32 %v4946_v40, %v5061_v18  ;;  %v5242_v51 = vadd.f32 %v5209_v12, %v3034_v5 }
  0xd9   : > { %9211 = vst [vmem:[#allocation52_spill] sm:$0xff] %v5222_v42  ;;  %v2899_v50 = vadd.f32 %v2640_v27, %v2404_v14  ;;  %v2643_v28 = vsel %vm4871_vm8, %v2641_v0, %v2642_v47  ;;  %v1576_v38 = vmul.f32 %v4907_v15, %v5035_v39  ;;  %v2972_v22 = vmul.f32 %v5220_v25, %v5138_v59 }
  0xda   : > { %9212 = vst [vmem:[#allocation53_spill] sm:$0xff] %v5230_v1  ;;  %v2900_v29 = vadd.f32 %v2643_v28, %v2405_v35  ;;  %v1878_v57 = vrot.slane %v1727_v26, 7  ;;  %v5256_v44 = vsel %vm4871_vm8, %v5222_v42, %v5140_v58  ;;  %3812 = vrot.lane.b32.xlu0 %v5242_v51, %s4732_s14  ;;  %v5264_v27 = vrot.slane %v5224_v56, 2 }
  0xdb   : > { %9213 = vst [vmem:[#allocation54_spill] sm:$0xff] %v5233_v55  ;;  %v5267_v35 = vrot.slane %v5224_v56, 6  ;;  %v2971_v5 = vmul.f32 %v5212_v17, %v5119_v34  ;;  %v8681_v28 = vrot.slane %v5239_v33, 7  ;;  %v2494_v1 = vmul.f32 %v5256_v44, %v5163_v6 }
  0xdc   : > { %9214 = vst [vmem:[#allocation55_spill] sm:$0xff] %v5242_v51  ;;  %v5248_v2 = vpop.f32.mrf.mxu2  ;;  %v3036_v14 = vadd.f32 %v2972_v22, %v2900_v29  ;;  %v1880_v26 = vrot.slane %v1878_v57, 2  ;;  %v5275_v58 = vrot.slane %v5209_v12, 2 }
  0xdd   : > { %9215 = vst [vmem:[#allocation56_spill] sm:$0xff] %v5248_v2  ;;  %v5261_v0 = vrot.slane %v5248_v2, 6  ;;  %v3035_v51 = vadd.f32 %v2971_v5, %v2899_v50  ;;  %v5291_v50 = vmul.f32 %v5170_v46, %v5166_v49  ;;  %v2645_v22 = vrot.slane %v2494_v1, 7 }
  0xde   : > { %9216 = vst [vmem:[#allocation57_spill] sm:$0xff] %v5256_v44  ;;  %v5283_v15 = vadd.f32 %v5233_v55, %v3036_v14  ;;  %v1882_v29 = vsel %vm4871_vm8, %v1880_v26, %v8681_v28  ;;  %v5294_v5 = vrot.slane %v4910_v16, 6  ;;  %v5301_v14 = vrot.slane %v5248_v2, 2 }
  0xdf   : > { %9217 = vst [vmem:[#allocation58_spill] sm:$0xff] %v5261_v0  ;;  %v5279_v7 = vmul.f32 %v4901_v13, %v5261_v0  ;;  %v2647_v26 = vrot.slane %v2645_v22, 2  ;;  %v1879_v1 = vsel %vm4871_vm8, %v5110_v19, %v1878_v57  ;;  %v5309_v28 = vrot.slane %v4919_v23, 6 }
  0xe0   : > { %9218 = vst [vmem:[#allocation59_spill] sm:$0xff] %v5267_v35  ;;  %v1640_v35 = vadd.f32 %v1576_v38, %v5008_v41  ;;  %v2207_v41 = vmul.f32 %v4910_v16, %v5061_v18  ;;  %v2343_v38 = vmul.f32 %v4919_v23, %v5163_v6  ;;  %3816 = vrot.lane.b32.xlu1 %v5283_v15, %s4732_s14  ;;  %v2648_v57 = vrot.slane %v5291_v50, 7 }
  0xe1   : > { %9219 = vst [vmem:[#allocation60_spill] sm:$0xff] %v5275_v58  ;;  %v837_v19 = vmul.f32 %v4885_v4, %v5261_v0 }
  0xe2   : > { %9220 = vst [vmem:[#allocation61_spill] sm:$0xff] %v5279_v7  ;;  %v2135_v13 = vadd.f32 %v1882_v29, %v1640_v35  ;;  %v5312_v35 = vrot.slane %v5248_v2, 4  ;;  %v5315_v29 = vadd.f32 %v5275_v58, %v3035_v51  ;;  %v2974_v2 = vmul.f32 %v5156_v37, %v5166_v49 }
  0xe3   : > { %9221 = vst [vmem:[#allocation62_spill] sm:$0xff] %v5283_v15  ;;  %v2134_v15 = vadd.f32 %v1879_v1, %v5103_v48  ;;  %v2206_v48 = vmul.f32 %v5294_v5, %v5035_v39  ;;  %v2342_v1 = vmul.f32 %v5309_v28, %v5138_v59  ;;  %v2649_v50 = vsel %vm4871_vm8, %v2647_v26, %v2648_v57 }
  0xe4   : > { %9222 = vst [vmem:[#allocation63_spill] sm:$0xff] %v5294_v5  ;;  %v5321_v16 = vpop.f32.mrf.mxu2  ;;  %3814 = vrot.lane.b32.xlu0 %v5315_v29, %s4732_s14  ;;  %v2271_v44 = vadd.f32 %v2207_v41, %v2135_v13  ;;  %v9232_v13 = vrot.slane %v5279_v7, 7 }
  0xe5   : > { %9223 = vst [vmem:[#allocation64_spill] sm:$0xff] %v5301_v14  ;;  %v5318_v14 = vpop.f32.mrf.mxu0  ;;  %v1000_v51 = vmul.f32 %v4897_v9, %v5321_v16  ;;  %v2270_v39 = vadd.f32 %v2206_v48, %v2134_v15  ;;  %v5353_v59 = vrot.slane %v5321_v16, 2  ;;  %v5356_v26 = vrot.slane %v5321_v16, 4 }
  0xe6   : > { %9224 = vst [vmem:[#allocation65_spill] sm:$0xff] %v5309_v28  ;;  %v5339_v4 = vrot.slane %v5318_v14, 2  ;;  %v1222_v41 = vrot.slane %v9232_v13, 2  ;;  %v2407_v9 = vadd.f32 %v2343_v38, %v2271_v44  ;;  %v5350_v0 = vrot.slane %v5318_v14, 6 }
  0xe7   : > { %9225 = vst [vmem:[#allocation66_spill] sm:$0xff] %v5312_v35  ;;  %v2644_v35 = vrot.slane %v2642_v47, 2  ;;  %v5342_v47 = vrot.slane %v5318_v14, 4  ;;  %v1223_v23 = vrot.slane %v1000_v51, 7  ;;  %v2406_v13 = vadd.f32 %v2342_v1, %v2270_v39 }
  0xe8   : > { %9226 = vst [vmem:[#allocation67_spill] sm:$0xff] %v5315_v29  ;;  %v5345_v29 = vrot.slane %v5156_v37, 6  ;;  %v5361_v37 = vrot.slane %v5209_v12, 6  ;;  %v2902_v7 = vadd.f32 %v2649_v50, %v2407_v9  ;;  %v1729_v44 = vmul.f32 %v4951_v43, %v5059_v53 }
  0xe9   : > { %9227 = vst [vmem:[#allocation68_spill] sm:$0xff] %v5318_v14  ;;  %v5366_v15 = vrot.slane %v5321_v16, 6  ;;  %v1578_v48 = vmul.f32 %v4937_v32, %v5059_v53  ;;  %v2497_v9 = vmul.f32 %v5204_v61, %v5264_v27  ;;  %v5378_v39 = vmul.f32 %v4931_v30, %v5321_v16 }
  0xea   : > { %9228 = vst [vmem:[#allocation69_spill] sm:$0xff] %v5321_v16  ;;  %v2973_v38 = vmul.f32 %v5345_v29, %v5163_v6  ;;  %v1884_v51 = vrot.slane %v1729_v44, 7  ;;  %v5382_v1 = vmul.f32 %v4977_v21, %v5321_v16  ;;  %v5393_v44 = vmul.f32 %v5294_v5, %v5321_v16 }
  0xeb   : > { %9229 = vst [vmem:[#allocation70_spill] sm:$0xff] %v5339_v4  ;;  %v5397_v30 = vmul.f32 %v5222_v42, %v5321_v16  ;;  %v2654_v21 = vrot.slane %v2497_v9, 7 }
  0xec   : > { %9230 = vst [vmem:[#allocation71_spill] sm:$0xff] %v5342_v47  ;;  %v2646_v47 = vsel %vm4871_vm8, %v2644_v35, %v2645_v22  ;;  %v2496_v22 = vmul.f32 %v5180_v52, %v5224_v56  ;;  %v3038_v35 = vadd.f32 %v2974_v2, %v2902_v7  ;;  %v1224_v7 = vsel %vm4871_vm8, %v1222_v41, %v1223_v23 }
  0xed   : > { %9231 = vst [vmem:[#allocation72_spill] sm:$0xff] %v5345_v29  ;;  %v9243_v41 = vrot.slane %v5108_v62, 7  ;;  %v1403_v16 = vadd.f32 %v1224_v7, %v837_v19  ;;  %v2976_v62 = vmul.f32 %v5220_v25, %v5264_v27 }
  0xee   : > { %9233 = vst [vmem:[#allocation73_spill] sm:$0xff] %v5350_v0  ;;  %v2651_v50 = vrot.slane %v2496_v22, 7  ;;  %v5389_v2 = vadd.f32 %v5209_v12, %v3038_v35  ;;  %v1642_v22 = vadd.f32 %v1578_v48, %v5027_v24  ;;  %v9244_v35 = vrot.slane %v5239_v33, 7 }
  0xef   : > { %9234 = vst [vmem:[#allocation74_spill] sm:$0xff] %v5353_v59  ;;  %v2345_v24 = vmul.f32 %v5191_v10, %v5224_v56  ;;  %v2208_v33 = vmul.f32 %v4941_v36, %v5059_v53 }
  0xf0   : > { %9235 = vst [vmem:[#allocation75_spill] sm:$0xff] %v5356_v26  ;;  %v2901_v26 = vadd.f32 %v2646_v47, %v2406_v13  ;;  %v1886_v13 = vrot.slane %v1884_v51, 2  ;;  %3820 = vrot.lane.b32.xlu2 %v5389_v2, %s4732_s14 }
  0xf1   : > { %9236 = vst [vmem:[#allocation76_spill] sm:$0xff] %v5361_v37 }
  0xf2   : > { %9237 = vst [vmem:[#allocation77_spill] sm:$0xff] %v5366_v15  ;;  %v1577_v15 = vmul.f32 %v4934_v31, %v5061_v18  ;;  %v3037_v47 = vadd.f32 %v2973_v38, %v2901_v26  ;;  %v1888_v26 = vsel %vm4871_vm8, %v1886_v13, %v9243_v41  ;;  %v2653_v38 = vrot.slane %v2651_v50, 2 }
  0xf3   : > { %9238 = vst [vmem:[#allocation78_spill] sm:$0xff] %v5382_v1  ;;  %v2137_v0 = vadd.f32 %v1888_v26, %v1642_v22  ;;  %v2344_v13 = vmul.f32 %v5174_v8, %v5166_v49  ;;  %v2210_v41 = vmul.f32 %v5294_v5, %v5069_v54  ;;  %v2346_v54 = vmul.f32 %v5309_v28, %v5264_v27 }
  0xf4   : > { %9239 = vst [vmem:[#allocation79_spill] sm:$0xff] %v5389_v2  ;;  %v5403_v23 = vadd.f32 %v5361_v37, %v3037_v47  ;;  %v1641_v48 = vadd.f32 %v1577_v15, %v5018_v63  ;;  %v2650_v47 = vrot.slane %v2648_v57, 2  ;;  %v5426_v63 = vrot.slane %v5224_v56, 4  ;;  %v9248_v2 = vld [vmem:[#allocation31_spill] sm:$0xff] }
  0xf5   : > { %9240 = vst [vmem:[#allocation80_spill] sm:$0xff] %v5393_v44  ;;  %v1883_v44 = vrot.slane %v9244_v35, 2  ;;  %v2273_v19 = vadd.f32 %v5135_v45, %v2137_v0  ;;  %v2655_v15 = vsel %vm4871_vm8, %v2653_v38, %v2654_v21  ;;  %v1890_v57 = vrot.slane %v5129_v3, 7  ;;  %v5435_v0 = vpop.f32.mrf.mxu0 }
  0xf6   : > { %9241 = vst [vmem:[#allocation81_spill] sm:$0xff] %v5397_v30  ;;  %3818 = vrot.lane.b32.xlu1 %v5403_v23, %s4732_s14  ;;  %v2652_v22 = vsel %vm4871_vm8, %v2650_v47, %v2651_v50  ;;  %v2498_v26 = vmul.f32 %v5222_v42, %v5426_v63  ;;  %v2656_v50 = vrot.slane %v2654_v21, 2  ;;  %v1581_v35 = vmul.f32 %v4934_v31, %v5112_v20 }
  0xf7   : > { %9242 = vst [vmem:[#allocation82_spill] sm:$0xff] %v5403_v23  ;;  %v1885_v9 = vsel %vm4871_vm8, %v1883_v44, %v1884_v51  ;;  %v2975_v51 = vmul.f32 %v5212_v17, %v5224_v56  ;;  %v2409_v44 = vadd.f32 %v2345_v24, %v2273_v19  ;;  %v1891_v38 = vsel %vm4871_vm8, %v5160_v11, %v1890_v57 }
  0xf8   : > { %v2136_v7 = vadd.f32 %v1885_v9, %v1641_v48  ;;  %9245 = vst [vmem:[#allocation83_spill] sm:$0xff] %v5426_v63  ;;  %v1733_v3 = vmul.f32 %v4946_v40, %v5112_v20  ;;  %v9247_v9 = vld [vmem:[#allocation39_spill] sm:$0xff]  ;;  %v2657_v47 = vrot.slane %v2498_v26, 7  ;;  %v2977_v19 = vmul.f32 %v5345_v29, %v5426_v63 }
  0xf9   : > { %9246 = vst [vmem:[#allocation84_spill] sm:$0xff] %v5435_v0  ;;  %v2904_v24 = vadd.f32 %v2655_v15, %v2409_v44  ;;  %v5455_v21 = vmul.f32 %v4951_v43, %v5119_v34  ;;  %v1645_v15 = vadd.f32 %v1581_v35, %v9248_v2  ;;  %v2500_v26 = vmul.f32 %v5170_v46, %v5318_v14 }
  0xfa   : > { %v2272_v45 = vadd.f32 %v2208_v33, %v2136_v7  ;;  %v2138_v33 = vadd.f32 %v1891_v38, %v9247_v9  ;;  %v1894_v11 = vrot.slane %v1733_v3, 7 }
  0xfb   : > { %v3040_v7 = vadd.f32 %v2976_v62, %v2904_v24  ;;  %v5468_v62 = vmul.f32 %v5180_v52, %v5339_v4  ;;  %v9256_v24 = vld [vmem:[#allocation30_spill] sm:$0xff] }
  0xfc   : > { %v2408_v48 = vadd.f32 %v2344_v13, %v2272_v45  ;;  %v2274_v23 = vadd.f32 %v2210_v41, %v2138_v33  ;;  %v2658_v13 = vsel %vm4871_vm8, %v2656_v50, %v2657_v47  ;;  %v1896_v44 = vrot.slane %v1894_v11, 2  ;;  %v9251_v33 = vld [vmem:[#allocation35_spill] sm:$0xff] }
  0xfd   : > { %v8723_v45 = vrot.slane %v5455_v21, 7  ;;  %v5464_v38 = vadd.f32 %v5233_v55, %v3040_v7  ;;  %v2348_v41 = vmul.f32 %v5174_v8, %v5318_v14  ;;  %v2661_v50 = vrot.slane %v2500_v26, 7  ;;  %v9253_v7 = vld [vmem:[#allocation9_spill] sm:$0xff] }
  0xfe   : > { %v2903_v57 = vadd.f32 %v2652_v22, %v2408_v48  ;;  %v2410_v43 = vadd.f32 %v2346_v54, %v2274_v23  ;;  %v2212_v22 = vmul.f32 %v4941_v36, %v5119_v34  ;;  %v8728_v3 = vrot.slane %v5468_v62, 7  ;;  %v9252_v54 = vld [vmem:[#allocation14_spill] sm:$0xff] }
  0xff   : > { %9249 = vst [vmem:[#allocation39_spill] sm:$0xff] %v5464_v38  ;;  %v1898_v2 = vsel %vm4871_vm8, %v1896_v44, %v8723_v45  ;;  %3824 = vrot.lane.b32.xlu0 %v5464_v38, %s4732_s14  ;;  %v2663_v48 = vrot.slane %v2661_v50, 2  ;;  %v1580_v47 = vmul.f32 %v9252_v54, %v9251_v33  ;;  %v5490_v44 = vadd.f32 %v5378_v39, %v1403_v16  ;;  %v9257_v39 = vld [vmem:[#allocation59_spill] sm:$0xff]  ;;  %v9258_v38 = vld [vmem:[#allocation42_spill] sm:$0xff] }
 0x100   : > { %v3039_v9 = vadd.f32 %v2975_v51, %v2903_v57  ;;  %v2905_v51 = vadd.f32 %v2658_v13, %v2410_v43  ;;  %v2140_v35 = vadd.f32 %v1898_v2, %v1645_v15  ;;  %v1732_v57 = vmul.f32 %v9253_v7, %v9251_v33  ;;  %v5497_v13 = vpop.f32.mrf.mxu0 }
 0x101   : > { %9254 = vst [vmem:[#allocation35_spill] sm:$0xff] %v5490_v44  ;;  %v2665_v2 = vsel %vm4871_vm8, %v2663_v48, %v8728_v3  ;;  %v1644_v45 = vadd.f32 %v1580_v47, %v9256_v24  ;;  %v2499_v26 = vmul.f32 %v9258_v38, %v9257_v39  ;;  %v5523_v48 = vrot.slane %v5497_v13, 2 }
 0x102   : > { %v5481_v23 = vadd.f32 %v5275_v58, %v3039_v9  ;;  %v5493_v9 = vpop.f32.mrf.mxu2  ;;  %v3041_v43 = vadd.f32 %v2977_v19, %v2905_v51  ;;  %v2276_v15 = vadd.f32 %v2212_v22, %v2140_v35  ;;  %v4476_v16 = vrot.slane %v1732_v57, 9 }
 0x103   : > { %9255 = vst [vmem:[#allocation85_spill] sm:$0xff] %v5493_v9  ;;  %v5507_v44 = vrot.slane %v5493_v9, 2  ;;  %v5516_v51 = vrot.slane %v5493_v9, 6  ;;  %v2979_v35 = vmul.f32 %v5212_v17, %v5339_v4  ;;  %v4484_v1 = vrot.slane %v2499_v26, 9 }
 0x104   : > { %9250 = vst [vmem:[#allocation31_spill] sm:$0xff] %v5481_v23  ;;  %3822 = vrot.lane.b32.xlu2 %v5481_v23, %s4732_s14  ;;  %v5510_v23 = vrot.slane %v5493_v9, 4  ;;  %v5513_v19 = vadd.f32 %v5361_v37, %v3041_v43  ;;  %v2412_v22 = vadd.f32 %v2348_v41, %v2276_v15  ;;  %v1895_v24 = vsel %vm4871_vm8, %v4476_v16, %v1894_v11  ;;  %v9264_v43 = vld [vmem:[#allocation15_spill] sm:$0xff]  ;;  %v9265_v15 = vld [vmem:[#allocation17_spill] sm:$0xff]  ;;  %v9267_v11 = vld [vmem:[#allocation2_spill] sm:$0xff] }
 0x105   : > { %9259 = vst [vmem:[#allocation30_spill] sm:$0xff] %v5507_v44  ;;  %v2139_v57 = vadd.f32 %v1895_v24, %v1644_v45  ;;  %v2211_v41 = vmul.f32 %v9264_v43, %v5112_v20  ;;  %v2347_v3 = vmul.f32 %v9265_v15, %v9257_v39  ;;  %v5532_v9 = vrot.slane %v5497_v13, 4 }
 0x106   : > { %9260 = vst [vmem:[#allocation59_spill] sm:$0xff] %v5510_v23  ;;  %3826 = vrot.lane.b32.xlu1 %v5513_v19, %s4732_s14  ;;  %v2907_v47 = vadd.f32 %v2665_v2, %v2412_v22  ;;  %v974_v16 = vmul.f32 %v9267_v11, %v9251_v33  ;;  %v983_v45 = vmul.f32 %v9267_v11, %v9257_v39  ;;  %v9288_v37 = vrot.slane %v5455_v21, 7 }
 0x107   : > { %9261 = vst [vmem:[#allocation86_spill] sm:$0xff] %v5513_v19  ;;  %v2275_v2 = vadd.f32 %v2211_v41, %v2139_v57  ;;  %v2662_v26 = vsel %vm4871_vm8, %v4484_v1, %v2661_v50  ;;  %v992_v24 = vmul.f32 %v9267_v11, %v5497_v13  ;;  %v5557_v50 = vrot.slane %v5435_v0, 2 }
 0x108   : > { %9262 = vst [vmem:[#allocation87_spill] sm:$0xff] %v5516_v51  ;;  %v9268_v51 = vld [vmem:[#allocation8_spill] sm:$0xff]  ;;  %v3043_v19 = vadd.f32 %v2979_v35, %v2907_v47  ;;  %v4469_v30 = vrot.slane %v974_v16, 9  ;;  %v9271_v47 = vld [vmem:[#allocation3_spill] sm:$0xff]  ;;  %v4470_v8 = vrot.slane %v983_v45, 9  ;;  %v5560_v11 = vrot.slane %v5435_v0, 4 }
 0x109   : > { %9263 = vst [vmem:[#allocation88_spill] sm:$0xff] %v5523_v48  ;;  %v5538_v23 = vmul.f32 %v9268_v51, %v5112_v20  ;;  %v984_v22 = vmul.f32 %v9268_v51, %v5318_v14  ;;  %v993_v44 = vmul.f32 %v9268_v51, %v5523_v48  ;;  %v2411_v35 = vadd.f32 %v2347_v3, %v2275_v2  ;;  %v9275_v16 = vld [vmem:[#allocation43_spill] sm:$0xff] }
 0x10a   : > { %9266 = vst [vmem:[#allocation89_spill] sm:$0xff] %v5532_v9  ;;  %v5551_v17 = vadd.f32 %v5275_v58, %v3043_v19  ;;  %v830_v57 = vmul.f32 %v9271_v47, %v5497_v13  ;;  %v4471_v52 = vrot.slane %v992_v24, 9  ;;  %v5564_v19 = vpop.f32.mrf.mxu2  ;;  %v2978_v2 = vmul.f32 %v9275_v16, %v5318_v14 }
 0x10b   : > { %9269 = vst [vmem:[#allocation90_spill] sm:$0xff] %v5538_v23  ;;  %v8753_v41 = vrot.slane %v5538_v23, 7  ;;  %v1177_v36 = vrot.slane %v984_v22, 7  ;;  %v1202_v1 = vrot.slane %v993_v44, 7  ;;  %v2906_v3 = vadd.f32 %v2662_v26, %v2411_v35 }
 0x10c   : > { %9270 = vst [vmem:[#allocation91_spill] sm:$0xff] %v5551_v17  ;;  %3830 = vrot.lane.b32.xlu0 %v5551_v17, %s4732_s14  ;;  %v5569_v45 = vrot.slane %v5564_v19, 4  ;;  %v814_v26 = vmul.f32 %v9271_v47, %v9251_v33  ;;  %v822_v35 = vmul.f32 %v9271_v47, %v9257_v39  ;;  %v5587_v23 = vrot.slane %v5497_v13, 6 }
 0x10d   : > { %9272 = vst [vmem:[#allocation92_spill] sm:$0xff] %v5557_v50  ;;  %v1153_v44 = vsel %vm4871_vm8, %v4469_v30, %v8753_v41  ;;  %v1178_v22 = vsel %vm4871_vm8, %v4470_v8, %v1177_v36  ;;  %v1203_v24 = vsel %vm4871_vm8, %v4471_v52, %v1202_v1  ;;  %v3042_v17 = vadd.f32 %v2978_v2, %v2906_v3  ;;  %v9279_v30 = vld [vmem:[#allocation10_spill] sm:$0xff]  ;;  %v9281_v52 = vld [vmem:[#allocation4_spill] sm:$0xff]  ;;  %v9287_v50 = vld [vmem:[#allocation25_spill] sm:$0xff] }
 0x10e   : > { %9273 = vst [vmem:[#allocation93_spill] sm:$0xff] %v5560_v11  ;;  %v1396_v58 = vadd.f32 %v1203_v24, %v830_v57  ;;  %v5591_v8 = vmul.f32 %v9279_v30, %v5532_v9  ;;  %v1468_v3 = vmul.f32 %v9281_v52, %v5523_v48  ;;  %v1380_v33 = vadd.f32 %v1153_v44, %v814_v26  ;;  %v9286_v30 = vld [vmem:[#allocation41_spill] sm:$0xff] }
 0x10f   : > { %9274 = vst [vmem:[#allocation94_spill] sm:$0xff] %v5564_v19  ;;  %v5596_v2 = vadd.f32 %v5209_v12, %v3042_v17  ;;  %v1388_v41 = vadd.f32 %v1178_v22, %v822_v35  ;;  %v1452_v57 = vmul.f32 %v9281_v52, %v5112_v20  ;;  %v1204_v24 = vrot.slane %v1202_v1, 2 }
 0x110   : > { %9276 = vst [vmem:[#allocation43_spill] sm:$0xff] %v5569_v45  ;;  %v5584_v45 = vrot.slane %v5564_v19, 6  ;;  %v1460_v19 = vmul.f32 %v9281_v52, %v5318_v14  ;;  %v1532_v17 = vadd.f32 %v1468_v3, %v1396_v58  ;;  %v1588_v44 = vmul.f32 %v9252_v54, %v9257_v39 }
 0x111   : > { %9278 = vst [vmem:[#allocation96_spill] sm:$0xff] %v5587_v23  ;;  %v5606_v23 = vmul.f32 %v4946_v40, %v5318_v14  ;;  %3828 = vrot.lane.b32.xlu2 %v5596_v2, %s4732_s14  ;;  %v1596_v1 = vmul.f32 %v9252_v54, %v5497_v13  ;;  %v1604_v22 = vmul.f32 %v9252_v54, %v5353_v59  ;;  %v8771_v26 = vrot.slane %v5591_v8, 7 }
 0x112   : > { %9277 = vst [vmem:[#allocation95_spill] sm:$0xff] %v5584_v45  ;;  %v1741_v45 = vmul.f32 %v9253_v7, %v9257_v39  ;;  %v5619_v35 = vmul.f32 %v9253_v7, %v5497_v13  ;;  %v5623_v20 = vmul.f32 %v4946_v40, %v5523_v48  ;;  %v5626_v3 = vrot.slane %v1177_v36, 2 }
 0x113   : > { %9280 = vst [vmem:[#allocation97_spill] sm:$0xff] %v5591_v8  ;;  %v1516_v39 = vadd.f32 %v1452_v57, %v1380_v33  ;;  %v1582_v9 = vmul.f32 %v4937_v32, %v5119_v34  ;;  %v5634_v59 = vsel %vm4871_vm8, %v1204_v24, %v8771_v26  ;;  %v1735_v48 = vmul.f32 %v9287_v50, %v9286_v30 }
 0x114   : > { %9282 = vst [vmem:[#allocation98_spill] sm:$0xff] %v5596_v2  ;;  %v1524_v2 = vadd.f32 %v1460_v19, %v1388_v41  ;;  %v4477_v7 = vrot.slane %v1741_v45, 9  ;;  %v1899_v58 = vrot.slane %v9288_v37, 2  ;;  %v5642_v41 = vadd.f32 %v1604_v22, %v1532_v17  ;;  %v9292_v17 = vld [vmem:[#allocation33_spill] sm:$0xff] }
 0x115   : > { %9283 = vst [vmem:[#allocation99_spill] sm:$0xff] %v5606_v23  ;;  %v1652_v36 = vadd.f32 %v1588_v44, %v1516_v39  ;;  %v5646_v19 = vmul.f32 %v9264_v43, %v5318_v14  ;;  %v9291_v33 = vrot.slane %v5606_v23, 7  ;;  %v1900_v21 = vrot.slane %v1735_v48, 7  ;;  %v9294_v39 = vld [vmem:[#allocation27_spill] sm:$0xff]  ;;  %v9299_v23 = vld [vmem:[#allocation57_spill] sm:$0xff] }
 0x116   : > { %9284 = vst [vmem:[#allocation100_spill] sm:$0xff] %v5626_v3  ;;  %v5640_v3 = vadd.f32 %v1596_v1, %v1524_v2  ;;  %v5656_v37 = vmul.f32 %v9265_v15, %v5497_v13  ;;  %v5660_v2 = vmul.f32 %v9258_v38, %v5497_v13  ;;  %v1646_v44 = vadd.f32 %v1582_v9, %v9292_v17  ;;  %v9293_v1 = vld [vmem:[#allocation71_spill] sm:$0xff] }
 0x117   : > { %9285 = vst [vmem:[#allocation101_spill] sm:$0xff] %v5634_v59  ;;  %v1920_v45 = vsel %vm4871_vm8, %v4477_v7, %v9291_v33  ;;  %v2502_v22 = vmul.f32 %v5204_v61, %v9293_v1  ;;  %v1901_v7 = vsel %vm4871_vm8, %v1899_v58, %v1900_v21  ;;  %v2213_v33 = vmul.f32 %v9294_v39, %v9286_v30  ;;  %v9296_v59 = vld [vmem:[#allocation53_spill] sm:$0xff] }
 0x118   : > { %9289 = vst [vmem:[#allocation102_spill] sm:$0xff] %v5640_v3  ;;  %v9295_v48 = vrot.slane %v5468_v62, 7  ;;  %v5673_v57 = vmul.f32 %v9268_v51, %v5061_v18  ;;  %v5675_v13 = vadd.f32 %v1920_v45, %v1652_v36  ;;  %v2141_v24 = vadd.f32 %v1901_v7, %v1646_v44  ;;  %v9297_v36 = vld [vmem:[#allocation29_spill] sm:$0xff] }
 0x119   : > { %9290 = vst [vmem:[#allocation103_spill] sm:$0xff] %v5642_v41  ;;  %v2349_v9 = vmul.f32 %v5191_v10, %v5339_v4  ;;  %v2980_v17 = vmul.f32 %v5220_v25, %v9293_v1  ;;  %v2667_v58 = vrot.slane %v2502_v22, 7  ;;  %v1736_v62 = vmul.f32 %v9296_v59, %v5163_v6  ;;  %v9298_v7 = vld [vmem:[#allocation73_spill] sm:$0xff]  ;;  %v9300_v22 = vld [vmem:[#allocation36_spill] sm:$0xff] }
 0x11a   : > { %v2666_v26 = vrot.slane %v9295_v48, 2  ;;  %v1139_v8 = vrot.slane %v5673_v57, 7  ;;  %v5686_v48 = vmul.f32 %v4946_v40, %v5166_v49  ;;  %v2277_v41 = vadd.f32 %v2213_v33, %v2141_v24 }
 0x11b   : > { %v810_v45 = vmul.f32 %v9271_v47, %v9297_v36  ;;  %v1448_v44 = vmul.f32 %v9281_v52, %v5061_v18  ;;  %v2503_v14 = vmul.f32 %v9299_v23, %v9298_v7  ;;  %v1903_v4 = vrot.slane %v1736_v62, 7 }
 0x11c   : > { %v2668_v57 = vsel %vm4871_vm8, %v2666_v26, %v2667_v58  ;;  %v1140_v38 = vsel %vm4871_vm8, %v9300_v22, %v1139_v8  ;;  %v5701_v24 = vmul.f32 %v5170_v46, %v5435_v0  ;;  %v2413_v33 = vadd.f32 %v2349_v9, %v2277_v41  ;;  %v9301_v41 = vld [vmem:[#allocation26_spill] sm:$0xff] }
 0x11d   : > { %v1376_v36 = vadd.f32 %v1140_v38, %v810_v45  ;;  %v1584_v34 = vmul.f32 %v9252_v54, %v5163_v6  ;;  %v2670_v52 = vrot.slane %v2503_v14, 7  ;;  %v1905_v47 = vrot.slane %v1903_v4, 2 }
 0x11e   : > { %v1906_v23 = vrot.slane %v5686_v48, 7  ;;  %v2215_v26 = vmul.f32 %v9264_v43, %v5166_v49  ;;  %v8788_v59 = vrot.slane %v5701_v24, 7  ;;  %v2908_v22 = vadd.f32 %v2668_v57, %v2413_v33  ;;  %v9302_v33 = vld [vmem:[#allocation34_spill] sm:$0xff] }
 0x11f   : > { %v1512_v62 = vadd.f32 %v1448_v44, %v1376_v36  ;;  %v2351_v3 = vmul.f32 %v9265_v15, %v9298_v7  ;;  %v2672_v40 = vrot.slane %v2670_v52, 2  ;;  %v2982_v14 = vmul.f32 %v9275_v16, %v5435_v0 }
 0x120   : > { %v1907_v38 = vsel %vm4871_vm8, %v1905_v47, %v1906_v23  ;;  %v1583_v9 = vmul.f32 %v9301_v41, %v9286_v30  ;;  %v1902_v48 = vrot.slane %v1900_v21, 2  ;;  %v3044_v45 = vadd.f32 %v2980_v17, %v2908_v22 }
 0x121   : > { %v1648_v43 = vadd.f32 %v1584_v34, %v1512_v62  ;;  %v2674_v44 = vsel %vm4871_vm8, %v2672_v40, %v8788_v59  ;;  %v2214_v57 = vmul.f32 %v5294_v5, %v5163_v6  ;;  %v2350_v15 = vmul.f32 %v5309_v28, %v9293_v1 }
 0x122   : > { %v1647_v36 = vadd.f32 %v1583_v9, %v9302_v33  ;;  %v1904_v47 = vsel %vm4871_vm8, %v1902_v48, %v1903_v4  ;;  %v2669_v30 = vrot.slane %v2667_v58, 2  ;;  %v5729_v21 = vadd.f32 %v5233_v55, %v3044_v45  ;;  %v9305_v58 = vld [vmem:[#allocation28_spill] sm:$0xff] }
 0x123   : > { %v2143_v34 = vadd.f32 %v1907_v38, %v1648_v43  ;;  %v5732_v17 = vrot.slane %v5435_v0, 6  ;;  %v1587_v40 = vmul.f32 %v9301_v41, %v5264_v27  ;;  %v2981_v62 = vmul.f32 %v5345_v29, %v9298_v7  ;;  %v9306_v48 = vld [vmem:[#allocation48_spill] sm:$0xff] }
 0x124   : > { %9303 = vst [vmem:[#allocation33_spill] sm:$0xff] %v5729_v21  ;;  %v2142_v22 = vadd.f32 %v1904_v47, %v1647_v36  ;;  %v5740_v4 = vmul.f32 %v9287_v50, %v5264_v27  ;;  %v1740_v9 = vmul.f32 %v9305_v58, %v5426_v63  ;;  %3832 = vrot.lane.b32.xlu1 %v5729_v21, %s4732_s14 }
 0x125   : > { %9304 = vst [vmem:[#allocation29_spill] sm:$0xff] %v5732_v17  ;;  %v2279_v43 = vadd.f32 %v2215_v26, %v2143_v34  ;;  %v2671_v38 = vsel %vm4871_vm8, %v2669_v30, %v2670_v52  ;;  %v1651_v45 = vadd.f32 %v1587_v40, %v9306_v48  ;;  %v2218_v33 = vmul.f32 %v5294_v5, %v5426_v63  ;;  %v9307_v52 = vld [vmem:[#allocation5_spill] sm:$0xff]  ;;  %v9309_v63 = vld [vmem:[#allocation32_spill] sm:$0xff] }
 0x126   : > { %v2278_v36 = vadd.f32 %v2214_v57, %v2142_v22  ;;  %v1912_v47 = vrot.slane %v5740_v4, 7  ;;  %v2354_v59 = vmul.f32 %v5309_v28, %v5560_v11  ;;  %v5756_v41 = vmul.f32 %v5204_v61, %v5560_v11  ;;  %v9308_v28 = vld [vmem:[#allocation13_spill] sm:$0xff] }
 0x127   : > { %v2415_v21 = vadd.f32 %v2351_v3, %v2279_v43  ;;  %v1915_v26 = vrot.slane %v1740_v9, 7  ;;  %v2507_v30 = vmul.f32 %v5222_v42, %v5732_v17  ;;  %v811_v34 = vmul.f32 %v9307_v52, %v5061_v18 }
 0x128   : > { %v2414_v40 = vadd.f32 %v2350_v15, %v2278_v36  ;;  %v1914_v48 = vrot.slane %v1912_v47, 2  ;;  %v2679_v57 = vrot.slane %v5756_v41, 7  ;;  %v1141_v22 = vrot.slane %v1139_v8, 2 }
 0x129   : > { %v2910_v4 = vadd.f32 %v2674_v44, %v2415_v21  ;;  %v2682_v5 = vrot.slane %v2507_v30, 7  ;;  %v1449_v58 = vmul.f32 %v9308_v28, %v5059_v53  ;;  %v1585_v3 = vmul.f32 %v4934_v31, %v5166_v49  ;;  %v9311_v21 = vld [vmem:[#allocation24_spill] sm:$0xff] }
 0x12a   : > { %v2909_v9 = vadd.f32 %v2671_v38, %v2414_v40  ;;  %v1916_v43 = vsel %vm4871_vm8, %v1914_v48, %v1915_v26  ;;  %v2681_v42 = vrot.slane %v2679_v57, 2  ;;  %v9310_v18 = vrot.slane %v9309_v63, 7 }
 0x12b   : > { %v3046_v41 = vadd.f32 %v2982_v14, %v2910_v4  ;;  %v2146_v8 = vadd.f32 %v1916_v43, %v1651_v45  ;;  %v1738_v36 = vmul.f32 %v9311_v21, %v5224_v56  ;;  %v9312_v53 = vrot.slane %v5623_v20, 7  ;;  %v9315_v4 = vld [vmem:[#allocation76_spill] sm:$0xff] }
 0x12c   : > { %v1143_v15 = vsel %vm4871_vm8, %v1141_v22, %v9310_v18  ;;  %v9313_v30 = vrot.slane %v5619_v35, 9  ;;  %v4485_v26 = vrot.slane %v5660_v2, 9  ;;  %v3045_v63 = vadd.f32 %v2981_v62, %v2909_v9  ;;  %v9317_v18 = vld [vmem:[#allocation92_spill] sm:$0xff] }
 0x12d   : > { %v1377_v44 = vadd.f32 %v1143_v15, %v811_v34  ;;  %v1908_v40 = vrot.slane %v1906_v23, 2  ;;  %v5785_v48 = vadd.f32 %v5209_v12, %v3046_v41  ;;  %v2282_v14 = vadd.f32 %v2218_v33, %v2146_v8  ;;  %v9318_v15 = vld [vmem:[#allocation46_spill] sm:$0xff] }
 0x12e   : > { %v5781_v38 = vsel %vm4871_vm8, %v9313_v30, %v9312_v53  ;;  %v1909_v34 = vrot.slane %v1738_v36, 7  ;;  %v2283_v22 = vadd.f32 %v5646_v19, %v5675_v13  ;;  %v5790_v43 = vadd.f32 %v9315_v4, %v3045_v63  ;;  %v9319_v13 = vld [vmem:[#allocation22_spill] sm:$0xff] }
 0x12f   : > { %9314 = vst [vmem:[#allocation36_spill] sm:$0xff] %v5785_v48  ;;  %v1513_v45 = vadd.f32 %v1449_v58, %v1377_v44  ;;  %v2683_v35 = vsel %vm4871_vm8, %v2681_v42, %v2682_v5  ;;  %v2505_v2 = vmul.f32 %v9318_v15, %v9317_v18  ;;  %3836 = vrot.lane.b32.xlu0 %v5785_v48, %s4732_s14  ;;  %v9320_v5 = vrot.slane %v5701_v24, 7  ;;  %v9322_v30 = vld [vmem:[#allocation50_spill] sm:$0xff]  ;;  %v9332_v48 = vld [vmem:[#allocation64_spill] sm:$0xff] }
 0x130   : > { %9316 = vst [vmem:[#allocation34_spill] sm:$0xff] %v5790_v43  ;;  %v2418_v23 = vadd.f32 %v2354_v59, %v2282_v14  ;;  %v2985_v62 = vmul.f32 %v5345_v29, %v5732_v17  ;;  %v1910_v19 = vsel %vm4871_vm8, %v1908_v40, %v1909_v34  ;;  %3834 = vrot.lane.b32.xlu2 %v5790_v43, %s4732_s14  ;;  %v1911_v36 = vrot.slane %v1909_v34, 2  ;;  %v9323_v40 = vld [vmem:[#allocation40_spill] sm:$0xff] }
 0x131   : > { %v1649_v58 = vadd.f32 %v1585_v3, %v1513_v45  ;;  %v2216_v42 = vmul.f32 %v9319_v13, %v5224_v56  ;;  %v2675_v33 = vrot.slane %v9320_v5, 2  ;;  %v2676_v9 = vrot.slane %v2505_v2, 7  ;;  %v9321_v3 = vld [vmem:[#allocation45_spill] sm:$0xff] }
 0x132   : > { %v1586_v59 = vmul.f32 %v4937_v32, %v5224_v56  ;;  %v2913_v41 = vadd.f32 %v2683_v35, %v2418_v23  ;;  %v2352_v44 = vmul.f32 %v9321_v3, %v5435_v0  ;;  %v2419_v53 = vadd.f32 %v5656_v37, %v2283_v22  ;;  %v9324_v22 = vld [vmem:[#allocation88_spill] sm:$0xff] }
 0x133   : > { %v2144_v8 = vadd.f32 %v1910_v19, %v1649_v58  ;;  %v2983_v63 = vmul.f32 %v9322_v30, %v9317_v18  ;;  %v2678_v45 = vrot.slane %v2676_v9, 2  ;;  %v1913_v2 = vsel %vm4871_vm8, %v1911_v36, %v1912_v47 }
 0x134   : > { %v1650_v14 = vadd.f32 %v1586_v59, %v9323_v40  ;;  %v3049_v24 = vadd.f32 %v2985_v62, %v2913_v41  ;;  %v2217_v35 = vmul.f32 %v9294_v39, %v5264_v27  ;;  %v2677_v23 = vsel %vm4871_vm8, %v2675_v33, %v2676_v9  ;;  %v9327_v41 = vld [vmem:[#allocation10_spill] sm:$0xff] }
 0x135   : > { %v2280_v5 = vadd.f32 %v2216_v42, %v2144_v8  ;;  %v2353_v37 = vmul.f32 %v5191_v10, %v9317_v18  ;;  %v5826_v58 = vmul.f32 %v5170_v46, %v9324_v22  ;;  %v2984_v47 = vmul.f32 %v5220_v25, %v5560_v11 }
 0x136   : > { %v2145_v34 = vadd.f32 %v1913_v2, %v1650_v14  ;;  %v5829_v62 = vadd.f32 %v9315_v4, %v3049_v24  ;;  %v5835_v42 = vmul.f32 %v9268_v51, %v5166_v49  ;;  %v2680_v9 = vsel %vm4871_vm8, %v2678_v45, %v2679_v57  ;;  %v9328_v14 = vld [vmem:[#allocation23_spill] sm:$0xff]  ;;  %v9357_v51 = vld [vmem:[#allocation17_spill] sm:$0xff] }
 0x137   : > { %9325 = vst [vmem:[#allocation48_spill] sm:$0xff] %v5826_v58  ;;  %v2416_v19 = vadd.f32 %v2352_v44, %v2280_v5  ;;  %v8802_v59 = vrot.slane %v5826_v58, 7  ;;  %v980_v8 = vmul.f32 %v9327_v41, %v5224_v56  ;;  %v2986_v36 = vmul.f32 %v9275_v16, %v9324_v22 }
 0x138   : > { %9326 = vst [vmem:[#allocation32_spill] sm:$0xff] %v5829_v62  ;;  %v2281_v33 = vadd.f32 %v2217_v35, %v2145_v34  ;;  %3842 = vrot.lane.b32.xlu0 %v5829_v62, %s4732_s14  ;;  %v1164_v40 = vrot.slane %v5835_v42, 7  ;;  %v5849_v24 = vmul.f32 %v9328_v14, %v5435_v0  ;;  %v5857_v2 = vmul.f32 %v9311_v21, %v9317_v18 }
 0x139   : > { %v2911_v44 = vadd.f32 %v2677_v23, %v2416_v19  ;;  %v2687_v57 = vsel %vm4871_vm8, %v4485_v26, %v8802_v59  ;;  %v1167_v45 = vrot.slane %v980_v8, 7  ;;  %v819_v62 = vmul.f32 %v9307_v52, %v5166_v49  ;;  %v9330_v8 = vld [vmem:[#allocation60_spill] sm:$0xff]  ;;  %v9351_v52 = vld [vmem:[#allocation6_spill] sm:$0xff] }
 0x13a   : > { %v2417_v5 = vadd.f32 %v2353_v37, %v2281_v33  ;;  %v2914_v23 = vadd.f32 %v2687_v57, %v2419_v53  ;;  %v1166_v34 = vrot.slane %v1164_v40, 2  ;;  %v8811_v19 = vrot.slane %v5849_v24, 7  ;;  %v5866_v33 = vpop.f32.mrf.mxu2 }
 0x13b   : > { %v3047_v35 = vadd.f32 %v2983_v63, %v2911_v44  ;;  %v1457_v37 = vmul.f32 %v9308_v28, %v5224_v56  ;;  %v1593_v26 = vmul.f32 %v4934_v31, %v5435_v0  ;;  %9329 = vst [vmem:[#allocation92_spill] sm:$0xff] %v5866_v33  ;;  %v5878_v43 = vmul.f32 %v5170_v46, %v9332_v48 }
 0x13c   : > { %v2912_v42 = vadd.f32 %v2680_v9, %v2417_v5  ;;  %v1168_v53 = vsel %vm4871_vm8, %v1166_v34, %v1167_v45  ;;  %v1933_v63 = vrot.slane %v8811_v19, 2  ;;  %v1934_v9 = vrot.slane %v5857_v2, 7 }
 0x13d   : > { %v5869_v59 = vadd.f32 %v9330_v8, %v3047_v35  ;;  %v3050_v5 = vadd.f32 %v2986_v36, %v2914_v23  ;;  %v1385_v57 = vadd.f32 %v1168_v53, %v819_v62  ;;  %v9333_v58 = vrot.slane %v5623_v20, 7  ;;  %v9335_v35 = vld [vmem:[#allocation102_spill] sm:$0xff] }
 0x13e   : > { %v3048_v44 = vadd.f32 %v2984_v47, %v2912_v42  ;;  %v5886_v28 = vadd.f32 %v5781_v38, %v9335_v35  ;;  %v5889_v34 = vrot.slane %v5866_v33, 2  ;;  %v9337_v47 = vld [vmem:[#allocation66_spill] sm:$0xff]  ;;  %v5898_v36 = vrot.slane %v5866_v33, 4 }
 0x13f   : > { %9331 = vst [vmem:[#allocation40_spill] sm:$0xff] %v5869_v59  ;;  %v5882_v31 = vrot.slane %v9333_v58, 2  ;;  %3838 = vrot.lane.b32.xlu1 %v5869_v59, %s4732_s14  ;;  %v5895_v62 = vmul.f32 %v9318_v15, %v9337_v47  ;;  %v1521_v58 = vadd.f32 %v1457_v37, %v1385_v57  ;;  %v2698_v38 = vrot.slane %v5878_v43, 7  ;;  %v9341_v53 = vld [vmem:[#allocation18_spill] sm:$0xff] }
 0x140   : > { %9336 = vst [vmem:[#allocation102_spill] sm:$0xff] %v5889_v34  ;;  %v5901_v20 = vadd.f32 %v5233_v55, %v3048_v44  ;;  %v5905_v2 = vrot.slane %v5866_v33, 6  ;;  %v1935_v23 = vsel %vm4871_vm8, %v1933_v63, %v1934_v9  ;;  %v2224_v42 = vmul.f32 %v9319_v13, %v9317_v18  ;;  %v9343_v34 = vld [vmem:[#allocation53_spill] sm:$0xff]  ;;  %v9350_v13 = vld [vmem:[#allocation15_spill] sm:$0xff] }
 0x141   : > { %9334 = vst [vmem:[#allocation104_spill] sm:$0xff] %v5882_v31  ;;  %v5913_v35 = vmul.f32 %v9341_v53, %v5163_v6  ;;  %v5918_v37 = vadd.f32 %v5209_v12, %v3050_v5  ;;  %v1657_v43 = vadd.f32 %v1593_v26, %v1521_v58  ;;  %v2360_v44 = vmul.f32 %v9321_v3, %v9332_v48  ;;  %v9344_v12 = vld [vmem:[#allocation3_spill] sm:$0xff]  ;;  %v9345_v26 = vld [vmem:[#allocation4_spill] sm:$0xff] }
 0x142   : > { %9338 = vst [vmem:[#allocation105_spill] sm:$0xff] %v5898_v36  ;;  %3840 = vrot.lane.b32.xlu2 %v5901_v20, %s4732_s14  ;;  %v2991_v63 = vmul.f32 %v9322_v30, %v9337_v47  ;;  %v2700_v57 = vrot.slane %v2698_v38, 2  ;;  %v2701_v19 = vrot.slane %v5895_v62, 7  ;;  %v5928_v33 = vmul.f32 %v9343_v34, %v9298_v7  ;;  %v9346_v31 = vld [vmem:[#allocation56_spill] sm:$0xff] }
 0x143   : > { %9339 = vst [vmem:[#allocation106_spill] sm:$0xff] %v5901_v20  ;;  %v8824_v59 = vrot.slane %v5913_v35, 7  ;;  %v2152_v20 = vadd.f32 %v1935_v23, %v1657_v43  ;;  %v818_v5 = vmul.f32 %v9344_v12, %v5163_v6  ;;  %v1456_v58 = vmul.f32 %v9345_v26, %v5166_v49  ;;  %v9349_v23 = vld [vmem:[#allocation12_spill] sm:$0xff] }
 0x144   : > { %9340 = vst [vmem:[#allocation107_spill] sm:$0xff] %v5905_v2  ;;  %v9347_v2 = vld [vmem:[#allocation57_spill] sm:$0xff]  ;;  %v1592_v30 = vmul.f32 %v9252_v54, %v9298_v7  ;;  %v5945_v43 = vmul.f32 %v9349_v23, %v5264_v27  ;;  %v2223_v49 = vmul.f32 %v9350_v13, %v5435_v0  ;;  %v820_v14 = vmul.f32 %v9351_v52, %v5224_v56  ;;  %v9352_v0 = vld [vmem:[#allocation16_spill] sm:$0xff] }
 0x145   : > { %9342 = vst [vmem:[#allocation108_spill] sm:$0xff] %v5918_v37  ;;  %v5936_v36 = vmul.f32 %v9347_v2, %v9346_v31  ;;  %v1163_v62 = vrot.slane %v8824_v59, 2  ;;  %v2288_v34 = vadd.f32 %v2224_v42, %v2152_v20  ;;  %v1169_v2 = vrot.slane %v1167_v45, 2 }
 0x146   : > { %v2702_v59 = vsel %vm4871_vm8, %v2700_v57, %v2701_v19  ;;  %v8835_v20 = vrot.slane %v5945_v43, 7  ;;  %v1458_v53 = vmul.f32 %v9352_v0, %v5264_v27  ;;  %v5963_v45 = vmul.f32 %v9287_v50, %v5560_v11 }
 0x147   : > { %9348 = vst [vmem:[#allocation109_spill] sm:$0xff] %v5936_v36  ;;  %3844 = vrot.lane.b32.xlu1 %v5918_v37, %s4732_s14  ;;  %v1165_v3 = vsel %vm4871_vm8, %v1163_v62, %v1164_v40  ;;  %v2424_v42 = vadd.f32 %v2360_v44, %v2288_v34  ;;  %v5965_v37 = vpop.f32.mrf.mxu2  ;;  %v9354_v57 = vrot.slane %v5928_v33, 7  ;;  %v9355_v40 = vrot.slane %v5936_v36, 7 }
 0x148   : > { %v1384_v54 = vadd.f32 %v1165_v3, %v818_v5  ;;  %9353 = vst [vmem:[#allocation110_spill] sm:$0xff] %v5965_v37  ;;  %v1171_v56 = vsel %vm4871_vm8, %v1169_v2, %v8835_v20  ;;  %v1936_v3 = vrot.slane %v1934_v9, 2  ;;  %v1594_v26 = vmul.f32 %v4937_v32, %v9317_v18 }
 0x149   : > { %v1930_v4 = vrot.slane %v9354_v57, 2  ;;  %v2697_v62 = vrot.slane %v9355_v40, 2  ;;  %v2919_v34 = vadd.f32 %v2702_v59, %v2424_v42  ;;  %v1386_v5 = vadd.f32 %v1171_v56, %v820_v14  ;;  %v9361_v56 = vld [vmem:[#allocation41_spill] sm:$0xff] }
 0x14a   : > { %v1520_v44 = vadd.f32 %v1456_v58, %v1384_v54  ;;  %v9356_v12 = vrot.slane %v5849_v24, 7  ;;  %v2359_v40 = vmul.f32 %v9357_v51, %v9346_v31  ;;  %v2990_v36 = vmul.f32 %v9275_v16, %v9332_v48  ;;  %v9359_v16 = vld [vmem:[#allocation38_spill] sm:$0xff] }
 0x14b   : > { %v8834_v2 = vrot.slane %v5963_v45, 7  ;;  %v3055_v9 = vadd.f32 %v2991_v63, %v2919_v34  ;;  %v1522_v54 = vadd.f32 %v1458_v53, %v1386_v5  ;;  %v2225_v14 = vmul.f32 %v9294_v39, %v5560_v11 }
 0x14c   : > { %v1932_v57 = vsel %vm4871_vm8, %v1930_v4, %v9356_v12  ;;  %v1656_v59 = vadd.f32 %v1592_v30, %v1520_v44  ;;  %v2699_v24 = vsel %vm4871_vm8, %v2697_v62, %v2698_v38  ;;  %v9358_v12 = vld [vmem:[#allocation58_spill] sm:$0xff]  ;;  %v6000_v63 = vmul.f32 %v9327_v41, %v9359_v16 }
 0x14d   : > { %v1938_v4 = vsel %vm4871_vm8, %v1936_v3, %v8834_v2  ;;  %v5996_v58 = vmul.f32 %v5204_v61, %v9358_v12  ;;  %v6003_v30 = vadd.f32 %v9330_v8, %v3055_v9  ;;  %v1658_v42 = vadd.f32 %v1594_v26, %v1522_v54 }
 0x14e   : > { %v2151_v53 = vadd.f32 %v1932_v57, %v1656_v59  ;;  %v6007_v38 = vmul.f32 %v9349_v23, %v9361_v56  ;;  %v2361_v62 = vmul.f32 %v5191_v10, %v9337_v47  ;;  %v2703_v3 = vrot.slane %v2701_v19, 2  ;;  %v9362_v57 = vld [vmem:[#allocation70_spill] sm:$0xff] }
 0x14f   : > { %9360 = vst [vmem:[#allocation38_spill] sm:$0xff] %v6003_v30  ;;  %v2992_v34 = vmul.f32 %v5220_v25, %v9358_v12  ;;  %v8839_v44 = vrot.slane %v6000_v63, 7  ;;  %3854 = vrot.lane.b32.xlu0 %v6003_v30, %s4732_s14  ;;  %v2153_v9 = vadd.f32 %v1938_v4, %v1658_v42  ;;  %v6019_v59 = vmul.f32 %v9311_v21, %v9362_v57 }
 0x150   : > { %v2287_v5 = vadd.f32 %v2223_v49, %v2151_v53  ;;  %v1158_v26 = vrot.slane %v6007_v38, 7  ;;  %v2704_v54 = vrot.slane %v5996_v58, 7  ;;  %v816_v19 = vmul.f32 %v9351_v52, %v9359_v16  ;;  %v9363_v53 = vld [vmem:[#allocation89_spill] sm:$0xff]  ;;  %v6033_v38 = vpop.f32.mrf.mxu2 }
 0x151   : > { %v1157_v2 = vrot.slane %v8839_v44, 2  ;;  %v1744_v20 = vmul.f32 %v9287_v50, %v9293_v1  ;;  %v2289_v49 = vadd.f32 %v2225_v14, %v2153_v9  ;;  %v8847_v4 = vrot.slane %v6019_v59, 7  ;;  %9364 = vst [vmem:[#allocation41_spill] sm:$0xff] %v6033_v38 }
 0x152   : > { %v2423_v30 = vadd.f32 %v2359_v40, %v2287_v5  ;;  %v6031_v42 = vmul.f32 %v9318_v15, %v9363_v53  ;;  %v2705_v58 = vsel %vm4871_vm8, %v2703_v3, %v2704_v54  ;;  %v1454_v44 = vmul.f32 %v9352_v0, %v9361_v56 }
 0x153   : > { %v1159_v8 = vsel %vm4871_vm8, %v1157_v2, %v1158_v26  ;;  %v1590_v40 = vmul.f32 %v4937_v32, %v9362_v57  ;;  %v2425_v5 = vadd.f32 %v2361_v62, %v2289_v49  ;;  %v1924_v15 = vrot.slane %v8847_v4, 2  ;;  %v9368_v62 = vld [vmem:[#allocation96_spill] sm:$0xff]  ;;  %v9369_v49 = vld [vmem:[#allocation83_spill] sm:$0xff]  ;;  %v6066_v2 = vld [vmem:[%s8634_s3] ss:$0 sm:$0xff] }
 0x154   : > { %v2918_v14 = vadd.f32 %v2699_v24, %v2423_v30  ;;  %v1382_v9 = vadd.f32 %v1159_v8, %v816_v19  ;;  %v6046_v50 = vrot.slane %v5965_v37, 2  ;;  %v6049_v3 = vrot.slane %v5965_v37, 4  ;;  %v9370_v4 = vld [vmem:[#allocation11_spill] sm:$0xff] }
 0x155   : > { %v1925_v21 = vrot.slane %v1744_v20, 7  ;;  %v6053_v0 = vrot.slane %v6033_v38, 2  ;;  %v2920_v32 = vadd.f32 %v2705_v58, %v2425_v5  ;;  %v2221_v30 = vmul.f32 %v9294_v39, %v9293_v1 }
 0x156   : > { %9365 = vst [vmem:[#allocation111_spill] sm:$0xff] %v6046_v50  ;;  %v3054_v47 = vadd.f32 %v2990_v36, %v2918_v14  ;;  %v1518_v24 = vadd.f32 %v1454_v44, %v1382_v9  ;;  %v2511_v19 = vmul.f32 %v5204_v61, %v9368_v62  ;;  %v982_v20 = vmul.f32 %v9370_v4, %v9369_v49  ;;  %v9377_v50 = vld [vmem:[#allocation19_spill] sm:$0xff] }
 0x157   : > { %9366 = vst [vmem:[#allocation112_spill] sm:$0xff] %v6049_v3  ;;  %v1926_v8 = vsel %vm4871_vm8, %v1924_v15, %v1925_v21  ;;  %v3056_v44 = vadd.f32 %v2992_v34, %v2920_v32  ;;  %v9372_v15 = vrot.slane %v5945_v43, 7  ;;  %v2357_v5 = vmul.f32 %v5191_v10, %v9363_v53  ;;  %v9375_v43 = vld [vmem:[#allocation7_spill] sm:$0xff] }
 0x158   : > { %9367 = vst [vmem:[#allocation113_spill] sm:$0xff] %v6053_v0  ;;  %v6069_v36 = vadd.f32 %v6066_v2, %v3054_v47  ;;  %v1654_v58 = vadd.f32 %v1590_v40, %v1518_v24  ;;  %v9373_v9 = vrot.slane %v6031_v42, 7  ;;  %v2988_v4 = vmul.f32 %v5220_v25, %v9368_v62  ;;  %v9376_v40 = vld [vmem:[#allocation28_spill] sm:$0xff] }
 0x159   : > { %v1172_v14 = vrot.slane %v9372_v15, 2  ;;  %v1173_v3 = vrot.slane %v982_v20, 7  ;;  %v6082_v47 = vadd.f32 %v5233_v55, %v3056_v44  ;;  %v821_v34 = vmul.f32 %v9375_v43, %v5264_v27  ;;  %v9379_v27 = vld [vmem:[#allocation26_spill] sm:$0xff] }
 0x15a   : > { %9371 = vst [vmem:[#allocation83_spill] sm:$0xff] %v6069_v36  ;;  %v2691_v0 = vrot.slane %v9373_v9, 2  ;;  %3852 = vrot.lane.b32.xlu2 %v6069_v36, %s4732_s14  ;;  %v2149_v32 = vadd.f32 %v1926_v8, %v1654_v58  ;;  %v1749_v24 = vmul.f32 %v9376_v40, %v5732_v17  ;;  %v2692_v15 = vrot.slane %v2511_v19, 7 }
 0x15b   : > { %9374 = vst [vmem:[#allocation114_spill] sm:$0xff] %v6082_v47  ;;  %v1174_v9 = vsel %vm4871_vm8, %v1172_v14, %v1173_v3  ;;  %v1459_v20 = vmul.f32 %v9377_v50, %v9369_v49  ;;  %v9378_v25 = vrot.slane %v5963_v45, 7  ;;  %3856 = vrot.lane.b32.xlu1 %v6082_v47, %s4732_s14  ;;  %v1595_v58 = vmul.f32 %v9379_v27, %v5560_v11  ;;  %v9380_v3 = vld [vmem:[#allocation63_spill] sm:$0xff] }
 0x15c   : > { %v2285_v8 = vadd.f32 %v2221_v30, %v2149_v32  ;;  %v1387_v44 = vadd.f32 %v1174_v9, %v821_v34  ;;  %v1940_v10 = vrot.slane %v1749_v24, 7  ;;  %v2693_v19 = vsel %vm4871_vm8, %v2691_v0, %v2692_v15 }
 0x15d   : > { %v1939_v36 = vrot.slane %v9378_v25, 2  ;;  %v2226_v14 = vmul.f32 %v9380_v3, %v5732_v17  ;;  %v2706_v40 = vrot.slane %v2704_v54, 2  ;;  %v1160_v49 = vrot.slane %v1158_v26, 2  ;;  %v9381_v25 = vld [vmem:[#allocation65_spill] sm:$0xff] }
 0x15e   : > { %v2421_v39 = vadd.f32 %v2357_v5, %v2285_v8  ;;  %v1523_v45 = vadd.f32 %v1459_v20, %v1387_v44  ;;  %v2362_v61 = vmul.f32 %v9381_v25, %v9358_v12  ;;  %v817_v30 = vmul.f32 %v9375_v43, %v9361_v56  ;;  %v6116_v8 = vpop.f32.mrf.mxu2  ;;  %v9384_v56 = vld [vmem:[#allocation81_spill] sm:$0xff]  ;;  %v9454_v43 = vld [vmem:[#allocation24_spill] sm:$0xff] }
 0x15f   : > { %v1941_v32 = vsel %vm4871_vm8, %v1939_v36, %v1940_v10  ;;  %v9382_v34 = vrot.slane %v5913_v35, 7  ;;  %v1455_v54 = vmul.f32 %v9377_v50, %v5163_v6  ;;  %v1927_v26 = vrot.slane %v1925_v21, 2  ;;  %9383 = vst [vmem:[#allocation115_spill] sm:$0xff] %v6116_v8  ;;  %v9386_v35 = vld [vmem:[#allocation69_spill] sm:$0xff]  ;;  %v9387_v21 = vld [vmem:[#allocation74_spill] sm:$0xff] }
 0x160   : > { %v2916_v5 = vadd.f32 %v2693_v19, %v2421_v39  ;;  %v1659_v24 = vadd.f32 %v1595_v58, %v1523_v45  ;;  %v1591_v20 = vmul.f32 %v9379_v27, %v9293_v1  ;;  %v9385_v44 = vrot.slane %v9384_v56, 7 }
 0x161   : > { %v1162_v0 = vsel %vm4871_vm8, %v1160_v49, %v9382_v34  ;;  %v2993_v36 = vmul.f32 %v5345_v29, %v9386_v35  ;;  %v2227_v6 = vmul.f32 %v9350_v13, %v9324_v22  ;;  %v2363_v39 = vmul.f32 %v9357_v51, %v9387_v21 }
 0x162   : > { %v1383_v9 = vadd.f32 %v1162_v0, %v817_v30  ;;  %v2708_v10 = vsel %vm4871_vm8, %v2706_v40, %v9385_v44  ;;  %v3052_v58 = vadd.f32 %v2988_v4, %v2916_v5  ;;  %v2154_v19 = vadd.f32 %v1941_v32, %v1659_v24  ;;  %v9389_v0 = vld [vmem:[#allocation42_spill] sm:$0xff]  ;;  %v9390_v44 = vld [vmem:[#allocation75_spill] sm:$0xff] }
 0x163   : > { %v2694_v45 = vrot.slane %v2692_v15, 2  ;;  %v9388_v30 = vrot.slane %v5928_v33, 7  ;;  %v2291_v40 = vadd.f32 %v2227_v6, %v5886_v28  ;;  %v2517_v56 = vmul.f32 %v9389_v0, %v9387_v21  ;;  %v9394_v6 = vld [vmem:[#allocation109_spill] sm:$0xff]  ;;  %v9401_v21 = vld [vmem:[#allocation3_spill] sm:$0xff] }
 0x164   : > { %v1519_v49 = vadd.f32 %v1455_v54, %v1383_v9  ;;  %v6137_v35 = vmul.f32 %v5170_v46, %v9390_v44  ;;  %v6140_v47 = vadd.f32 %v5233_v55, %v3052_v58  ;;  %v2290_v4 = vadd.f32 %v2226_v14, %v2154_v19  ;;  %v6154_v14 = vld [vmem:[%s8633_s2 + $0x8] ss:$0 sm:$0xff] }
 0x165   : > { %v1929_v34 = vsel %vm4871_vm8, %v1927_v26, %v9388_v30  ;;  %v2222_v33 = vmul.f32 %v9380_v3, %v9298_v7  ;;  %v2358_v15 = vmul.f32 %v9381_v25, %v9368_v62  ;;  %v2427_v54 = vadd.f32 %v2363_v39, %v2291_v40  ;;  %9393 = vst [vmem:[#allocation116_spill] sm:$0xff] %v6154_v14  ;;  %v9398_v30 = vld [vmem:[#allocation2_spill] sm:$0xff]  ;;  %v9422_v25 = vld [vmem:[#allocation5_spill] sm:$0xff] }
 0x166   : > { %9391 = vst [vmem:[#allocation81_spill] sm:$0xff] %v6137_v35  ;;  %v1655_v32 = vadd.f32 %v1591_v20, %v1519_v49  ;;  %v4486_v28 = vrot.slane %v2517_v56, 9  ;;  %v8865_v26 = vrot.slane %v6137_v35, 7  ;;  %3848 = vrot.lane.b32.xlu0 %v6140_v47, %s4732_s14  ;;  %v2426_v5 = vadd.f32 %v2362_v61, %v2290_v4  ;;  %v9397_v49 = vld [vmem:[#allocation43_spill] sm:$0xff] }
 0x167   : > { %9392 = vst [vmem:[#allocation69_spill] sm:$0xff] %v6140_v47  ;;  %v2989_v9 = vmul.f32 %v5345_v29, %v9346_v31  ;;  %v2994_v20 = vmul.f32 %v6154_v14, %v9390_v44  ;;  %v9395_v39 = vrot.slane %v9394_v6, 7  ;;  %v6167_v19 = vrot.slane %v5965_v37, 6  ;;  %v9400_v47 = vld [vmem:[#allocation8_spill] sm:$0xff] }
 0x168   : > { %v2150_v24 = vadd.f32 %v1929_v34, %v1655_v32  ;;  %v2712_v61 = vsel %vm4871_vm8, %v4486_v28, %v8865_v26  ;;  %v1010_v34 = vmul.f32 %v9398_v30, %v9397_v49  ;;  %v2921_v40 = vadd.f32 %v2708_v10, %v2426_v5  ;;  %v9399_v32 = vld [vmem:[#allocation95_spill] sm:$0xff]  ;;  %v616_v10 = vpop.f32.mrf.mxu2 }
 0x169   : > { %v2696_v58 = vsel %vm4871_vm8, %v2694_v45, %v9395_v39  ;;  %9396 = vst [vmem:[#allocation109_spill] sm:$0xff] %v6167_v19  ;;  %v2922_v4 = vadd.f32 %v2712_v61, %v2427_v54  ;;  %v1011_v6 = vmul.f32 %v9400_v47, %v9399_v32  ;;  %v846_v45 = vmul.f32 %v9401_v21, %v9397_v49  ;;  %v9403_v49 = vld [vmem:[#allocation76_spill] sm:$0xff] }
 0x16a   : > { %v2286_v56 = vadd.f32 %v2222_v33, %v2150_v24  ;;  %v1019_v39 = vmul.f32 %v9398_v30, %v6167_v19  ;;  %v1020_v28 = vmul.f32 %v9400_v47, %v6033_v38  ;;  %v4473_v26 = vrot.slane %v1010_v34, 9  ;;  %v9402_v24 = vld [vmem:[#allocation4_spill] sm:$0xff] }
 0x16b   : > { %v3057_v37 = vadd.f32 %v2993_v36, %v2921_v40  ;;  %v3058_v35 = vadd.f32 %v2994_v20, %v2922_v4  ;;  %v1252_v17 = vrot.slane %v1011_v6, 7  ;;  %v854_v33 = vmul.f32 %v9401_v21, %v6167_v19  ;;  %v9407_v40 = vld [vmem:[#allocation14_spill] sm:$0xff]  ;;  %v9410_v6 = vld [vmem:[#allocation9_spill] sm:$0xff] }
 0x16c   : > { %v2422_v44 = vadd.f32 %v2358_v15, %v2286_v56  ;;  %v4474_v54 = vrot.slane %v1019_v39, 9  ;;  %v1277_v5 = vrot.slane %v1020_v28, 7  ;;  %v1484_v61 = vmul.f32 %v9402_v24, %v9399_v32  ;;  %v9411_v39 = vld [vmem:[#allocation23_spill] sm:$0xff] }
 0x16d   : > { %v6184_v62 = vadd.f32 %v9403_v49, %v3057_v37  ;;  %v6187_v1 = vadd.f32 %v6066_v2, %v3058_v35  ;;  %v1253_v36 = vsel %vm4871_vm8, %v4473_v26, %v1252_v17  ;;  %v6192_v15 = vrot.slane %v6033_v38, 4 }
 0x16e   : > { %v2917_v30 = vadd.f32 %v2696_v58, %v2422_v44  ;;  %v1278_v20 = vsel %vm4871_vm8, %v4474_v54, %v1277_v5  ;;  %v1412_v34 = vadd.f32 %v1253_v36, %v846_v45  ;;  %v1620_v56 = vmul.f32 %v9407_v40, %v6167_v19 }
 0x16f   : > { %9404 = vst [vmem:[#allocation117_spill] sm:$0xff] %v6184_v62  ;;  %v6199_v37 = vrot.slane %v6033_v38, 6  ;;  %3858 = vrot.lane.b32.xlu2 %v6184_v62, %s4732_s14  ;;  %3860 = vrot.lane.b32.xlu0 %v6187_v1, %s4732_s14  ;;  %v6205_v35 = vrot.slane %v616_v10, 2  ;;  %v1492_v26 = vmul.f32 %v9402_v24, %v6033_v38  ;;  %v1420_v58 = vadd.f32 %v1278_v20, %v854_v33 }
 0x170   : > { %9405 = vst [vmem:[#allocation118_spill] sm:$0xff] %v6187_v1  ;;  %v3053_v44 = vadd.f32 %v2989_v9, %v2917_v30  ;;  %v1548_v4 = vadd.f32 %v1484_v61, %v1412_v34  ;;  %v1777_v45 = vmul.f32 %v9410_v6, %v6167_v19  ;;  %v1778_v28 = vmul.f32 %v9411_v39, %v6033_v38 }
 0x171   : > { %9406 = vst [vmem:[#allocation119_spill] sm:$0xff] %v6192_v15  ;;  %v6214_v54 = vrot.slane %v6116_v8, 2  ;;  %v1786_v30 = vmul.f32 %v9410_v6, %v616_v10  ;;  %v1787_v36 = vmul.f32 %v9411_v39, %v6205_v35  ;;  %v6223_v33 = vrot.slane %v6116_v8, 4 }
 0x172   : > { %9408 = vst [vmem:[#allocation120_spill] sm:$0xff] %v6199_v37  ;;  %v6217_v9 = vadd.f32 %v9403_v49, %v3053_v44  ;;  %v1684_v61 = vadd.f32 %v1620_v56, %v1548_v4  ;;  %v4481_v20 = vrot.slane %v1777_v45, 9  ;;  %v2019_v34 = vrot.slane %v1778_v28, 7  ;;  %v9419_v4 = vld [vmem:[#allocation90_spill] sm:$0xff] }
 0x173   : > { %9409 = vst [vmem:[#allocation121_spill] sm:$0xff] %v6205_v35  ;;  %v6226_v1 = vrot.slane %v6116_v8, 6  ;;  %v6230_v62 = vrot.slane %v616_v10, 4  ;;  %v6232_v44 = vrot.slane %v616_v10, 6  ;;  %v6234_v19 = vrot.slane %v1252_v17, 2 }
 0x174   : > { %9412 = vst [vmem:[#allocation122_spill] sm:$0xff] %v6214_v54  ;;  %3850 = vrot.lane.b32.xlu1 %v6217_v9, %s4732_s14  ;;  %v1556_v32 = vadd.f32 %v1492_v26, %v1420_v58  ;;  %v1628_v6 = vmul.f32 %v9407_v40, %v616_v10  ;;  %v2020_v56 = vsel %vm4871_vm8, %v4481_v20, %v2019_v34  ;;  %v9420_v45 = vrot.slane %v9419_v4, 7  ;;  %v9425_v20 = vld [vmem:[#allocation13_spill] sm:$0xff] }
 0x175   : > { %9413 = vst [vmem:[#allocation123_spill] sm:$0xff] %v6217_v9  ;;  %v4482_v49 = vrot.slane %v1786_v30, 9  ;;  %v2044_v54 = vrot.slane %v1787_v36, 7  ;;  %v6242_v15 = vmul.f32 %v9389_v0, %v616_v10  ;;  %v9421_v9 = vld [vmem:[#allocation37_spill] sm:$0xff]  ;;  %v2251_v17 = vmul.f32 %v9350_v13, %v6033_v38 }
 0x176   : > { %9414 = vst [vmem:[#allocation124_spill] sm:$0xff] %v6223_v33  ;;  %v1154_v28 = vrot.slane %v9420_v45, 2  ;;  %v815_v3 = vmul.f32 %v9422_v25, %v9421_v9  ;;  %v6250_v26 = vmul.f32 %v5170_v46, %v6205_v35  ;;  %v9424_v58 = vrot.slane %v6000_v63, 7  ;;  %v9426_v45 = vld [vmem:[#allocation68_spill] sm:$0xff]  ;;  %v9449_v33 = vld [vmem:[#allocation59_spill] sm:$0xff] }
 0x177   : > { %9415 = vst [vmem:[#allocation125_spill] sm:$0xff] %v6226_v1  ;;  %v1453_v4 = vmul.f32 %v9425_v20, %v9359_v16  ;;  %v6262_v27 = vrot.slane %v1277_v5, 2  ;;  %v6264_v50 = vadd.f32 %v1628_v6, %v1556_v32  ;;  %v6266_v35 = vrot.slane %v2019_v34, 2  ;;  %v9434_v5 = vld [vmem:[#allocation48_spill] sm:$0xff] }
 0x178   : > { %9416 = vst [vmem:[#allocation126_spill] sm:$0xff] %v6230_v62  ;;  %v1156_v30 = vsel %vm4871_vm8, %v1154_v28, %v9424_v58  ;;  %v6269_v63 = vmul.f32 %v9357_v51, %v616_v10  ;;  %v6275_v16 = vrot.slane %v2044_v54, 2  ;;  %v4489_v28 = vrot.slane %v6242_v15, 9  ;;  %v9436_v10 = vld [vmem:[#allocation18_spill] sm:$0xff] }
 0x179   : > { %9417 = vst [vmem:[#allocation127_spill] sm:$0xff] %v6232_v44  ;;  %v2179_v44 = vadd.f32 %v2020_v56, %v1684_v61  ;;  %v1381_v36 = vadd.f32 %v1156_v30, %v815_v3  ;;  %v9428_v61 = vld [vmem:[#allocation99_spill] sm:$0xff]  ;;  %v6273_v3 = vsel %vm4871_vm8, %v4482_v49, %v2044_v54  ;;  %v9433_v30 = vrot.slane %v6019_v59, 7  ;;  %v9439_v59 = vld [vmem:[#allocation22_spill] sm:$0xff] }
 0x17a   : > { %9418 = vst [vmem:[#allocation128_spill] sm:$0xff] %v6234_v19  ;;  %v9427_v19 = vld [vmem:[#allocation20_spill] sm:$0xff]  ;;  %v9429_v56 = vrot.slane %v9428_v61, 7  ;;  %v9435_v6 = vrot.slane %v9434_v5, 7  ;;  %v6286_v61 = vmul.f32 %v9436_v10, %v9298_v7  ;;  %v9440_v5 = vld [vmem:[#allocation53_spill] sm:$0xff]  ;;  %v9444_v15 = vld [vmem:[#allocation30_spill] sm:$0xff] }
 0x17b   : > { %9423 = vst [vmem:[#allocation90_spill] sm:$0xff] %v6250_v26  ;;  %v1589_v9 = vmul.f32 %v9427_v19, %v9426_v45  ;;  %v1517_v58 = vadd.f32 %v1453_v4, %v1381_v36  ;;  %v2315_v54 = vadd.f32 %v2251_v17, %v2179_v44  ;;  %v2220_v4 = vmul.f32 %v9439_v59, %v9362_v57  ;;  %v9442_v44 = vld [vmem:[#allocation45_spill] sm:$0xff] }
 0x17c   : > { %v1921_v0 = vrot.slane %v9429_v56, 2  ;;  %9430 = vst [vmem:[#allocation37_spill] sm:$0xff] %v6262_v27  ;;  %v2688_v34 = vrot.slane %v9435_v6, 2  ;;  %v9438_v56 = vld [vmem:[#allocation84_spill] sm:$0xff]  ;;  %v6299_v6 = vmul.f32 %v9440_v5, %v9346_v31  ;;  %v2356_v17 = vmul.f32 %v9442_v44, %v9324_v22  ;;  %v9445_v57 = vld [vmem:[#allocation57_spill] sm:$0xff] }
 0x17d   : > { %9431 = vst [vmem:[#allocation99_spill] sm:$0xff] %v6266_v35  ;;  %v6290_v49 = vmul.f32 %v9400_v47, %v9438_v56  ;;  %v1653_v36 = vadd.f32 %v1589_v9, %v1517_v58  ;;  %v6303_v35 = vmul.f32 %v9411_v39, %v9332_v48  ;;  %v9443_v9 = vld [vmem:[#allocation50_spill] sm:$0xff]  ;;  %v826_v27 = vmul.f32 %v9401_v21, %v9298_v7 }
 0x17e   : > { %9432 = vst [vmem:[#allocation129_spill] sm:$0xff] %v6275_v16  ;;  %v1923_v32 = vsel %vm4871_vm8, %v1921_v0, %v9433_v30  ;;  %v2987_v58 = vmul.f32 %v9443_v9, %v9363_v53  ;;  %v6311_v0 = vmul.f32 %v9445_v57, %v9444_v15  ;;  %v9447_v30 = vrot.slane %v6031_v42, 7 }
 0x17f   : > { %9437 = vst [vmem:[#allocation48_spill] sm:$0xff] %v6286_v61  ;;  %v2148_v45 = vadd.f32 %v1923_v32, %v1653_v36  ;;  %v9448_v32 = vrot.slane %v6286_v61, 7  ;;  %v8907_v22 = vrot.slane %v6299_v6, 7  ;;  %v1464_v53 = vmul.f32 %v9402_v24, %v9438_v56 }
 0x180   : > { %9441 = vst [vmem:[#allocation84_spill] sm:$0xff] %v6299_v6  ;;  %v2690_v16 = vsel %vm4871_vm8, %v2688_v34, %v9447_v30  ;;  %v6327_v42 = vmul.f32 %v5170_v46, %v9449_v33  ;;  %v9450_v34 = vrot.slane %v6290_v49, 7  ;;  %v6344_v46 = vmul.f32 %v9349_v23, %v5560_v11 }
 0x181   : > { %9446 = vst [vmem:[#allocation130_spill] sm:$0xff] %v6311_v0  ;;  %v1188_v36 = vrot.slane %v9448_v32, 2  ;;  %v2284_v62 = vadd.f32 %v2220_v4, %v2148_v45  ;;  %v1600_v32 = vmul.f32 %v9407_v40, %v9346_v31  ;;  %v1955_v45 = vrot.slane %v8907_v22, 2 }
 0x182   : > { %v6339_v4 = vmul.f32 %v9327_v41, %v9317_v18  ;;  %9451 = vst [vmem:[#allocation131_spill] sm:$0xff] %v6344_v46  ;;  %v828_v22 = vmul.f32 %v9351_v52, %v9317_v18  ;;  %v8920_v38 = vrot.slane %v6344_v46, 7  ;;  %v9455_v52 = vld [vmem:[#allocation25_spill] sm:$0xff]  ;;  %v9464_v46 = vrot.slane %v6250_v26, 7 }
 0x183   : > { %v1190_v30 = vsel %vm4871_vm8, %v1188_v36, %v9450_v34  ;;  %v2420_v1 = vadd.f32 %v2356_v17, %v2284_v62  ;;  %v2231_v36 = vmul.f32 %v9350_v13, %v9332_v48  ;;  %v2367_v34 = vmul.f32 %v9357_v51, %v9444_v15  ;;  %v9453_v15 = vld [vmem:[#allocation66_spill] sm:$0xff] }
 0x184   : > { %v1392_v61 = vadd.f32 %v1190_v30, %v826_v27  ;;  %v8917_v6 = vrot.slane %v6339_v4, 7  ;;  %v9452_v27 = vrot.slane %v6303_v35, 7  ;;  %v6363_v41 = vmul.f32 %v9454_v43, %v9453_v15  ;;  %v9459_v30 = vld [vmem:[#allocation46_spill] sm:$0xff]  ;;  %v9460_v43 = vld [vmem:[#allocation16_spill] sm:$0xff] }
 0x185   : > { %v2915_v31 = vadd.f32 %v2690_v16, %v2420_v1  ;;  %v6367_v1 = vmul.f32 %v9455_v52, %v9358_v12  ;;  %v1466_v9 = vmul.f32 %v9460_v43, %v5560_v11  ;;  %v9461_v52 = vld [vmem:[#allocation21_spill] sm:$0xff] }
 0x186   : > { %v1528_v62 = vadd.f32 %v1464_v53, %v1392_v61  ;;  %v1957_v17 = vsel %vm4871_vm8, %v1955_v45, %v9452_v27  ;;  %v1194_v7 = vrot.slane %v8917_v6, 2  ;;  %v9457_v61 = vrot.slane %v6311_v0, 7  ;;  %v9458_v27 = vld [vmem:[#allocation87_spill] sm:$0xff]  ;;  %v9466_v11 = vld [vmem:[#allocation49_spill] sm:$0xff] }
 0x187   : > { %9456 = vst [vmem:[#allocation132_spill] sm:$0xff] %v6367_v1  ;;  %v3051_v53 = vadd.f32 %v2987_v58, %v2915_v31  ;;  %v6373_v23 = vmul.f32 %v9459_v30, %v9458_v27  ;;  %v1602_v44 = vmul.f32 %v9461_v52, %v9453_v15  ;;  %v8922_v31 = vrot.slane %v6363_v41, 7  ;;  %v9462_v58 = vld [vmem:[#allocation60_spill] sm:$0xff]  ;;  %v9465_v52 = vld [vmem:[#allocation94_spill] sm:$0xff] }
 0x188   : > { %v1664_v16 = vadd.f32 %v1600_v32, %v1528_v62  ;;  %v2722_v45 = vrot.slane %v9457_v61, 2  ;;  %v1196_v6 = vsel %vm4871_vm8, %v1194_v7, %v8920_v38  ;;  %v2787_v7 = vsel %vm4871_vm8, %v4489_v28, %v9464_v46 }
 0x189   : > { %v6385_v32 = vadd.f32 %v9462_v58, %v3051_v53  ;;  %v1394_v61 = vadd.f32 %v1196_v6, %v828_v22  ;;  %v1961_v38 = vrot.slane %v8922_v31, 2  ;;  %v8926_v43 = vrot.slane %v6367_v1, 7  ;;  %v9469_v31 = vld [vmem:[#allocation47_spill] sm:$0xff] }
 0x18a   : > { %v2159_v62 = vadd.f32 %v1957_v17, %v1664_v16  ;;  %v6397_v30 = vmul.f32 %v9466_v11, %v9465_v52  ;;  %v2451_v53 = vadd.f32 %v6269_v63, %v2315_v54  ;;  %v2998_v6 = vmul.f32 %v6154_v14, %v9449_v33  ;;  %v9468_v63 = vld [vmem:[#allocation27_spill] sm:$0xff] }
 0x18b   : > { %9463 = vst [vmem:[#allocation133_spill] sm:$0xff] %v6385_v32  ;;  %3846 = vrot.lane.b32.xlu2 %v6385_v32, %s4732_s14  ;;  %v1530_v17 = vadd.f32 %v1466_v9, %v1394_v61  ;;  %v9467_v46 = vrot.slane %v6327_v42, 7  ;;  %v1963_v16 = vsel %vm4871_vm8, %v1961_v38, %v8926_v43  ;;  %v2233_v54 = vmul.f32 %v9468_v63, %v9358_v12  ;;  %v9471_v32 = vld [vmem:[#allocation105_spill] sm:$0xff] }
 0x18c   : > { %v2295_v22 = vadd.f32 %v2231_v36, %v2159_v62  ;;  %v2369_v36 = vmul.f32 %v9469_v31, %v9458_v27  ;;  %v9470_v9 = vrot.slane %v6373_v23, 7  ;;  %v6420_v26 = vmul.f32 %v9436_v10, %v9471_v32 }
 0x18d   : > { %v2724_v28 = vsel %vm4871_vm8, %v2722_v45, %v9467_v46  ;;  %v1666_v0 = vadd.f32 %v1602_v44, %v1530_v17  ;;  %v9473_v46 = vld [vmem:[#allocation107_spill] sm:$0xff]  ;;  %v6429_v43 = vmul.f32 %v9436_v10, %v6199_v37  ;;  %v1024_v44 = vmul.f32 %v9400_v47, %v6116_v8 }
 0x18e   : > { %v2431_v62 = vadd.f32 %v2367_v34, %v2295_v22  ;;  %v2728_v61 = vrot.slane %v9470_v9, 2  ;;  %9472 = vst [vmem:[#allocation134_spill] sm:$0xff] %v6420_v26  ;;  %v6425_v38 = vmul.f32 %v9400_v47, %v9473_v46  ;;  %v9476_v17 = vld [vmem:[#allocation51_spill] sm:$0xff]  ;;  %v8932_v14 = vrot.slane %v6420_v26, 7 }
 0x18f   : > { %9475 = vst [vmem:[#allocation136_spill] sm:$0xff] %v6429_v43  ;;  %v2161_v22 = vadd.f32 %v1963_v16, %v1666_v0  ;;  %v3000_v9 = vmul.f32 %v9476_v17, %v9465_v52  ;;  %v850_v45 = vmul.f32 %v9401_v21, %v9471_v32  ;;  %v8933_v63 = vrot.slane %v6429_v43, 7 }
 0x190   : > { %9474 = vst [vmem:[#allocation135_spill] sm:$0xff] %v6425_v38  ;;  %v2926_v34 = vadd.f32 %v2724_v28, %v2431_v62  ;;  %v1289_v1 = vrot.slane %v1024_v44, 7  ;;  %v9477_v58 = vrot.slane %v6397_v30, 7  ;;  %v1263_v28 = vrot.slane %v8932_v14, 2 }
 0x191   : > { %v2297_v12 = vadd.f32 %v2233_v54, %v2161_v22  ;;  %v1288_v16 = vrot.slane %v8933_v63, 2  ;;  %v1488_v62 = vmul.f32 %v9402_v24, %v9473_v46  ;;  %v6452_v31 = vmul.f32 %v9440_v5, %v6199_v37 }
 0x192   : > { %v3062_v10 = vadd.f32 %v2998_v6, %v2926_v34  ;;  %v2730_v0 = vsel %vm4871_vm8, %v2728_v61, %v9477_v58  ;;  %v6456_v6 = vmul.f32 %v9411_v39, %v6116_v8  ;;  %v6461_v61 = vpop.f32.mrf.mxu2  ;;  %v858_v44 = vmul.f32 %v9401_v21, %v6199_v37  ;;  %v9513_v21 = vld [vmem:[#allocation25_spill] sm:$0xff] }
 0x193   : > { %9478 = vst [vmem:[#allocation137_spill] sm:$0xff] %v6452_v31  ;;  %v2433_v58 = vadd.f32 %v2369_v36, %v2297_v12  ;;  %v9482_v34 = vrot.slane %v6425_v38, 7  ;;  %v1290_v14 = vsel %vm4871_vm8, %v1288_v16, %v1289_v1  ;;  %v6473_v26 = vmul.f32 %v9440_v5, %v6461_v61  ;;  %v9512_v5 = vld [vmem:[#allocation124_spill] sm:$0xff] }
 0x194   : > { %9479 = vst [vmem:[#allocation138_spill] sm:$0xff] %v6456_v6  ;;  %v6459_v54 = vadd.f32 %v6066_v2, %v3062_v10  ;;  %v8935_v12 = vrot.slane %v6452_v31, 7  ;;  %v6478_v2 = vadd.f32 %v6273_v3, %v6264_v50  ;;  %v6480_v10 = vadd.f32 %v2787_v7, %v2451_v53  ;;  %v9504_v31 = vld [vmem:[#allocation12_spill] sm:$0xff] }
 0x195   : > { %9481 = vst [vmem:[#allocation140_spill] sm:$0xff] %v6461_v61  ;;  %v1265_v22 = vsel %vm4871_vm8, %v1263_v28, %v9482_v34  ;;  %v2928_v36 = vadd.f32 %v2730_v0, %v2433_v58  ;;  %v1624_v28 = vmul.f32 %v9407_v40, %v6199_v37  ;;  %v6493_v3 = vrot.slane %v6461_v61, 4 }
 0x196   : > { %9480 = vst [vmem:[#allocation139_spill] sm:$0xff] %v6459_v54  ;;  %v1416_v63 = vadd.f32 %v1265_v22, %v850_v45  ;;  %3868 = vrot.lane.b32.xlu1 %v6459_v54, %s4732_s14  ;;  %v6487_v45 = vrot.slane %v6461_v61, 2  ;;  %v2030_v34 = vrot.slane %v8935_v12, 2  ;;  %v8938_v22 = vrot.slane %v6456_v6, 7 }
 0x197   : > { %9483 = vst [vmem:[#allocation141_spill] sm:$0xff] %v6473_v26  ;;  %v3064_v50 = vadd.f32 %v3000_v9, %v2928_v36  ;;  %v1424_v7 = vadd.f32 %v1290_v14, %v858_v44  ;;  %v1496_v53 = vmul.f32 %v9402_v24, %v6116_v8  ;;  %v6498_v0 = vrot.slane %v6461_v61, 6 }
 0x198   : > { %9484 = vst [vmem:[#allocation142_spill] sm:$0xff] %v6480_v10  ;;  %v1552_v16 = vadd.f32 %v1488_v62, %v1416_v63  ;;  %v6500_v58 = vrot.slane %v1289_v1, 2  ;;  %v1632_v63 = vmul.f32 %v9407_v40, %v6461_v61  ;;  %v6510_v14 = vmul.f32 %v9445_v57, %v6461_v61  ;;  %v9511_v40 = vld [vmem:[#allocation41_spill] sm:$0xff] }
 0x199   : > { %9485 = vst [vmem:[#allocation143_spill] sm:$0xff] %v6487_v45  ;;  %v6506_v12 = vadd.f32 %v5233_v55, %v3064_v50  ;;  %v9491_v44 = vrot.slane %v6290_v49, 7  ;;  %v2032_v1 = vsel %vm4871_vm8, %v2030_v34, %v8938_v22  ;;  %v2255_v54 = vmul.f32 %v9350_v13, %v6116_v8  ;;  %v9518_v55 = vld [vmem:[#allocation24_spill] sm:$0xff]  ;;  %v9521_v45 = vld [vmem:[#allocation26_spill] sm:$0xff] }
 0x19a   : > { %9486 = vst [vmem:[#allocation144_spill] sm:$0xff] %v6493_v3  ;;  %v1688_v9 = vadd.f32 %v1624_v28, %v1552_v16  ;;  %v827_v50 = vmul.f32 %v9422_v25, %v9438_v56  ;;  %v9492_v28 = vrot.slane %v6303_v35, 7  ;;  %v1560_v62 = vadd.f32 %v1496_v53, %v1424_v7 }
 0x19b   : > { %9487 = vst [vmem:[#allocation145_spill] sm:$0xff] %v6498_v0  ;;  %v1191_v36 = vrot.slane %v9491_v44, 2  ;;  %3872 = vrot.lane.b32.xlu0 %v6506_v12, %s4732_s14  ;;  %v6528_v49 = vmul.f32 %v9357_v51, %v6461_v61  ;;  %v9493_v44 = vrot.slane %v6339_v4, 7  ;;  %v9494_v22 = vrot.slane %v6327_v42, 7 }
 0x19c   : > { %9488 = vst [vmem:[#allocation146_spill] sm:$0xff] %v6500_v58  ;;  %v1958_v16 = vrot.slane %v9492_v28, 2  ;;  %v9495_v56 = vrot.slane %v6473_v26, 7  ;;  %v1465_v7 = vmul.f32 %v9425_v20, %v9317_v18  ;;  %v1601_v53 = vmul.f32 %v9427_v19, %v9332_v48 }
 0x19d   : > { %9489 = vst [vmem:[#allocation147_spill] sm:$0xff] %v6506_v12  ;;  %v1193_v34 = vsel %vm4871_vm8, %v1191_v36, %v9493_v44  ;;  %v2725_v6 = vrot.slane %v9494_v22, 2  ;;  %v2183_v12 = vadd.f32 %v2032_v1, %v1688_v9  ;;  %v6547_v36 = vmul.f32 %v5345_v29, %v6461_v61  ;;  %v6551_v22 = vpop.f32.mrf.mxu3  ;;  %v9501_v1 = vld [vmem:[#allocation50_spill] sm:$0xff] }
 0x19e   : > { %9490 = vst [vmem:[#allocation148_spill] sm:$0xff] %v6510_v14  ;;  %v6538_v35 = vrot.slane %v9495_v56, 2  ;;  %v1393_v28 = vadd.f32 %v1193_v34, %v827_v50  ;;  %v2232_v42 = vmul.f32 %v9439_v59, %v9453_v15  ;;  %v9499_v50 = vrot.slane %v6363_v41, 7  ;;  %v9500_v34 = vld [vmem:[#allocation45_spill] sm:$0xff]  ;;  %v9507_v41 = vld [vmem:[#allocation11_spill] sm:$0xff] }
 0x19f   : > { %9497 = vst [vmem:[#allocation150_spill] sm:$0xff] %v6547_v36  ;;  %v2368_v9 = vmul.f32 %v9500_v34, %v9449_v33  ;;  %v2999_v56 = vmul.f32 %v9501_v1, %v9458_v27  ;;  %v9502_v4 = vrot.slane %v6373_v23, 7  ;;  %v9503_v36 = vld [vmem:[#allocation111_spill] sm:$0xff]  ;;  %v9508_v15 = vld [vmem:[#allocation113_spill] sm:$0xff]  ;;  %v714_v32 = vrot.slane %v6551_v22, 2  ;;  %v9516_v1 = vld [vmem:[#allocation28_spill] sm:$0xff] }
 0x1a0   : > { %9496 = vst [vmem:[#allocation149_spill] sm:$0xff] %v6538_v35  ;;  %v1529_v44 = vadd.f32 %v1465_v7, %v1393_v28  ;;  %v1960_v18 = vsel %vm4871_vm8, %v1958_v16, %v9499_v50  ;;  %v6567_v10 = vmul.f32 %v9504_v31, %v9503_v36  ;;  %v9506_v28 = vld [vmem:[#allocation112_spill] sm:$0xff]  ;;  %v9509_v16 = vld [vmem:[#allocation10_spill] sm:$0xff]  ;;  %v9510_v27 = vld [vmem:[#allocation7_spill] sm:$0xff]  ;;  %v6584_v47 = vmul.f32 %v9513_v21, %v9512_v5 }
 0x1a1   : > { %9498 = vst [vmem:[#allocation151_spill] sm:$0xff] %v6551_v22  ;;  %v2727_v38 = vsel %vm4871_vm8, %v2725_v6, %v9502_v4  ;;  %v1018_v7 = vmul.f32 %v9507_v41, %v9506_v28  ;;  %v6573_v50 = vmul.f32 %v9509_v16, %v9508_v15  ;;  %v853_v23 = vmul.f32 %v9510_v27, %v9503_v36  ;;  %v9517_v36 = vld [vmem:[#allocation126_spill] sm:$0xff] }
 0x1a2   : > { %9505 = vst [vmem:[#allocation152_spill] sm:$0xff] %v6567_v10  ;;  %v1665_v46 = vadd.f32 %v1601_v53, %v1529_v44  ;;  %v855_v6 = vmul.f32 %v9422_v25, %v9511_v40  ;;  %v8967_v4 = vrot.slane %v6567_v10, 7  ;;  %v1493_v53 = vmul.f32 %v9425_v20, %v9508_v15  ;;  %v9515_v44 = vld [vmem:[#allocation125_spill] sm:$0xff] }
 0x1a3   : > { %v1273_v24 = vrot.slane %v1018_v7, 7  ;;  %v8968_v33 = vrot.slane %v6573_v50, 7  ;;  %9514 = vst [vmem:[#allocation153_spill] sm:$0xff] %v6584_v47  ;;  %v1785_v57 = vmul.f32 %v9516_v1, %v9515_v44  ;;  %v6592_v61 = vmul.f32 %v9518_v55, %v9517_v36  ;;  %v9519_v40 = vld [vmem:[#allocation37_spill] sm:$0xff] }
 0x1a4   : > { %v2160_v48 = vadd.f32 %v1960_v18, %v1665_v46  ;;  %v1272_v7 = vrot.slane %v8967_v4, 2  ;;  %v9520_v46 = vld [vmem:[#allocation19_spill] sm:$0xff]  ;;  %v8973_v35 = vrot.slane %v6584_v47, 7  ;;  %v1627_v43 = vmul.f32 %v9521_v45, %v9512_v5  ;;  %v9522_v20 = vld [vmem:[#allocation121_spill] sm:$0xff] }
 0x1a5   : > { %v1281_v26 = vsel %vm4871_vm8, %v9519_v40, %v8968_v33  ;;  %v1491_v18 = vmul.f32 %v9520_v46, %v9506_v28  ;;  %v1629_v10 = vmul.f32 %v9427_v19, %v9522_v20  ;;  %v2040_v40 = vrot.slane %v1785_v57, 7  ;;  %v9525_v47 = vld [vmem:[#allocation129_spill] sm:$0xff] }
 0x1a6   : > { %v2296_v3 = vadd.f32 %v2232_v42, %v2160_v48  ;;  %v1421_v39 = vadd.f32 %v1281_v26, %v855_v6  ;;  %v1274_v4 = vsel %vm4871_vm8, %v1272_v7, %v1273_v24  ;;  %v2039_v58 = vrot.slane %v8973_v35, 2 }
 0x1a7   : > { %v2259_v33 = vmul.f32 %v9350_v13, %v9522_v20  ;;  %v1419_v37 = vadd.f32 %v1274_v4, %v853_v23  ;;  %v8975_v26 = vrot.slane %v6592_v61, 7  ;;  %v6615_v42 = vadd.f32 %v1632_v63, %v1560_v62  ;;  %v9528_v62 = vld [vmem:[#allocation52_spill] sm:$0xff]  ;;  %v9530_v23 = vld [vmem:[#allocation42_spill] sm:$0xff] }
 0x1a8   : > { %v2432_v28 = vadd.f32 %v2368_v9, %v2296_v3  ;;  %v1557_v48 = vadd.f32 %v1493_v53, %v1421_v39  ;;  %v2319_v6 = vadd.f32 %v2255_v54, %v2183_v12  ;;  %v6618_v5 = vrot.slane %v6551_v22, 4  ;;  %v9551_v20 = vld [vmem:[#allocation56_spill] sm:$0xff] }
 0x1a9   : > { %v6621_v24 = vrot.slane %v6551_v22, 6  ;;  %v1555_v35 = vadd.f32 %v1491_v18, %v1419_v37  ;;  %v2048_v39 = vsel %vm4871_vm8, %v9525_v47, %v8975_v26  ;;  %v6630_v3 = vmul.f32 %v9516_v1, %v6551_v22  ;;  %v9538_v18 = vld [vmem:[#allocation46_spill] sm:$0xff] }
 0x1aa   : > { %9523 = vst [vmem:[#allocation37_spill] sm:$0xff] %v6618_v5  ;;  %v2927_v7 = vadd.f32 %v2727_v38, %v2432_v28  ;;  %v1693_v57 = vadd.f32 %v1629_v10, %v1557_v48  ;;  %v2041_v54 = vsel %vm4871_vm8, %v2039_v58, %v2040_v40  ;;  %v2323_v12 = vadd.f32 %v2259_v33, %v6478_v2 }
 0x1ab   : > { %9524 = vst [vmem:[#allocation154_spill] sm:$0xff] %v6621_v24  ;;  %v6637_v38 = vmul.f32 %v9466_v11, %v6498_v0  ;;  %v1691_v10 = vadd.f32 %v1627_v43, %v1555_v35  ;;  %v2395_v63 = vmul.f32 %v9357_v51, %v714_v32  ;;  %v6642_v47 = vmul.f32 %v9528_v62, %v6551_v22  ;;  %v9534_v43 = vld [vmem:[#allocation60_spill] sm:$0xff] }
 0x1ac   : > { %9526 = vst [vmem:[#allocation129_spill] sm:$0xff] %v6630_v3  ;;  %v3063_v37 = vadd.f32 %v2999_v56, %v2927_v7  ;;  %v2188_v9 = vadd.f32 %v2048_v39, %v1693_v57  ;;  %v2260_v28 = vmul.f32 %v9439_v59, %v9517_v36  ;;  %v6647_v58 = vmul.f32 %v9530_v23, %v714_v32  ;;  %v9536_v56 = vld [vmem:[#allocation44_spill] sm:$0xff]  ;;  %v9541_v57 = vld [vmem:[#allocation63_spill] sm:$0xff]  ;;  %v9553_v3 = vld [vmem:[#allocation29_spill] sm:$0xff] }
 0x1ad   : > { %9527 = vst [vmem:[#allocation155_spill] sm:$0xff] %v6637_v38  ;;  %v9532_v2 = vrot.slane %v6510_v14, 7  ;;  %v6659_v53 = vmul.f32 %v9536_v56, %v6618_v5  ;;  %v6663_v40 = vmul.f32 %v9538_v18, %v6621_v24  ;;  %v6666_v32 = vadd.f32 %v6528_v49, %v2319_v6  ;;  %v9549_v49 = vld [vmem:[#allocation85_spill] sm:$0xff] }
 0x1ae   : > { %9529 = vst [vmem:[#allocation156_spill] sm:$0xff] %v6642_v47  ;;  %v6655_v35 = vadd.f32 %v9534_v43, %v3063_v37  ;;  %v2186_v7 = vadd.f32 %v2041_v54, %v1691_v10  ;;  %v2258_v39 = vmul.f32 %v9541_v57, %v9515_v44  ;;  %v9542_v37 = vld [vmem:[#allocation65_spill] sm:$0xff]  ;;  %v6679_v26 = vmul.f32 %v9500_v34, %v6618_v5 }
 0x1af   : > { %9531 = vst [vmem:[#allocation157_spill] sm:$0xff] %v6647_v58  ;;  %v6652_v4 = vrot.slane %v9532_v2, 2  ;;  %v6675_v2 = vmul.f32 %v9542_v37, %v6498_v0  ;;  %v6681_v33 = vadd.f32 %v2395_v63, %v2323_v12  ;;  %v6684_v6 = vadd.f32 %v2260_v28, %v2188_v9  ;;  %v9548_v63 = vld [vmem:[#allocation96_spill] sm:$0xff]  ;;  %v9550_v14 = vld [vmem:[#allocation73_spill] sm:$0xff]  ;;  %v9554_v0 = vld [vmem:[#allocation30_spill] sm:$0xff] }
 0x1b0   : > { %9535 = vst [vmem:[#allocation159_spill] sm:$0xff] %v6655_v35  ;;  %3870 = vrot.lane.b32.xlu2 %v6655_v35, %s4732_s14  ;;  %v9544_v54 = vrot.slane %v6637_v38, 7  ;;  %v9546_v35 = vld [vmem:[#allocation71_spill] sm:$0xff]  ;;  %v6699_v12 = vmul.f32 %v5345_v29, %v6551_v22  ;;  %v6703_v9 = vmul.f32 %v9513_v21, %v9548_v63  ;;  %v6705_v28 = vadd.f32 %v2258_v39, %v2186_v7 }
 0x1b1   : > { %9533 = vst [vmem:[#allocation158_spill] sm:$0xff] %v6652_v4  ;;  %v6712_v4 = vmul.f32 %v9466_v11, %v9549_v49  ;;  %v1463_v38 = vmul.f32 %v9520_v46, %v9550_v14  ;;  %v2230_v7 = vmul.f32 %v9541_v57, %v9551_v20  ;;  %v991_v22 = vmul.f32 %v9507_v41, %v9553_v3  ;;  %v9557_v20 = vld [vmem:[#allocation48_spill] sm:$0xff]  ;;  %v9560_v41 = vld [vmem:[#allocation93_spill] sm:$0xff]  ;;  %v9561_v11 = vld [vmem:[#allocation58_spill] sm:$0xff] }
 0x1b2   : > { %9537 = vst [vmem:[#allocation160_spill] sm:$0xff] %v6659_v53  ;;  %v6688_v10 = vrot.slane %v9544_v54, 2  ;;  %v825_v54 = vmul.f32 %v9510_v27, %v9546_v35  ;;  %v1950_v58 = vrot.slane %v6703_v9, 7  ;;  %v2366_v14 = vmul.f32 %v9542_v37, %v9549_v49  ;;  %v9555_v9 = vld [vmem:[#allocation131_spill] sm:$0xff] }
 0x1b3   : > { %9539 = vst [vmem:[#allocation161_spill] sm:$0xff] %v6663_v40  ;;  %v6731_v44 = vmul.f32 %v5345_v29, %v9554_v0  ;;  %v9556_v43 = vrot.slane %v9555_v9, 7  ;;  %v9558_v53 = vrot.slane %v9557_v20, 7  ;;  %v9559_v40 = vrot.slane %v6712_v4, 7 }
 0x1b4   : > { %9540 = vst [vmem:[#allocation162_spill] sm:$0xff] %v6666_v32  ;;  %v6693_v32 = vmul.f32 %v9504_v31, %v9546_v35  ;;  %v829_v56 = vmul.f32 %v9510_v27, %v9560_v41  ;;  %v1198_v51 = vrot.slane %v991_v22, 7  ;;  %v1467_v0 = vmul.f32 %v9520_v46, %v9553_v3 }
 0x1b5   : > { %9543 = vst [vmem:[#allocation163_spill] sm:$0xff] %v6681_v33  ;;  %v1599_v33 = vmul.f32 %v9521_v45, %v9548_v63  ;;  %v1197_v23 = vrot.slane %v9556_v43, 2  ;;  %v2719_v34 = vrot.slane %v9559_v40, 2  ;;  %v1603_v9 = vmul.f32 %v9521_v45, %v9561_v11  ;;  %v9562_v43 = vld [vmem:[#allocation132_spill] sm:$0xff]  ;;  %v9576_v11 = vld [vmem:[#allocation21_spill] sm:$0xff] }
 0x1b6   : > { %9545 = vst [vmem:[#allocation164_spill] sm:$0xff] %v6688_v10  ;;  %v1183_v48 = vrot.slane %v6693_v32, 7  ;;  %v6723_v32 = vrot.slane %v9465_v52, 2  ;;  %v9563_v5 = vrot.slane %v9562_v43, 7  ;;  %v9564_v10 = vld [vmem:[#allocation84_spill] sm:$0xff] }
 0x1b7   : > { %9547 = vst [vmem:[#allocation71_spill] sm:$0xff] %v6699_v12  ;;  %v1952_v12 = vrot.slane %v1950_v58, 2  ;;  %v9565_v47 = vrot.slane %v9564_v10, 7  ;;  %v1199_v40 = vsel %vm4871_vm8, %v1197_v23, %v1198_v51  ;;  %v2370_v10 = vmul.f32 %v9542_v37, %v9465_v52 }
 0x1b8   : > { %v1185_v39 = vrot.slane %v1183_v48, 2  ;;  %9552 = vst [vmem:[#allocation73_spill] sm:$0xff] %v6723_v32  ;;  %v1964_v20 = vrot.slane %v9563_v5, 2  ;;  %v2525_v22 = vmul.f32 %v9528_v62, %v6723_v32  ;;  %v1395_v43 = vadd.f32 %v1199_v40, %v829_v56  ;;  %v9574_v40 = vld [vmem:[#allocation89_spill] sm:$0xff]  ;;  %v6793_v62 = vpop.f32.mrf.mxu3 }
 0x1ba   : > { %v1187_v1 = vsel %vm4871_vm8, %v1185_v39, %v9558_v53  ;;  %v1954_v53 = vsel %vm4871_vm8, %v1952_v12, %v9565_v47  ;;  %v9569_v47 = vld [vmem:[#allocation78_spill] sm:$0xff]  ;;  %v2732_v23 = vrot.slane %v2525_v22, 7 }
 0x1bb   : > { %v1391_v24 = vadd.f32 %v1187_v1, %v825_v54  ;;  %v9566_v1 = vrot.slane %v6397_v30, 7  ;;  %v9567_v54 = vld [vmem:[#allocation130_spill] sm:$0xff]  ;;  %v9570_v12 = vrot.slane %v9569_v47, 7  ;;  %v3001_v30 = vmul.f32 %v5345_v29, %v6723_v32  ;;  %v9575_v47 = vld [vmem:[#allocation16_spill] sm:$0xff] }
 0x1bc   : > { %v9568_v39 = vrot.slane %v9567_v54, 7  ;;  %v1531_v54 = vadd.f32 %v1467_v0, %v1395_v43  ;;  %v1598_v32 = vmul.f32 %v9576_v11, %v9574_v40  ;;  %v9577_v43 = vld [vmem:[#allocation77_spill] sm:$0xff] }
 0x1bd   : > { %v2731_v41 = vrot.slane %v9566_v1, 2  ;;  %v1527_v3 = vadd.f32 %v1463_v38, %v1391_v24  ;;  %v1966_v51 = vsel %vm4871_vm8, %v1964_v20, %v9570_v12  ;;  %v9571_v1 = vld [vmem:[#allocation70_spill] sm:$0xff]  ;;  %v1462_v12 = vmul.f32 %v9575_v47, %v9546_v35  ;;  %v9579_v35 = vld [vmem:[#allocation47_spill] sm:$0xff] }
 0x1be   : > { %v2721_v5 = vsel %vm4871_vm8, %v2719_v34, %v9568_v39  ;;  %v6773_v24 = vmul.f32 %v9509_v16, %v9571_v1  ;;  %v9573_v34 = vld [vmem:[#allocation6_spill] sm:$0xff]  ;;  %v6779_v39 = vmul.f32 %v9518_v55, %v9574_v40  ;;  %v1667_v0 = vadd.f32 %v1603_v9, %v1531_v54 }
 0x1bf   : > { %v1663_v38 = vadd.f32 %v1599_v33, %v1527_v3  ;;  %v824_v56 = vmul.f32 %v9573_v34, %v9571_v1  ;;  %v2733_v20 = vsel %vm4871_vm8, %v2731_v41, %v2732_v23  ;;  %v6791_v52 = vmul.f32 %v9538_v18, %v9577_v43  ;;  %v9578_v23 = vld [vmem:[#allocation27_spill] sm:$0xff] }
 0x1c0   : > { %9572 = vst [vmem:[#allocation29_spill] sm:$0xff] %v6773_v24  ;;  %v9008_v22 = vrot.slane %v6773_v24, 7  ;;  %v9014_v3 = vrot.slane %v6779_v39, 7  ;;  %v2229_v1 = vmul.f32 %v9578_v23, %v9548_v63  ;;  %v2365_v29 = vmul.f32 %v9579_v35, %v9577_v43  ;;  %v9580_v43 = vld [vmem:[#allocation119_spill] sm:$0xff] }
 0x1c1   : > { %v2158_v33 = vadd.f32 %v1954_v53, %v1663_v38  ;;  %v6803_v9 = vmul.f32 %v9476_v17, %v9549_v49  ;;  %v2162_v38 = vadd.f32 %v1966_v51, %v1667_v0  ;;  %v9017_v40 = vrot.slane %v6791_v52, 7 }
 0x1c2   : > { %v1182_v41 = vrot.slane %v9008_v22, 2  ;;  %v1949_v54 = vrot.slane %v9014_v3, 2  ;;  %v6811_v24 = vrot.slane %v6793_v62, 2  ;;  %v856_v63 = vmul.f32 %v9573_v34, %v9508_v15  ;;  %v9582_v15 = vld [vmem:[#allocation122_spill] sm:$0xff] }
 0x1c3   : > { %v2294_v53 = vadd.f32 %v2230_v7, %v2158_v33  ;;  %v857_v49 = vmul.f32 %v9510_v27, %v9580_v43  ;;  %v9581_v7 = vld [vmem:[#allocation80_spill] sm:$0xff]  ;;  %v2716_v3 = vrot.slane %v9017_v40, 2  ;;  %v6828_v34 = vmul.f32 %v9509_v16, %v9582_v15 }
 0x1c4   : > { %v1184_v22 = vsel %vm4871_vm8, %v1182_v41, %v1183_v48  ;;  %v2298_v51 = vadd.f32 %v9581_v7, %v2162_v38  ;;  %v1951_v0 = vsel %vm4871_vm8, %v1949_v54, %v1950_v58  ;;  %v859_v48 = vmul.f32 %v9422_v25, %v6116_v8 }
 0x1c5   : > { %v2430_v17 = vadd.f32 %v2366_v14, %v2294_v53  ;;  %v1390_v33 = vadd.f32 %v1184_v22, %v824_v56  ;;  %v1022_v41 = vmul.f32 %v9504_v31, %v9580_v43  ;;  %v9583_v56 = vrot.slane %v6573_v50, 7 }
 0x1c6   : > { %v2434_v53 = vadd.f32 %v2370_v10, %v2298_v51  ;;  %v9584_v58 = vrot.slane %v6712_v4, 7  ;;  %v9022_v40 = vrot.slane %v6828_v34, 7  ;;  %v1494_v8 = vmul.f32 %v9575_v47, %v9580_v43  ;;  %v9587_v51 = vld [vmem:[#allocation13_spill] sm:$0xff] }
 0x1c7   : > { %v2925_v14 = vadd.f32 %v2721_v5, %v2430_v17  ;;  %v1526_v38 = vadd.f32 %v1462_v12, %v1390_v33  ;;  %v1282_v22 = vrot.slane %v9583_v56, 2  ;;  %v1283_v7 = vrot.slane %v1022_v41, 7  ;;  %v9585_v5 = vld [vmem:[#allocation120_spill] sm:$0xff]  ;;  %v9586_v12 = vld [vmem:[#allocation146_spill] sm:$0xff] }
 0x1c8   : > { %v2718_v54 = vsel %vm4871_vm8, %v2716_v3, %v9584_v58  ;;  %v2929_v31 = vadd.f32 %v2733_v20, %v2434_v53  ;;  %v1495_v10 = vmul.f32 %v9520_v46, %v9585_v5  ;;  %v1293_v3 = vsel %vm4871_vm8, %v9586_v12, %v9022_v40  ;;  %v9588_v41 = vld [vmem:[#allocation76_spill] sm:$0xff] }
 0x1c9   : > { %v3061_v27 = vadd.f32 %v6731_v44, %v2925_v14  ;;  %v1662_v17 = vadd.f32 %v1598_v32, %v1526_v38  ;;  %v1284_v50 = vsel %vm4871_vm8, %v1282_v22, %v1283_v7  ;;  %v1285_v4 = vrot.slane %v1283_v7, 2  ;;  %v9590_v53 = vld [vmem:[#allocation136_spill] sm:$0xff]  ;;  %v9592_v7 = vld [vmem:[#allocation127_spill] sm:$0xff] }
 0x1ca   : > { %v1497_v33 = vmul.f32 %v9587_v51, %v9582_v15  ;;  %v3065_v32 = vadd.f32 %v3001_v30, %v2929_v31  ;;  %v1422_v14 = vadd.f32 %v1284_v50, %v856_v63  ;;  %v9591_v38 = vrot.slane %v9590_v53, 7  ;;  %v9596_v40 = vld [vmem:[#allocation144_spill] sm:$0xff] }
 0x1cb   : > { %v6852_v44 = vadd.f32 %v9588_v41, %v3061_v27  ;;  %v2157_v20 = vadd.f32 %v1951_v0, %v1662_v17  ;;  %v1425_v22 = vadd.f32 %v1293_v3, %v859_v48  ;;  %v1630_v58 = vmul.f32 %v9576_v11, %v9517_v36  ;;  %v9594_v17 = vld [vmem:[#allocation143_spill] sm:$0xff]  ;;  %v9620_v36 = vld [vmem:[#allocation160_spill] sm:$0xff] }
 0x1cc   : > { %v1287_v56 = vsel %vm4871_vm8, %v1285_v4, %v9591_v38  ;;  %v1631_v12 = vmul.f32 %v9521_v45, %v9592_v7  ;;  %v6865_v27 = vadd.f32 %v9588_v41, %v3065_v32  ;;  %v1558_v30 = vadd.f32 %v1494_v8, %v1422_v14  ;;  %v9595_v4 = vld [vmem:[#allocation23_spill] sm:$0xff] }
 0x1cd   : > { %9589 = vst [vmem:[#allocation131_spill] sm:$0xff] %v6852_v44  ;;  %3866 = vrot.lane.b32.xlu0 %v6852_v44, %s4732_s14  ;;  %v2293_v31 = vadd.f32 %v2229_v1, %v2157_v20  ;;  %v1423_v63 = vadd.f32 %v1287_v56, %v857_v49  ;;  %v1561_v0 = vadd.f32 %v1497_v33, %v1425_v22  ;;  %v6880_v8 = vrot.slane %v6793_v62, 4 }
 0x1ce   : > { %9593 = vst [vmem:[#allocation48_spill] sm:$0xff] %v6865_v27  ;;  %v1633_v50 = vmul.f32 %v9427_v19, %v9594_v17  ;;  %v1789_v48 = vmul.f32 %v9513_v21, %v9592_v7  ;;  %v1791_v3 = vmul.f32 %v9595_v4, %v9594_v17  ;;  %3874 = vrot.lane.b32.xlu1 %v6865_v27, %s4732_s14  ;;  %v9597_v1 = vrot.slane %v6592_v61, 7 }
 0x1cf   : > { %v2429_v53 = vadd.f32 %v2365_v29, %v2293_v31  ;;  %v1559_v38 = vadd.f32 %v1495_v10, %v1423_v63  ;;  %v1694_v32 = vadd.f32 %v1630_v58, %v1558_v30  ;;  %v6877_v49 = vmul.f32 %v9518_v55, %v9596_v40  ;;  %v9598_v58 = vld [vmem:[#allocation149_spill] sm:$0xff] }
 0x1d0   : > { %v2049_v33 = vrot.slane %v9597_v1, 2  ;;  %v2050_v20 = vrot.slane %v1789_v48, 7  ;;  %v2056_v14 = vrot.slane %v1791_v3, 7  ;;  %v1697_v44 = vadd.f32 %v1633_v50, %v1561_v0 }
 0x1d1   : > { %v2924_v56 = vadd.f32 %v2718_v54, %v2429_v53  ;;  %v1695_v22 = vadd.f32 %v1631_v12, %v1559_v38  ;;  %v9027_v27 = vrot.slane %v6877_v49, 7  ;;  %v2261_v54 = vmul.f32 %v9578_v23, %v9592_v7  ;;  %v9599_v12 = vld [vmem:[#allocation141_spill] sm:$0xff]  ;;  %v9601_v53 = vld [vmem:[#allocation140_spill] sm:$0xff] }
 0x1d2   : > { %v2051_v29 = vsel %vm4871_vm8, %v2049_v33, %v2050_v20  ;;  %v2052_v10 = vrot.slane %v2050_v20, 2  ;;  %v2057_v31 = vsel %vm4871_vm8, %v9598_v58, %v2056_v14  ;;  %v2058_v63 = vrot.slane %v2056_v14, 2  ;;  %v9607_v58 = vld [vmem:[#allocation164_spill] sm:$0xff] }
 0x1d3   : > { %v3060_v30 = vadd.f32 %v6803_v9, %v2924_v56  ;;  %v2189_v61 = vadd.f32 %v2051_v29, %v1694_v32  ;;  %v2191_v48 = vadd.f32 %v2057_v31, %v6615_v42  ;;  %v9600_v0 = vrot.slane %v9599_v12, 7  ;;  %v9602_v42 = vld [vmem:[#allocation54_spill] sm:$0xff]  ;;  %v9605_v29 = vld [vmem:[#allocation156_spill] sm:$0xff] }
 0x1d4   : > { %v2060_v3 = vsel %vm4871_vm8, %v2058_v63, %v9027_v27  ;;  %v2262_v38 = vmul.f32 %v9541_v57, %v9601_v53  ;;  %v2263_v9 = vmul.f32 %v9350_v13, %v9594_v17  ;;  %v2264_v20 = vmul.f32 %v9439_v59, %v9596_v40  ;;  %v9608_v63 = vld [vmem:[#allocation37_spill] sm:$0xff]  ;;  %v9613_v12 = vld [vmem:[#allocation154_spill] sm:$0xff]  ;;  %v9657_v23 = vld [vmem:[#allocation4_spill] sm:$0xff] }
 0x1d5   : > { %v2054_v50 = vsel %vm4871_vm8, %v2052_v10, %v9600_v0  ;;  %v6907_v32 = vadd.f32 %v9602_v42, %v3060_v30  ;;  %v2192_v33 = vadd.f32 %v2060_v3, %v1697_v44  ;;  %v2458_v14 = vadd.f32 %v6675_v2, %v6705_v28  ;;  %v9609_v30 = vld [vmem:[#allocation116_spill] sm:$0xff]  ;;  %v9615_v53 = vld [vmem:[#allocation57_spill] sm:$0xff] }
 0x1d6   : > { %v2190_v1 = vadd.f32 %v2054_v50, %v1695_v22  ;;  %v6915_v56 = vadd.f32 %v6679_v26, %v6684_v6  ;;  %v9606_v10 = vrot.slane %v9605_v29, 7  ;;  %v6924_v22 = vmul.f32 %v9609_v30, %v9608_v63  ;;  %v9612_v26 = vld [vmem:[#allocation49_spill] sm:$0xff] }
 0x1d7   : > { %9603 = vst [vmem:[#allocation93_spill] sm:$0xff] %v6907_v32  ;;  %3864 = vrot.lane.b32.xlu2 %v6907_v32, %s4732_s14  ;;  %v6929_v44 = vrot.slane %v6793_v62, 6  ;;  %v2325_v2 = vadd.f32 %v2261_v54, %v2189_v61  ;;  %v2327_v28 = vadd.f32 %v2263_v9, %v2191_v48  ;;  %v2556_v6 = vmul.f32 %v9612_v26, %v6793_v62  ;;  %v9614_v50 = vld [vmem:[#allocation17_spill] sm:$0xff] }
 0x1d8   : > { %9604 = vst [vmem:[#allocation132_spill] sm:$0xff] %v6915_v56  ;;  %v2808_v31 = vsel %vm4871_vm8, %v9607_v58, %v9606_v10  ;;  %v2397_v0 = vmul.f32 %v9579_v35, %v9613_v12  ;;  %v2399_v3 = vmul.f32 %v9614_v50, %v6811_v24  ;;  %v2557_v29 = vmul.f32 %v9615_v53, %v6811_v24  ;;  %v9616_v10 = vld [vmem:[#allocation44_spill] sm:$0xff]  ;;  %v9617_v48 = vld [vmem:[#allocation45_spill] sm:$0xff]  ;;  %v9656_v35 = vld [vmem:[#allocation59_spill] sm:$0xff] }
 0x1d9   : > { %9610 = vst [vmem:[#allocation84_spill] sm:$0xff] %v6924_v22  ;;  %v2558_v58 = vmul.f32 %v9616_v10, %v6880_v8  ;;  %v2326_v63 = vadd.f32 %v2262_v38, %v2190_v1  ;;  %v2328_v27 = vadd.f32 %v2264_v20, %v2192_v33  ;;  %v2398_v61 = vmul.f32 %v9542_v37, %v6793_v62  ;;  %v9618_v9 = vld [vmem:[#allocation161_spill] sm:$0xff]  ;;  %v9624_v38 = vld [vmem:[#allocation50_spill] sm:$0xff] }
 0x1da   : > { %9611 = vst [vmem:[#allocation130_spill] sm:$0xff] %v6929_v44  ;;  %v2400_v54 = vmul.f32 %v9617_v48, %v6880_v8  ;;  %v9619_v32 = vrot.slane %v9618_v9, 7  ;;  %v2817_v56 = vrot.slane %v2556_v6, 7  ;;  %v2820_v17 = vrot.slane %v2557_v29, 7 }
 0x1db   : > { %v2823_v7 = vrot.slane %v2558_v58, 7  ;;  %v9621_v5 = vrot.slane %v9620_v36, 7  ;;  %v6951_v41 = vadd.f32 %v2808_v31, %v2458_v14  ;;  %v6955_v1 = vmul.f32 %v9624_v38, %v9613_v12  ;;  %v9629_v14 = vld [vmem:[#allocation100_spill] sm:$0xff] }
 0x1dc   : > { %v2816_v22 = vrot.slane %v9619_v32, 2  ;;  %v6959_v33 = vmul.f32 %v9538_v18, %v6929_v44  ;;  %v2461_v20 = vadd.f32 %v2397_v0, %v2325_v2  ;;  %v2463_v9 = vadd.f32 %v2399_v3, %v2327_v28  ;;  %v9630_v28 = vld [vmem:[#allocation68_spill] sm:$0xff]  ;;  %v9631_v3 = vld [vmem:[#allocation51_spill] sm:$0xff] }
 0x1dd   : > { %v6949_v43 = vrot.slane %v9621_v5, 2  ;;  %9623 = vst [vmem:[#allocation80_spill] sm:$0xff] %v6951_v41  ;;  %v2819_v32 = vrot.slane %v2817_v56, 2  ;;  %v2822_v6 = vrot.slane %v2820_v17, 2  ;;  %v2462_v29 = vadd.f32 %v2398_v61, %v2326_v63  ;;  %v9627_v5 = vld [vmem:[#allocation29_spill] sm:$0xff]  ;;  %v9670_v41 = vld [vmem:[#allocation103_spill] sm:$0xff] }
 0x1de   : > { %9625 = vst [vmem:[#allocation146_spill] sm:$0xff] %v6955_v1  ;;  %v6961_v58 = vadd.f32 %v2400_v54, %v2328_v27  ;;  %v2825_v36 = vrot.slane %v2823_v7, 2  ;;  %v2818_v12 = vsel %vm4871_vm8, %v2816_v22, %v2817_v56  ;;  %v823_v27 = vmul.f32 %v9422_v25, %v9630_v28  ;;  %v9636_v22 = vld [vmem:[#allocation70_spill] sm:$0xff] }
 0x1df   : > { %9622 = vst [vmem:[#allocation78_spill] sm:$0xff] %v6949_v43  ;;  %v9628_v43 = vrot.slane %v9627_v5, 7  ;;  %v2821_v1 = vsel %vm4871_vm8, %v2819_v32, %v2820_v17  ;;  %v2824_v2 = vsel %vm4871_vm8, %v2822_v6, %v2823_v7  ;;  %v9035_v0 = vrot.slane %v6959_v33, 7  ;;  %v9637_v32 = vld [vmem:[#allocation88_spill] sm:$0xff] }
 0x1e0   : > { %9626 = vst [vmem:[#allocation136_spill] sm:$0xff] %v6959_v33  ;;  %v6979_v63 = vmul.f32 %v9631_v3, %v6793_v62  ;;  %v6987_v56 = vmul.f32 %v9609_v30, %v6880_v8  ;;  %v6991_v7 = vmul.f32 %v9624_v38, %v6929_v44  ;;  %v1461_v54 = vmul.f32 %v9587_v51, %v9636_v22 }
 0x1e1   : > { %v1181_v31 = vsel %vm4871_vm8, %v9629_v14, %v9628_v43  ;;  %v9632_v43 = vld [vmem:[#allocation72_spill] sm:$0xff]  ;;  %v1597_v62 = vmul.f32 %v9427_v19, %v9637_v32  ;;  %v7003_v6 = vadd.f32 %v2818_v12, %v2461_v20  ;;  %v7005_v8 = vadd.f32 %v2821_v1, %v2462_v29  ;;  %v9646_v1 = vld [vmem:[#allocation77_spill] sm:$0xff]  ;;  %v9648_v12 = vld [vmem:[#allocation18_spill] sm:$0xff] }
 0x1e2   : > { %v6983_v61 = vmul.f32 %v9632_v43, %v6811_v24  ;;  %9634 = vst [vmem:[#allocation141_spill] sm:$0xff] %v6987_v56  ;;  %v1389_v17 = vadd.f32 %v1181_v31, %v823_v27  ;;  %v7001_v24 = vsel %vm4871_vm8, %v2825_v36, %v9035_v0  ;;  %v7007_v30 = vadd.f32 %v2824_v2, %v2463_v9  ;;  %v9641_v31 = vld [vmem:[#allocation104_spill] sm:$0xff]  ;;  %v9642_v27 = vld [vmem:[#allocation89_spill] sm:$0xff]  ;;  %v9645_v0 = vld [vmem:[#allocation75_spill] sm:$0xff] }
 0x1e3   : > { %9635 = vst [vmem:[#allocation140_spill] sm:$0xff] %v6991_v7  ;;  %v9640_v14 = vrot.slane %v6779_v39, 7  ;;  %v2228_v22 = vmul.f32 %v9439_v59, %v9642_v27  ;;  %v9643_v43 = vld [vmem:[#allocation81_spill] sm:$0xff]  ;;  %v2364_v20 = vmul.f32 %v9617_v48, %v9645_v0  ;;  %v2995_v9 = vmul.f32 %v9624_v38, %v9646_v1  ;;  %v9647_v29 = vld [vmem:[#allocation56_spill] sm:$0xff]  ;;  %v9661_v56 = vld [vmem:[#allocation107_spill] sm:$0xff] }
 0x1e4   : > { %9633 = vst [vmem:[#allocation149_spill] sm:$0xff] %v6983_v61  ;;  %v1525_v5 = vadd.f32 %v1461_v54, %v1389_v17  ;;  %v9644_v3 = vrot.slane %v9643_v43, 7  ;;  %v7024_v2 = vmul.f32 %v9648_v12, %v9647_v29  ;;  %v9650_v39 = vld [vmem:[#allocation64_spill] sm:$0xff]  ;;  %v9653_v43 = vld [vmem:[#allocation30_spill] sm:$0xff]  ;;  %v7038_v44 = vmul.f32 %v9595_v4, %v9656_v35  ;;  %v9660_v7 = vld [vmem:[#allocation105_spill] sm:$0xff] }
 0x1e5   : > { %9638 = vst [vmem:[#allocation156_spill] sm:$0xff] %v7005_v8  ;;  %v1948_v28 = vsel %vm4871_vm8, %v9641_v31, %v9640_v14  ;;  %v9651_v17 = vld [vmem:[#allocation8_spill] sm:$0xff]  ;;  %v9652_v31 = vld [vmem:[#allocation3_spill] sm:$0xff]  ;;  %v7053_v45 = vmul.f32 %v9615_v53, %v9660_v7  ;;  %v1760_v53 = vmul.f32 %v9595_v4, %v9645_v0 }
 0x1e6   : > { %9639 = vst [vmem:[#allocation164_spill] sm:$0xff] %v7007_v30  ;;  %v2713_v36 = vrot.slane %v9644_v3, 2  ;;  %v7028_v54 = vmul.f32 %v9651_v17, %v9650_v39  ;;  %v1661_v14 = vadd.f32 %v1597_v62, %v1525_v5  ;;  %v834_v33 = vmul.f32 %v9652_v31, %v9647_v29  ;;  %v9654_v3 = vld [vmem:[#allocation53_spill] sm:$0xff]  ;;  %v9658_v62 = vld [vmem:[#allocation14_spill] sm:$0xff]  ;;  %v9668_v8 = vld [vmem:[#allocation95_spill] sm:$0xff] }
 0x1e7   : > { %9649 = vst [vmem:[#allocation37_spill] sm:$0xff] %v7024_v2  ;;  %v7034_v37 = vmul.f32 %v9654_v3, %v9653_v43  ;;  %v9046_v57 = vrot.slane %v7024_v2, 7  ;;  %v1472_v17 = vmul.f32 %v9657_v23, %v9650_v39  ;;  %v1608_v5 = vmul.f32 %v9658_v62, %v9653_v43  ;;  %v9667_v30 = vld [vmem:[#allocation42_spill] sm:$0xff] }
 0x1e8   : > { %v2156_v42 = vadd.f32 %v1948_v28, %v1661_v14  ;;  %v9659_v31 = vrot.slane %v6791_v52, 7  ;;  %v7060_v62 = vmul.f32 %v9616_v10, %v9661_v56  ;;  %v9662_v28 = vld [vmem:[#allocation74_spill] sm:$0xff]  ;;  %v9663_v52 = vld [vmem:[#allocation9_spill] sm:$0xff]  ;;  %v2239_v2 = vmul.f32 %v9350_v13, %v9656_v35 }
 0x1e9   : > { %9655 = vst [vmem:[#allocation116_spill] sm:$0xff] %v7034_v37  ;;  %v9048_v29 = vrot.slane %v7034_v37, 7  ;;  %v1213_v12 = vrot.slane %v9046_v57, 2  ;;  %v1759_v14 = vmul.f32 %v9663_v52, %v9662_v28  ;;  %v9664_v57 = vrot.slane %v7028_v54, 7 }
 0x1ea   : > { %v2715_v3 = vsel %vm4871_vm8, %v2713_v36, %v9659_v31  ;;  %v2292_v43 = vadd.f32 %v2228_v22, %v2156_v42  ;;  %v2375_v52 = vmul.f32 %v9614_v50, %v9660_v7  ;;  %v2235_v31 = vmul.f32 %v9350_v13, %v9645_v0 }
 0x1eb   : > { %v1980_v36 = vrot.slane %v9048_v29, 2  ;;  %v1215_v23 = vsel %vm4871_vm8, %v1213_v12, %v9664_v57  ;;  %v4479_v42 = vrot.slane %v1759_v14, 9  ;;  %v9665_v4 = vrot.slane %v7038_v44, 7  ;;  %v9666_v12 = vld [vmem:[#allocation43_spill] sm:$0xff] }
 0x1ec   : > { %v2428_v22 = vadd.f32 %v2364_v20, %v2292_v43  ;;  %v1400_v28 = vadd.f32 %v1215_v23, %v834_v33  ;;  %v1969_v57 = vrot.slane %v1760_v53, 7  ;;  %v2526_v61 = vmul.f32 %v9667_v30, %v9666_v12 }
 0x1ed   : > { %v1982_v37 = vsel %vm4871_vm8, %v1980_v36, %v9665_v4  ;;  %v2527_v7 = vmul.f32 %v9616_v10, %v9668_v8  ;;  %v9669_v23 = vrot.slane %v7053_v45, 7  ;;  %v2371_v43 = vmul.f32 %v9614_v50, %v9666_v12 }
 0x1ee   : > { %v2923_v14 = vadd.f32 %v2715_v3, %v2428_v22  ;;  %v1536_v20 = vadd.f32 %v1472_v17, %v1400_v28  ;;  %v1970_v29 = vsel %vm4871_vm8, %v4479_v42, %v1969_v57  ;;  %v4487_v13 = vrot.slane %v2526_v61, 9  ;;  %v7102_v3 = vld [vmem:[%s8633_s2 + $0x8] ss:$0 sm:$0xff]  ;;  %v9672_v61 = vld [vmem:[#allocation101_spill] sm:$0xff] }
 0x1ef   : > { %v2747_v33 = vrot.slane %v9669_v23, 2  ;;  %v2736_v4 = vrot.slane %v2527_v7, 7  ;;  %v831_v53 = vmul.f32 %v9422_v25, %v9637_v32  ;;  %v2163_v10 = vadd.f32 %v1970_v29, %v9670_v41  ;;  %9671 = vst [vmem:[#allocation154_spill] sm:$0xff] %v7102_v3  ;;  %v9673_v41 = vld [vmem:[#allocation60_spill] sm:$0xff] }
 0x1f0   : > { %v3059_v36 = vadd.f32 %v2995_v9, %v2923_v14  ;;  %v1672_v30 = vadd.f32 %v1608_v5, %v1536_v20  ;;  %v1469_v17 = vmul.f32 %v9587_v51, %v9642_v27  ;;  %v3006_v28 = vmul.f32 %v7102_v3, %v9661_v56 }
 0x1f1   : > { %v1397_v7 = vadd.f32 %v9672_v61, %v831_v53  ;;  %v1605_v32 = vmul.f32 %v9427_v19, %v9645_v0  ;;  %v7111_v9 = vmul.f32 %v9518_v55, %v9646_v1  ;;  %v2299_v42 = vadd.f32 %v2235_v31, %v2163_v10  ;;  %v9676_v10 = vld [vmem:[#allocation92_spill] sm:$0xff] }
 0x1f2   : > { %v7114_v29 = vadd.f32 %v9673_v41, %v3059_v36  ;;  %v2167_v5 = vadd.f32 %v1982_v37, %v1672_v30  ;;  %v1971_v22 = vrot.slane %v1969_v57, 2  ;;  %v9675_v14 = vrot.slane %v7060_v62, 7 }
 0x1f3   : > { %v2737_v23 = vsel %vm4871_vm8, %v4487_v13, %v2736_v4  ;;  %v1533_v53 = vadd.f32 %v1469_v17, %v1397_v7  ;;  %v9055_v61 = vrot.slane %v7111_v9, 7  ;;  %v2435_v36 = vadd.f32 %v2371_v43, %v2299_v42  ;;  %v9677_v7 = vld [vmem:[#allocation66_spill] sm:$0xff] }
 0x1f4   : > { %9674 = vst [vmem:[#allocation29_spill] sm:$0xff] %v7114_v29  ;;  %v2749_v20 = vsel %vm4871_vm8, %v2747_v33, %v9675_v14  ;;  %3862 = vrot.lane.b32.xlu1 %v7114_v29, %s4732_s14  ;;  %v2303_v50 = vadd.f32 %v2239_v2, %v2167_v5  ;;  %v3002_v37 = vmul.f32 %v7102_v3, %v9668_v8  ;;  %v2738_v33 = vrot.slane %v2736_v4, 2 }
 0x1f5   : > { %v7129_v30 = vmul.f32 %v9538_v18, %v9676_v10  ;;  %v1669_v31 = vadd.f32 %v1605_v32, %v1533_v53  ;;  %v1973_v13 = vsel %vm4871_vm8, %v1971_v22, %v9055_v61  ;;  %v2236_v57 = vmul.f32 %v9439_v59, %v9646_v1 }
 0x1f6   : > { %v2439_v17 = vadd.f32 %v2375_v52, %v2303_v50  ;;  %v2930_v2 = vadd.f32 %v2737_v23, %v2435_v36  ;;  %v2372_v43 = vmul.f32 %v9617_v48, %v9668_v8  ;;  %v7141_v5 = vmul.f32 %v9509_v16, %v9677_v7 }
 0x1f7   : > { %v2164_v42 = vadd.f32 %v1973_v13, %v1669_v31  ;;  %v9056_v32 = vrot.slane %v7129_v30, 7  ;;  %v835_v14 = vmul.f32 %v9422_v25, %v9650_v39  ;;  %v9678_v22 = vrot.slane %v7028_v54, 7  ;;  %v9679_v39 = vld [vmem:[#allocation87_spill] sm:$0xff] }
 0x1f8   : > { %v2934_v61 = vadd.f32 %v2749_v20, %v2439_v17  ;;  %v3066_v4 = vadd.f32 %v3002_v37, %v2930_v2  ;;  %v9059_v50 = vrot.slane %v7141_v5, 7  ;;  %v1473_v52 = vmul.f32 %v9587_v51, %v9677_v7  ;;  %v7164_v37 = vld [vmem:[%s8634_s3] ss:$0 sm:$0xff]  ;;  %v9703_v51 = vld [vmem:[#allocation164_spill] sm:$0xff] }
 0x1f9   : > { %v1216_v53 = vrot.slane %v9678_v22, 2  ;;  %v2300_v23 = vadd.f32 %v2236_v57, %v2164_v42  ;;  %v2740_v36 = vsel %vm4871_vm8, %v2738_v33, %v9056_v32  ;;  %v1609_v31 = vmul.f32 %v9427_v19, %v9656_v35  ;;  %9680 = vst [vmem:[#allocation100_spill] sm:$0xff] %v7164_v37 }
 0x1fa   : > { %v7159_v54 = vmul.f32 %v9518_v55, %v9679_v39  ;;  %v3070_v20 = vadd.f32 %v3006_v28, %v2934_v61  ;;  %v7167_v13 = vadd.f32 %v7164_v37, %v3066_v4  ;;  %v9682_v33 = vrot.slane %v7038_v44, 7  ;;  %v9683_v61 = vld [vmem:[#allocation110_spill] sm:$0xff]  ;;  %v9733_v55 = vld [vmem:[#allocation37_spill] sm:$0xff] }
 0x1fb   : > { %v1218_v57 = vsel %vm4871_vm8, %v1216_v53, %v9059_v50  ;;  %v2436_v2 = vadd.f32 %v2372_v43, %v2300_v23  ;;  %v7178_v22 = vmul.f32 %v9538_v18, %v9683_v61  ;;  %v2959_v4 = vadd.f32 %v7001_v24, %v6961_v58 }
 0x1fc   : > { %9681 = vst [vmem:[#allocation68_spill] sm:$0xff] %v7167_v13  ;;  %v1983_v17 = vrot.slane %v9682_v33, 2  ;;  %v1401_v42 = vadd.f32 %v1218_v57, %v835_v14  ;;  %v9062_v28 = vrot.slane %v7159_v54, 7  ;;  %v3092_v32 = vadd.f32 %v6979_v63, %v7003_v6  ;;  %3876 = vrot.lane.b32.xlu2 %v7167_v13, %s4732_s14  ;;  %v7202_v6 = vpop.f32.mrf.mxu3  ;;  %v9688_v57 = vld [vmem:[#allocation125_spill] sm:$0xff]  ;;  %v9689_v33 = vld [vmem:[#allocation11_spill] sm:$0xff] }
 0x1fd   : > { %v7185_v29 = vadd.f32 %v7164_v37, %v3070_v20  ;;  %v3003_v44 = vmul.f32 %v9624_v38, %v9676_v10  ;;  %v2931_v43 = vadd.f32 %v2740_v36, %v2436_v2  ;;  %v2240_v53 = vmul.f32 %v9439_v59, %v9679_v39  ;;  %v9686_v36 = vld [vmem:[#allocation124_spill] sm:$0xff] }
 0x1fe   : > { %v1537_v14 = vadd.f32 %v1473_v52, %v1401_v42  ;;  %v9685_v23 = vrot.slane %v7060_v62, 7  ;;  %v1985_v63 = vsel %vm4871_vm8, %v1983_v17, %v9062_v28  ;;  %v9687_v52 = vld [vmem:[#allocation12_spill] sm:$0xff]  ;;  %v1027_v2 = vmul.f32 %v9689_v33, %v9688_v57 }
 0x1ff   : > { %9684 = vst [vmem:[#allocation70_spill] sm:$0xff] %v7185_v29  ;;  %3884 = vrot.lane.b32.xlu0 %v7185_v29, %s4732_s14  ;;  %v1026_v20 = vmul.f32 %v9687_v52, %v9686_v36  ;;  %v2376_v42 = vmul.f32 %v9617_v48, %v9661_v56  ;;  %v9691_v29 = vrot.slane %v6828_v34, 7  ;;  %v3067_v28 = vadd.f32 %v3003_v44, %v2931_v43  ;;  %v9694_v43 = vld [vmem:[#allocation145_spill] sm:$0xff] }
 0x200   : > { %v2750_v58 = vrot.slane %v9685_v23, 2  ;;  %v1673_v62 = vadd.f32 %v1609_v31, %v1537_v14  ;;  %v9690_v23 = vld [vmem:[#allocation6_spill] sm:$0xff]  ;;  %v3007_v24 = vmul.f32 %v9624_v38, %v9683_v61  ;;  %v1298_v35 = vrot.slane %v1027_v2, 7  ;;  %v9692_v31 = vld [vmem:[#allocation7_spill] sm:$0xff] }
 0x201   : > { %v860_v50 = vmul.f32 %v9690_v23, %v9582_v15  ;;  %v1294_v17 = vrot.slane %v9691_v29, 2  ;;  %v1295_v13 = vrot.slane %v1026_v20, 7  ;;  %v720_v37 = vrot.slane %v7202_v6, 2 }
 0x202   : > { %v2168_v59 = vadd.f32 %v1985_v63, %v1673_v62  ;;  %v861_v14 = vmul.f32 %v9692_v31, %v9686_v36  ;;  %v1498_v33 = vmul.f32 %v9575_v47, %v9686_v36  ;;  %v9693_v15 = vrot.slane %v7178_v22, 7 }
 0x203   : > { %v1296_v29 = vsel %vm4871_vm8, %v1294_v17, %v1295_v13  ;;  %v1297_v44 = vrot.slane %v1295_v13, 2  ;;  %v1793_v63 = vmul.f32 %v9513_v21, %v9694_v43  ;;  %v1499_v62 = vmul.f32 %v9520_v46, %v9688_v57 }
 0x204   : > { %v2752_v34 = vsel %vm4871_vm8, %v2750_v58, %v9693_v15  ;;  %v2304_v20 = vadd.f32 %v2240_v53, %v2168_v59  ;;  %v1426_v2 = vadd.f32 %v1296_v29, %v860_v50  ;;  %v1634_v36 = vmul.f32 %v9576_v11, %v9596_v40  ;;  %v9697_v53 = vld [vmem:[#allocation80_spill] sm:$0xff]  ;;  %v9698_v29 = vld [vmem:[#allocation71_spill] sm:$0xff] }
 0x205   : > { %v7234_v56 = vadd.f32 %v9673_v41, %v3067_v28  ;;  %v1299_v15 = vsel %vm4871_vm8, %v1297_v44, %v1298_v35  ;;  %v9696_v58 = vrot.slane %v6877_v49, 7  ;;  %v2062_v17 = vrot.slane %v1793_v63, 7  ;;  %v9700_v40 = vld [vmem:[#allocation156_spill] sm:$0xff]  ;;  %v9701_v28 = vld [vmem:[#allocation149_spill] sm:$0xff]  ;;  %v9706_v49 = vld [vmem:[#allocation26_spill] sm:$0xff] }
 0x206   : > { %v2440_v38 = vadd.f32 %v2376_v42, %v2304_v20  ;;  %v1427_v48 = vadd.f32 %v1299_v15, %v861_v14  ;;  %v1562_v59 = vadd.f32 %v1498_v33, %v1426_v2  ;;  %v2560_v50 = vmul.f32 %v9612_v26, %v7202_v6  ;;  %v9704_v35 = vld [vmem:[#allocation141_spill] sm:$0xff]  ;;  %v9707_v2 = vld [vmem:[#allocation140_spill] sm:$0xff] }
 0x207   : > { %9695 = vst [vmem:[#allocation88_spill] sm:$0xff] %v7234_v56  ;;  %v2061_v13 = vrot.slane %v9696_v58, 2  ;;  %v7244_v57 = vadd.f32 %v9698_v29, %v9697_v53  ;;  %v7248_v19 = vadd.f32 %v9701_v28, %v9700_v40  ;;  %v7252_v44 = vadd.f32 %v9704_v35, %v9703_v51  ;;  %3878 = vrot.lane.b32.xlu0 %v7234_v56, %s4732_s14  ;;  %v9709_v58 = vld [vmem:[#allocation54_spill] sm:$0xff]  ;;  %v9711_v53 = vld [vmem:[#allocation52_spill] sm:$0xff]  ;;  %v9712_v35 = vld [vmem:[#allocation27_spill] sm:$0xff] }
 0x208   : > { %v1635_v33 = vmul.f32 %v9706_v49, %v9694_v43  ;;  %v2935_v42 = vadd.f32 %v2752_v34, %v2440_v38  ;;  %v1563_v14 = vadd.f32 %v1499_v62, %v1427_v48  ;;  %v1698_v63 = vadd.f32 %v1634_v36, %v1562_v59  ;;  %v9714_v38 = vld [vmem:[#allocation63_spill] sm:$0xff]  ;;  %v9715_v34 = vld [vmem:[#allocation130_spill] sm:$0xff] }
 0x209   : > { %9699 = vst [vmem:[#allocation104_spill] sm:$0xff] %v7244_v57  ;;  %v2064_v20 = vrot.slane %v2062_v17, 2  ;;  %v7259_v15 = vadd.f32 %v9707_v2, %v2959_v4  ;;  %v7262_v40 = vadd.f32 %v9709_v58, %v3092_v32  ;;  %v2063_v51 = vsel %vm4871_vm8, %v2061_v13, %v2062_v17  ;;  %v9716_v62 = vld [vmem:[#allocation47_spill] sm:$0xff]  ;;  %v9717_v32 = vld [vmem:[#allocation65_spill] sm:$0xff]  ;;  %v9718_v2 = vld [vmem:[#allocation136_spill] sm:$0xff] }
 0x20a   : > { %9702 = vst [vmem:[#allocation89_spill] sm:$0xff] %v7248_v19  ;;  %v2561_v29 = vmul.f32 %v9711_v53, %v720_v37  ;;  %v3071_v28 = vadd.f32 %v3007_v24, %v2935_v42  ;;  %v2265_v56 = vmul.f32 %v9712_v35, %v9694_v43  ;;  %v9713_v19 = vld [vmem:[#allocation151_spill] sm:$0xff]  ;;  %v2829_v36 = vrot.slane %v2560_v50, 7 }
 0x20b   : > { %9705 = vst [vmem:[#allocation81_spill] sm:$0xff] %v7252_v44  ;;  %v2266_v48 = vmul.f32 %v9714_v38, %v9713_v19  ;;  %v7273_v4 = vmul.f32 %v9716_v62, %v9715_v34  ;;  %v7277_v59 = vmul.f32 %v9717_v32, %v7202_v6  ;;  %v9719_v13 = vrot.slane %v9718_v2, 7  ;;  %v9720_v44 = vld [vmem:[#allocation96_spill] sm:$0xff]  ;;  %v9722_v19 = vld [vmem:[#allocation129_spill] sm:$0xff]  ;;  %v9724_v57 = vld [vmem:[#allocation51_spill] sm:$0xff] }
 0x20c   : > { %9708 = vst [vmem:[#allocation75_spill] sm:$0xff] %v7259_v15  ;;  %v995_v24 = vmul.f32 %v9687_v52, %v9720_v44  ;;  %v7284_v42 = vadd.f32 %v9673_v41, %v3071_v28  ;;  %v1699_v15 = vadd.f32 %v1635_v33, %v1563_v14  ;;  %v9723_v50 = vrot.slane %v9722_v19, 7  ;;  %v9727_v33 = vld [vmem:[#allocation72_spill] sm:$0xff] }
 0x20d   : > { %9710 = vst [vmem:[#allocation77_spill] sm:$0xff] %v7262_v40  ;;  %v2828_v17 = vrot.slane %v9719_v13, 2  ;;  %v2193_v40 = vadd.f32 %v2063_v51, %v1698_v63  ;;  %v2832_v43 = vrot.slane %v2561_v29, 7  ;;  %v7292_v25 = vmul.f32 %v9724_v57, %v7202_v6  ;;  %v9726_v13 = vld [vmem:[#allocation85_spill] sm:$0xff]  ;;  %v9729_v63 = vld [vmem:[#allocation102_spill] sm:$0xff] }
 0x20e   : > { %9721 = vst [vmem:[#allocation64_spill] sm:$0xff] %v7284_v42  ;;  %v2066_v34 = vsel %vm4871_vm8, %v2064_v20, %v9723_v50  ;;  %v1208_v2 = vrot.slane %v995_v24, 7  ;;  %v1762_v18 = vmul.f32 %v9513_v21, %v9726_v13  ;;  %3886 = vrot.lane.b32.xlu1 %v7284_v42, %s4732_s14  ;;  %v2831_v28 = vrot.slane %v2829_v36, 2  ;;  %v9731_v24 = vld [vmem:[#allocation56_spill] sm:$0xff] }
 0x20f   : > { %9725 = vst [vmem:[#allocation43_spill] sm:$0xff] %v7292_v25  ;;  %v7299_v14 = vmul.f32 %v9727_v33, %v720_v37  ;;  %v833_v20 = vmul.f32 %v9692_v31, %v9720_v44  ;;  %v2529_v51 = vmul.f32 %v9612_v26, %v9729_v63  ;;  %v7307_v6 = vsel %vm4871_vm8, %v2828_v17, %v2829_v36  ;;  %v9735_v17 = vld [vmem:[#allocation97_spill] sm:$0xff] }
 0x210   : > { %9730 = vst [vmem:[#allocation103_spill] sm:$0xff] %v7307_v6  ;;  %v1210_v29 = vrot.slane %v1208_v2, 2  ;;  %v1471_v19 = vmul.f32 %v9520_v46, %v9731_v24  ;;  %v1975_v50 = vrot.slane %v1762_v18, 7  ;;  %v2194_v42 = vadd.f32 %v2066_v34, %v1699_v15 }
 0x211   : > { %9728 = vst [vmem:[#allocation95_spill] sm:$0xff] %v7299_v14  ;;  %v7311_v25 = vadd.f32 %v2265_v56, %v2193_v40  ;;  %v2742_v37 = vrot.slane %v2529_v51, 7  ;;  %v9732_v14 = vld [vmem:[#allocation79_spill] sm:$0xff]  ;;  %v9734_v31 = vrot.slane %v9733_v55, 7  ;;  %v832_v36 = vmul.f32 %v9690_v23, %v9642_v27  ;;  %v9738_v55 = vld [vmem:[#allocation30_spill] sm:$0xff] }
 0x212   : > { %v3240_v41 = vmul.f32 0.044715, %v9732_v14  ;;  %v1977_v52 = vrot.slane %v1975_v50, 2  ;;  %v9736_v16 = vrot.slane %v9735_v17, 7  ;;  %v7324_v18 = vsel %vm4871_vm8, %v2831_v28, %v2832_v43  ;;  %v9739_v28 = vld [vmem:[#allocation116_spill] sm:$0xff]  ;;  %v9743_v17 = vld [vmem:[#allocation105_spill] sm:$0xff] }
 0x213   : > { %v1212_v3 = vsel %vm4871_vm8, %v1210_v29, %v9734_v31  ;;  %9737 = vst [vmem:[#allocation101_spill] sm:$0xff] %v7324_v18  ;;  %v1607_v15 = vmul.f32 %v9706_v49, %v9726_v13  ;;  %v2744_v40 = vrot.slane %v2742_v37, 2  ;;  %v2238_v34 = vmul.f32 %v9714_v38, %v9738_v55  ;;  %v9750_v55 = vld [vmem:[#allocation112_spill] sm:$0xff] }
 0x214   : > { %v1207_v6 = vrot.slane %v9736_v16, 2  ;;  %v1399_v56 = vadd.f32 %v1212_v3, %v833_v20  ;;  %v3304_v31 = vmul.f32 %v3240_v41, %v9732_v14  ;;  %v1470_v16 = vmul.f32 %v9575_v47, %v9720_v44 }
 0x215   : > { %v7335_v51 = vadd.f32 %v2266_v48, %v2194_v42  ;;  %v9740_v3 = vrot.slane %v9739_v28, 7  ;;  %v2374_v29 = vmul.f32 %v9717_v32, %v9729_v63  ;;  %v9742_v42 = vrot.slane %v7053_v45, 7 }
 0x216   : > { %v1209_v27 = vsel %vm4871_vm8, %v1207_v6, %v1208_v2  ;;  %v1535_v43 = vadd.f32 %v1471_v19, %v1399_v56  ;;  %v3368_v24 = vmul.f32 %v3304_v31, %v9732_v14  ;;  %v1606_v2 = vmul.f32 %v9576_v11, %v9646_v1 }
 0x217   : > { %v1979_v20 = vsel %vm4871_vm8, %v1977_v52, %v9740_v3  ;;  %v1398_v41 = vadd.f32 %v1209_v27, %v832_v36  ;;  %v9741_v6 = vrot.slane %v7111_v9, 7  ;;  %v2746_v19 = vsel %vm4871_vm8, %v2744_v40, %v9742_v42  ;;  %v9745_v40 = vld [vmem:[#allocation94_spill] sm:$0xff] }
 0x218   : > { %v1671_v48 = vadd.f32 %v1607_v15, %v1535_v43  ;;  %v3005_v52 = vmul.f32 %v9727_v33, %v9743_v17  ;;  %v2237_v56 = vmul.f32 %v9712_v35, %v9726_v13  ;;  %v3432_v36 = vadd.f32 %v3368_v24, %v9732_v14  ;;  %v9746_v24 = vld [vmem:[#allocation73_spill] sm:$0xff]  ;;  %v9749_v17 = vld [vmem:[#allocation111_spill] sm:$0xff] }
 0x219   : > { %v1974_v44 = vrot.slane %v9741_v6, 2  ;;  %v1534_v31 = vadd.f32 %v1470_v16, %v1398_v41  ;;  %v2373_v27 = vmul.f32 %v9716_v62, %v9676_v10  ;;  %v9744_v9 = vrot.slane %v7129_v30, 7  ;;  %v9747_v41 = vld [vmem:[#allocation28_spill] sm:$0xff] }
 0x21a   : > { %v2166_v43 = vadd.f32 %v1979_v20, %v1671_v48  ;;  %v1611_v28 = vmul.f32 %v9706_v49, %v9745_v40  ;;  %v1766_v3 = vmul.f32 %v9513_v21, %v9745_v40  ;;  %v3496_v6 = vmul.f32 0.7978846, %v3432_v36  ;;  %v9748_v48 = vld [vmem:[#allocation35_spill] sm:$0xff] }
 0x21b   : > { %v2741_v15 = vrot.slane %v9744_v9, 2  ;;  %v1976_v45 = vsel %vm4871_vm8, %v1974_v44, %v1975_v50  ;;  %v1670_v42 = vadd.f32 %v1606_v2, %v1534_v31  ;;  %v3004_v16 = vmul.f32 %v9724_v57, %v9729_v63 }
 0x21c   : > { %v1767_v46 = vmul.f32 %v9747_v41, %v9746_v24  ;;  %v2302_v30 = vadd.f32 %v2238_v34, %v2166_v43  ;;  %v1675_v50 = vadd.f32 %v1611_v28, %v9748_v48  ;;  %v1987_v44 = vrot.slane %v1766_v3, 7  ;;  %v9752_v48 = vld [vmem:[#allocation61_spill] sm:$0xff] }
 0x21d   : > { %v2743_v20 = vsel %vm4871_vm8, %v2741_v15, %v2742_v37  ;;  %4558 = vtanh.f32 %v3496_v6  ;;  %v2165_v9 = vadd.f32 %v1976_v45, %v1670_v42  ;;  %v2242_v36 = vmul.f32 %v9714_v38, %v9746_v24 }
 0x21e   : > { %v1990_v49 = vrot.slane %v1767_v46, 7  ;;  %v2438_v2 = vadd.f32 %v2374_v29, %v2302_v30  ;;  %v1989_v31 = vrot.slane %v1987_v44, 2  ;;  %v2533_v18 = vmul.f32 %v9612_v26, %v9749_v17 }
 0x21f   : > { %v2534_v34 = vmul.f32 %v9711_v53, %v9750_v55  ;;  %v2301_v43 = vadd.f32 %v2237_v56, %v2165_v9  ;;  %v2378_v37 = vmul.f32 %v9717_v32, %v9749_v17  ;;  %v836_v15 = vmul.f32 %v9690_v23, %v9677_v7  ;;  %v9754_v9 = vld [vmem:[#allocation58_spill] sm:$0xff] }
 0x220   : > { %v9751_v46 = vrot.slane %v7141_v5, 7  ;;  %v2933_v28 = vadd.f32 %v2746_v19, %v2438_v2  ;;  %v1991_v29 = vsel %vm4871_vm8, %v1989_v31, %v1990_v49  ;;  %v2754_v3 = vrot.slane %v2533_v18, 7 }
 0x221   : > { %v2757_v6 = vrot.slane %v2534_v34, 7  ;;  %v2437_v42 = vadd.f32 %v2373_v27, %v2301_v43  ;;  %v2170_v30 = vadd.f32 %v1991_v29, %v1675_v50  ;;  %v9753_v53 = vrot.slane %v9752_v48, 7  ;;  %v9756_v34 = vld [vmem:[#allocation76_spill] sm:$0xff] }
 0x222   : > { %v1219_v45 = vrot.slane %v9751_v46, 2  ;;  %v1474_v41 = vmul.f32 %v9575_v47, %v9754_v9  ;;  %v3069_v7 = vadd.f32 %v3005_v52, %v2933_v28  ;;  %v2756_v24 = vrot.slane %v2754_v3, 2 }
 0x223   : > { %v1610_v19 = vmul.f32 %v9576_v11, %v9679_v39  ;;  %v4559_v2 = vpop.eup %4558  ;;  %v3176_v49 = vmul.f32 0.5, %v9732_v14  ;;  %v2932_v18 = vadd.f32 %v2743_v20, %v2437_v42  ;;  %v2306_v27 = vadd.f32 %v2242_v36, %v2170_v30  ;;  %v9760_v42 = vld [vmem:[#allocation31_spill] sm:$0xff] }
 0x224   : > { %v1221_v56 = vsel %vm4871_vm8, %v1219_v45, %v9753_v53  ;;  %v9755_v50 = vrot.slane %v7159_v54, 7  ;;  %v7400_v43 = vadd.f32 %v9756_v34, %v3069_v7  ;;  %v3624_v53 = vadd.f32 1.0, %v4559_v2  ;;  %v9762_v7 = vld [vmem:[#allocation2_spill] sm:$0xff] }
 0x225   : > { %v1402_v5 = vadd.f32 %v1221_v56, %v836_v15  ;;  %v2758_v52 = vsel %vm4871_vm8, %v2756_v24, %v2757_v6  ;;  %v3821_v15 = vpop.permute.xlu2 %3820  ;;  %v3068_v45 = vadd.f32 %v3004_v16, %v2932_v18  ;;  %v2442_v28 = vadd.f32 %v2378_v37, %v2306_v27  ;;  %v9764_v27 = vld [vmem:[#allocation3_spill] sm:$0xff] }
 0x226   : > { %v1986_v31 = vrot.slane %v9755_v50, 2  ;;  %9757 = vst [vmem:[#allocation92_spill] sm:$0xff] %v7400_v43  ;;  %v3009_v29 = vmul.f32 %v9727_v33, %v9750_v55  ;;  %3882 = vrot.lane.b32.xlu2 %v7400_v43, %s4732_s14  ;;  %v3688_v54 = vmul.f32 %v3624_v53, %v3176_v49  ;;  %v2241_v36 = vmul.f32 %v9712_v35, %v9745_v40  ;;  %v9788_v40 = vld [vmem:[#allocation5_spill] sm:$0xff] }
 0x227   : > { %v1538_v46 = vadd.f32 %v1474_v41, %v1402_v5  ;;  %v9758_v24 = vrot.slane %v7178_v22, 7  ;;  %v2465_v16 = vadd.f32 %v7273_v4, %v7311_v25  ;;  %v7417_v37 = vadd.f32 %v9709_v58, %v3068_v45  ;;  %v9761_v4 = vld [vmem:[#allocation74_spill] sm:$0xff] }
 0x228   : > { %v1988_v14 = vsel %vm4871_vm8, %v1986_v31, %v1987_v44  ;;  %v2937_v6 = vadd.f32 %v2758_v52, %v2442_v28  ;;  %v3241_v44 = vmul.f32 0.044715, %v9760_v42  ;;  %v4008_v30 = vmul.f32 %v3821_v15, %v3688_v54  ;;  %v9765_v31 = vld [vmem:[#allocation9_spill] sm:$0xff] }
 0x229   : > { %v1674_v20 = vadd.f32 %v1610_v19, %v1538_v46  ;;  %v2753_v41 = vrot.slane %v9758_v24, 2  ;;  %9759 = vst [vmem:[#allocation66_spill] sm:$0xff] %v7417_v37  ;;  %v2377_v56 = vmul.f32 %v9716_v62, %v9683_v61  ;;  %v3008_v9 = vmul.f32 %v9724_v57, %v9749_v17  ;;  %3880 = vrot.lane.b32.xlu1 %v7417_v37, %s4732_s14  ;;  %v9763_v19 = vld [vmem:[#allocation8_spill] sm:$0xff] }
 0x22a   : > { %v3073_v22 = vadd.f32 %v3009_v29, %v2937_v6  ;;  %v3305_v25 = vmul.f32 %v3241_v44, %v9760_v42  ;;  %v1001_v5 = vmul.f32 %v9762_v7, %v9761_v4  ;;  %v7431_v2 = vmul.f32 %v9763_v19, %v9645_v0  ;;  %4142 = vst [vmem:[#allocation1 + $0x20] ss:$4 sm:$0xff] %v4008_v30  ;;  %v9767_v29 = vld [vmem:[#allocation4_spill] sm:$0xff]  ;;  %v9770_v44 = vld [vmem:[#allocation109_spill] sm:$0xff]  ;;  %v9771_v30 = vld [vmem:[#allocation42_spill] sm:$0xff] }
 0x22b   : > { %v2169_v48 = vadd.f32 %v1988_v14, %v1674_v20  ;;  %v2755_v18 = vsel %vm4871_vm8, %v2753_v41, %v2754_v3  ;;  %v838_v50 = vmul.f32 %v9764_v27, %v9761_v4  ;;  %v1768_v53 = vmul.f32 %v9765_v31, %v9666_v12  ;;  %v9768_v3 = vld [vmem:[#allocation23_spill] sm:$0xff]  ;;  %v9769_v41 = vld [vmem:[#allocation14_spill] sm:$0xff]  ;;  %v9772_v4 = vld [vmem:[#allocation41_spill] sm:$0xff] }
 0x22c   : > { %v7440_v52 = vadd.f32 %v9756_v34, %v3073_v22  ;;  %v3369_v46 = vmul.f32 %v3305_v25, %v9760_v42  ;;  %v4472_v15 = vrot.slane %v1001_v5, 9  ;;  %v1227_v45 = vrot.slane %v7431_v2, 7  ;;  %v9773_v7 = vld [vmem:[#allocation44_spill] sm:$0xff] }
 0x22d   : > { %v2305_v49 = vadd.f32 %v2241_v36, %v2169_v48  ;;  %v1476_v14 = vmul.f32 %v9767_v29, %v9645_v0  ;;  %v7448_v54 = vmul.f32 %v9768_v3, %v9668_v8  ;;  %v4480_v20 = vrot.slane %v1768_v53, 9 }
 0x22e   : > { %9766 = vst [vmem:[#allocation87_spill] sm:$0xff] %v7440_v52  ;;  %3890 = vrot.lane.b32.xlu0 %v7440_v52, %s4732_s14  ;;  %v3433_v36 = vadd.f32 %v3369_v46, %v9760_v42  ;;  %v1228_v24 = vsel %vm4871_vm8, %v4472_v15, %v1227_v45  ;;  %v1612_v6 = vmul.f32 %v9769_v41, %v9666_v12  ;;  %v3177_v12 = vmul.f32 0.5, %v9760_v42 }
 0x22f   : > { %v2441_v28 = vadd.f32 %v2377_v56, %v2305_v49  ;;  %v2535_v48 = vmul.f32 %v9771_v30, %v9770_v44  ;;  %v1404_v22 = vadd.f32 %v1228_v24, %v838_v50  ;;  %v9097_v25 = vrot.slane %v7448_v54, 7  ;;  %v9774_v49 = vld [vmem:[#allocation103_spill] sm:$0xff] }
 0x230   : > { %v7462_v5 = vmul.f32 %v9773_v7, %v9772_v4  ;;  %v7466_v2 = vadd.f32 %v7277_v59, %v7335_v51  ;;  %v7469_v31 = vadd.f32 %v9774_v49, %v2465_v16  ;;  %v3497_v53 = vmul.f32 0.7978846, %v3433_v36  ;;  %v9776_v59 = vld [vmem:[#allocation10_spill] sm:$0xff]  ;;  %v9777_v16 = vld [vmem:[#allocation12_spill] sm:$0xff] }
 0x231   : > { %v2936_v56 = vadd.f32 %v2755_v18, %v2441_v28  ;;  %v1540_v15 = vadd.f32 %v1476_v14, %v1404_v22  ;;  %v1995_v18 = vsel %vm4871_vm8, %v4480_v20, %v9097_v25  ;;  %v4488_v50 = vrot.slane %v2535_v48, 9  ;;  %v9779_v14 = vld [vmem:[#allocation15_spill] sm:$0xff]  ;;  %v9780_v20 = vld [vmem:[#allocation17_spill] sm:$0xff]  ;;  %v9781_v48 = vld [vmem:[#allocation154_spill] sm:$0xff] }
 0x232   : > { %9775 = vst [vmem:[#allocation80_spill] sm:$0xff] %v7469_v31  ;;  %4560 = vtanh.f32 %v3497_v53  ;;  %v1003_v51 = vmul.f32 %v9776_v59, %v9646_v1  ;;  %v7481_v24 = vmul.f32 %v9777_v16, %v9726_v13  ;;  %v2243_v36 = vmul.f32 %v9779_v14, %v9668_v8  ;;  %v9782_v49 = vld [vmem:[#allocation24_spill] sm:$0xff]  ;;  %v9784_v28 = vld [vmem:[#allocation46_spill] sm:$0xff]  ;;  %v3823_v16 = vpop.permute.xlu2 %3822 }
 0x233   : > { %v3072_v46 = vadd.f32 %v3008_v9, %v2936_v56  ;;  %v1676_v9 = vadd.f32 %v1612_v6, %v1540_v15  ;;  %v2379_v30 = vmul.f32 %v9780_v20, %v9770_v44  ;;  %v3010_v56 = vmul.f32 %v9781_v48, %v9772_v4  ;;  %v9783_v15 = vld [vmem:[#allocation113_spill] sm:$0xff] }
 0x234   : > { %v1230_v22 = vrot.slane %v1003_v51, 7  ;;  %v1770_v53 = vmul.f32 %v9782_v49, %v9676_v10  ;;  %v7496_v25 = vmul.f32 %v9513_v21, %v9729_v63  ;;  %v1478_v44 = vmul.f32 %v9575_v47, %v9726_v13 }
 0x235   : > { %v7484_v42 = vadd.f32 %v9709_v58, %v3072_v46  ;;  %v2171_v6 = vadd.f32 %v1995_v18, %v1676_v9  ;;  %v840_v46 = vmul.f32 %v9690_v23, %v9646_v1  ;;  %v7506_v51 = vmul.f32 %v9784_v28, %v9783_v15 }
 0x236   : > { %v9785_v52 = vrot.slane %v7462_v5, 7  ;;  %v1232_v43 = vrot.slane %v1230_v22, 2  ;;  %v1233_v31 = vrot.slane %v7481_v24, 7  ;;  %v1614_v9 = vmul.f32 %v9576_v11, %v9676_v10 }
 0x237   : > { %9778 = vst [vmem:[#allocation71_spill] sm:$0xff] %v7484_v42  ;;  %3888 = vrot.lane.b32.xlu2 %v7484_v42, %s4732_s14  ;;  %v1997_v42 = vrot.slane %v1770_v53, 7  ;;  %v2307_v18 = vadd.f32 %v2243_v36, %v2171_v6  ;;  %v2245_v55 = vmul.f32 %v9712_v35, %v9729_v63  ;;  %v2764_v21 = vrot.slane %v7506_v51, 7  ;;  %v9787_v6 = vld [vmem:[#allocation119_spill] sm:$0xff] }
 0x238   : > { %v2762_v37 = vsel %vm4871_vm8, %v4488_v50, %v9785_v52  ;;  %v4561_v17 = vpop.eup %4560  ;;  %v1234_v47 = vsel %vm4871_vm8, %v1232_v43, %v1233_v31  ;;  %v2000_v52 = vrot.slane %v7496_v25, 7  ;;  %v9786_v50 = vld [vmem:[#allocation55_spill] sm:$0xff]  ;;  %v7524_v11 = vmul.f32 %v9612_v26, %v9787_v6 }
 0x239   : > { %v1999_v48 = vrot.slane %v1997_v42, 2  ;;  %v3236_v23 = vmul.f32 0.044715, %v9786_v50  ;;  %v3625_v24 = vadd.f32 1.0, %v4561_v17  ;;  %v2443_v53 = vadd.f32 %v2379_v30, %v2307_v18 }
 0x23a   : > { %v1406_v36 = vadd.f32 %v1234_v47, %v840_v46  ;;  %v2766_v35 = vrot.slane %v2764_v21, 2  ;;  %v839_v20 = vmul.f32 %v9788_v40, %v9645_v0  ;;  %v1229_v43 = vrot.slane %v1227_v45, 2  ;;  %v9789_v46 = vld [vmem:[#allocation13_spill] sm:$0xff] }
 0x23b   : > { %v3300_v51 = vmul.f32 %v3236_v23, %v9786_v50  ;;  %v3689_v14 = vmul.f32 %v3625_v24, %v3177_v12  ;;  %v2938_v34 = vadd.f32 %v2762_v37, %v2443_v53  ;;  %v2001_v17 = vsel %vm4871_vm8, %v1999_v48, %v2000_v52  ;;  %v9790_v23 = vld [vmem:[#allocation20_spill] sm:$0xff] }
 0x23c   : > { %v1542_v25 = vadd.f32 %v1478_v44, %v1406_v36  ;;  %v1231_v30 = vsel %vm4871_vm8, %v1229_v43, %v1230_v22  ;;  %v1477_v18 = vmul.f32 %v9789_v46, %v9646_v1  ;;  %v1613_v26 = vmul.f32 %v9790_v23, %v9668_v8  ;;  %v9792_v53 = vld [vmem:[#allocation100_spill] sm:$0xff] }
 0x23d   : > { %v3364_v47 = vmul.f32 %v3300_v51, %v9786_v50  ;;  %v4009_v41 = vmul.f32 %v3823_v16, %v3689_v14  ;;  %v3074_v0 = vadd.f32 %v3010_v56, %v2938_v34  ;;  %v1405_v12 = vadd.f32 %v1231_v30, %v839_v20  ;;  %v9794_v56 = vld [vmem:[#allocation22_spill] sm:$0xff] }
 0x23e   : > { %v1678_v45 = vadd.f32 %v1614_v9, %v1542_v25  ;;  %v2381_v37 = vmul.f32 %v9716_v62, %v9783_v15  ;;  %v2767_v48 = vrot.slane %v7524_v11, 7  ;;  %v9791_v24 = vrot.slane %v7448_v54, 7  ;;  %v9796_v25 = vld [vmem:[#allocation98_spill] sm:$0xff] }
 0x23f   : > { %v3428_v44 = vadd.f32 %v3364_v47, %v9786_v50  ;;  %4144 = vst [vmem:[#allocation1 + $0x21] ss:$4 sm:$0xff] %v4009_v41  ;;  %v7545_v1 = vadd.f32 %v9792_v53, %v3074_v0  ;;  %v3012_v34 = vmul.f32 %v9724_v57, %v9787_v6  ;;  %v1541_v16 = vadd.f32 %v1477_v18, %v1405_v12  ;;  %v9798_v30 = vld [vmem:[#allocation30_spill] sm:$0xff] }
 0x240   : > { %v1996_v22 = vrot.slane %v9791_v24, 2  ;;  %v2173_v36 = vadd.f32 %v2001_v17, %v1678_v45  ;;  %v2768_v14 = vsel %vm4871_vm8, %v2766_v35, %v2767_v48  ;;  %v2244_v54 = vmul.f32 %v9794_v56, %v9676_v10  ;;  %v9797_v35 = vld [vmem:[#allocation45_spill] sm:$0xff]  ;;  %v9799_v18 = vld [vmem:[#allocation18_spill] sm:$0xff] }
 0x241   : > { %9793 = vst [vmem:[#allocation156_spill] sm:$0xff] %v7545_v1  ;;  %v3492_v20 = vmul.f32 0.7978846, %v3428_v44  ;;  %3892 = vrot.lane.b32.xlu1 %v7545_v1, %s4732_s14  ;;  %v1677_v9 = vadd.f32 %v1613_v26, %v1541_v16  ;;  %v9795_v51 = vrot.slane %v7462_v5, 7  ;;  %v3244_v17 = vmul.f32 0.044715, %v9796_v25 }
 0x242   : > { %v1998_v11 = vsel %vm4871_vm8, %v1996_v22, %v1997_v42  ;;  %v2309_v41 = vadd.f32 %v2245_v55, %v2173_v36  ;;  %v2380_v47 = vmul.f32 %v9797_v35, %v9772_v4  ;;  %v7564_v42 = vmul.f32 %v9799_v18, %v9798_v30  ;;  %v9800_v26 = vld [vmem:[#allocation7_spill] sm:$0xff]  ;;  %v9801_v5 = vld [vmem:[#allocation101_spill] sm:$0xff]  ;;  %v9803_v22 = vld [vmem:[#allocation50_spill] sm:$0xff] }
 0x243   : > { %v2763_v43 = vrot.slane %v9795_v51, 2  ;;  %4562 = vtanh.f32 %v3492_v20  ;;  %v1235_v0 = vrot.slane %v1233_v31, 2  ;;  %v2172_v12 = vadd.f32 %v1998_v11, %v1677_v9  ;;  %v9804_v20 = vld [vmem:[#allocation105_spill] sm:$0xff] }
 0x244   : > { %v2445_v45 = vadd.f32 %v2381_v37, %v2309_v41  ;;  %v3308_v44 = vmul.f32 %v3244_v17, %v9796_v25  ;;  %v841_v55 = vmul.f32 %v9800_v26, %v9726_v13  ;;  %v7571_v24 = vadd.f32 %v9801_v5, %v7466_v2  ;;  %v9805_v51 = vld [vmem:[#allocation53_spill] sm:$0xff]  ;;  %v9806_v41 = vld [vmem:[#allocation19_spill] sm:$0xff] }
 0x245   : > { %v3011_v36 = vmul.f32 %v9803_v22, %v9783_v15  ;;  %v9118_v16 = vrot.slane %v7564_v42, 7  ;;  %v7578_v18 = vmul.f32 %v9805_v51, %v9804_v20  ;;  %v2308_v37 = vadd.f32 %v2244_v54, %v2172_v12  ;;  %v9807_v54 = vld [vmem:[#allocation120_spill] sm:$0xff] }
 0x246   : > { %9802 = vst [vmem:[#allocation149_spill] sm:$0xff] %v7571_v24  ;;  %v2940_v31 = vadd.f32 %v2768_v14, %v2445_v45  ;;  %v2765_v11 = vsel %vm4871_vm8, %v2763_v43, %v2764_v21  ;;  %v3372_v13 = vmul.f32 %v3308_v44, %v9796_v25  ;;  %v1479_v9 = vmul.f32 %v9806_v41, %v9798_v30  ;;  %v9808_v45 = vld [vmem:[#allocation57_spill] sm:$0xff]  ;;  %v9813_v24 = vld [vmem:[#allocation60_spill] sm:$0xff] }
 0x247   : > { %v1237_v2 = vsel %vm4871_vm8, %v1235_v0, %v9118_v16  ;;  %v2002_v17 = vrot.slane %v2000_v52, 2  ;;  %v2444_v1 = vadd.f32 %v2380_v47, %v2308_v37  ;;  %v7592_v12 = vmul.f32 %v9808_v45, %v9807_v54  ;;  %v9809_v16 = vld [vmem:[#allocation26_spill] sm:$0xff] }
 0x248   : > { %v3076_v51 = vadd.f32 %v3012_v34, %v2940_v31  ;;  %v1407_v14 = vadd.f32 %v1237_v2, %v841_v55  ;;  %v3172_v43 = vmul.f32 0.5, %v9786_v50  ;;  %v7596_v44 = vmul.f32 0.5, %v9796_v25  ;;  %v3813_v31 = vpop.permute.xlu0 %3812 }
 0x249   : > { %v4563_v21 = vpop.eup %4562  ;;  %v3436_v0 = vadd.f32 %v3372_v13, %v9796_v25  ;;  %v1615_v52 = vmul.f32 %v9809_v16, %v9729_v63  ;;  %v2939_v47 = vadd.f32 %v2765_v11, %v2444_v1  ;;  %v2246_v55 = vmul.f32 %v9714_v38, %v9804_v20  ;;  %v9812_v25 = vld [vmem:[#allocation59_spill] sm:$0xff]  ;;  %v9821_v63 = vld [vmem:[#allocation62_spill] sm:$0xff] }
 0x24a   : > { %v7602_v5 = vadd.f32 %v9709_v58, %v3076_v51  ;;  %v3620_v34 = vadd.f32 1.0, %v4563_v21  ;;  %v1543_v37 = vadd.f32 %v1479_v9, %v1407_v14  ;;  %v9811_v50 = vrot.slane %v7578_v18, 7 }
 0x24b   : > { %v2769_v45 = vrot.slane %v2767_v48, 2  ;;  %v1006_v13 = vmul.f32 %v9763_v19, %v9812_v25  ;;  %v3075_v21 = vadd.f32 %v3011_v36, %v2939_v47  ;;  %v7617_v11 = vmul.f32 %v9776_v59, %v9679_v39 }
 0x24c   : > { %9810 = vst [vmem:[#allocation164_spill] sm:$0xff] %v7602_v5  ;;  %v2004_v2 = vsel %vm4871_vm8, %v2002_v17, %v9811_v50  ;;  %3896 = vrot.lane.b32.xlu0 %v7602_v5, %s4732_s14  ;;  %v3684_v51 = vmul.f32 %v3620_v34, %v3172_v43  ;;  %v3500_v9 = vmul.f32 0.7978846, %v3436_v0  ;;  %v1679_v14 = vadd.f32 %v1615_v52, %v1543_v37  ;;  %v9815_v43 = vld [vmem:[#allocation107_spill] sm:$0xff] }
 0x24d   : > { %v843_v17 = vmul.f32 %v9788_v40, %v9812_v25  ;;  %v1239_v48 = vrot.slane %v1006_v13, 7  ;;  %v7622_v19 = vadd.f32 %v9813_v24, %v3075_v21  ;;  %v9125_v5 = vrot.slane %v7617_v11, 7 }
 0x24e   : > { %v4004_v50 = vmul.f32 %v3813_v31, %v3684_v51  ;;  %v1773_v36 = vmul.f32 %v9768_v3, %v9815_v43  ;;  %v2174_v34 = vadd.f32 %v2004_v2, %v1679_v14  ;;  %v2382_v47 = vmul.f32 %v9717_v32, %v9787_v6  ;;  %v9817_v2 = vld [vmem:[#allocation115_spill] sm:$0xff] }
 0x24f   : > { %9814 = vst [vmem:[#allocation141_spill] sm:$0xff] %v7622_v19  ;;  %v1241_v1 = vrot.slane %v1239_v48, 2  ;;  %v7631_v0 = vmul.f32 %v9782_v49, %v9683_v61  ;;  %3894 = vrot.lane.b32.xlu2 %v7622_v19, %s4732_s14  ;;  %v9816_v52 = vrot.slane %v7592_v12, 7  ;;  %v1481_v3 = vmul.f32 %v9789_v46, %v9679_v39  ;;  %v9818_v19 = vld [vmem:[#allocation122_spill] sm:$0xff] }
 0x250   : > { %4134 = vst [vmem:[#allocation1] ss:$4 sm:$0xff] %v4004_v50  ;;  %v2006_v37 = vrot.slane %v1773_v36, 7  ;;  %v7643_v13 = vmul.f32 %v9773_v7, %v9817_v2  ;;  %4564 = vtanh.f32 %v3500_v9  ;;  %v2310_v51 = vadd.f32 %v2246_v55, %v2174_v34  ;;  %v9819_v34 = vld [vmem:[#allocation67_spill] sm:$0xff] }
 0x251   : > { %v2771_v31 = vsel %vm4871_vm8, %v2769_v45, %v9816_v52  ;;  %v1243_v21 = vsel %vm4871_vm8, %v1241_v1, %v9125_v5  ;;  %v1617_v45 = vmul.f32 %v9790_v23, %v9815_v43  ;;  %v7654_v36 = vmul.f32 %v9784_v28, %v9818_v19 }
 0x252   : > { %v1409_v50 = vadd.f32 %v1243_v21, %v843_v17  ;;  %v2008_v52 = vrot.slane %v2006_v37, 2  ;;  %v2446_v7 = vadd.f32 %v2382_v47, %v2310_v51  ;;  %v3013_v55 = vmul.f32 %v9727_v33, %v9807_v54 }
 0x253   : > { %v2773_v9 = vrot.slane %v7643_v13, 7  ;;  %v3237_v6 = vmul.f32 0.044715, %v9819_v34  ;;  %v2248_v17 = vmul.f32 %v9794_v56, %v9683_v61  ;;  %v2384_v21 = vmul.f32 %v9797_v35, %v9817_v2 }
 0x254   : > { %v1545_v1 = vadd.f32 %v1481_v3, %v1409_v50  ;;  %v3015_v5 = vmul.f32 %v9803_v22, %v9818_v19  ;;  %v2941_v14 = vadd.f32 %v2771_v31, %v2446_v7  ;;  %v9820_v47 = vrot.slane %v7631_v0, 7 }
 0x255   : > { %v3301_v13 = vmul.f32 %v3237_v6, %v9819_v34  ;;  %v3238_v28 = vmul.f32 0.044715, %v9821_v63  ;;  %v9133_v50 = vrot.slane %v7654_v36, 7  ;;  %v842_v56 = vmul.f32 %v9764_v27, %v9798_v30  ;;  %v9824_v30 = vld [vmem:[#allocation76_spill] sm:$0xff] }
 0x256   : > { %v2010_v51 = vsel %vm4871_vm8, %v2008_v52, %v9820_v47  ;;  %v1681_v3 = vadd.f32 %v1617_v45, %v1545_v1  ;;  %v9822_v35 = vrot.slane %v7564_v42, 7  ;;  %v4565_v22 = vpop.eup %4564  ;;  %v3077_v7 = vadd.f32 %v3013_v55, %v2941_v14  ;;  %v9823_v1 = vld [vmem:[#allocation14_spill] sm:$0xff] }
 0x257   : > { %v2775_v31 = vrot.slane %v2773_v9, 2  ;;  %v3365_v4 = vmul.f32 %v3301_v13, %v9819_v34  ;;  %v3302_v52 = vmul.f32 %v3238_v28, %v9821_v63  ;;  %v1480_v45 = vmul.f32 %v9767_v29, %v9812_v25 }
 0x258   : > { %v1238_v23 = vrot.slane %v9822_v35, 2  ;;  %v2176_v47 = vadd.f32 %v2010_v51, %v1681_v3  ;;  %v1616_v27 = vmul.f32 %v9823_v1, %v9804_v20  ;;  %v7686_v42 = vadd.f32 %v9824_v30, %v3077_v7 }
 0x259   : > { %v3429_v35 = vadd.f32 %v3365_v4, %v9819_v34  ;;  %v3366_v14 = vmul.f32 %v3302_v52, %v9821_v63  ;;  %v3628_v13 = vadd.f32 1.0, %v4565_v22  ;;  %v3173_v51 = vmul.f32 0.5, %v9819_v34 }
 0x25a   : > { %v1240_v6 = vsel %vm4871_vm8, %v1238_v23, %v1239_v48  ;;  %9825 = vst [vmem:[#allocation140_spill] sm:$0xff] %v7686_v42  ;;  %v2312_v28 = vadd.f32 %v2248_v17, %v2176_v47  ;;  %v9826_v23 = vrot.slane %v7578_v18, 7  ;;  %3898 = vrot.lane.b32.xlu1 %v7686_v42, %s4732_s14  ;;  %v2777_v29 = vsel %vm4871_vm8, %v2775_v31, %v9133_v50  ;;  %v9827_v18 = vld [vmem:[#allocation15_spill] sm:$0xff]  ;;  %v9828_v47 = vld [vmem:[#allocation17_spill] sm:$0xff] }
 0x25b   : > { %v1408_v55 = vadd.f32 %v1240_v6, %v842_v56  ;;  %v3493_v25 = vmul.f32 0.7978846, %v3429_v35  ;;  %v3430_v4 = vadd.f32 %v3366_v14, %v9821_v63  ;;  %v3174_v22 = vmul.f32 0.5, %v9821_v63  ;;  %v9831_v14 = vld [vmem:[#allocation94_spill] sm:$0xff]  ;;  %v9832_v63 = vld [vmem:[#allocation12_spill] sm:$0xff]  ;;  %v9844_v42 = vld [vmem:[#allocation49_spill] sm:$0xff] }
 0x25c   : > { %v2005_v48 = vrot.slane %v9826_v23, 2  ;;  %v2448_v56 = vadd.f32 %v2384_v21, %v2312_v28  ;;  %v2247_v17 = vmul.f32 %v9827_v18, %v9815_v43  ;;  %v2383_v6 = vmul.f32 %v9828_v47, %v9807_v54  ;;  %v9833_v28 = vld [vmem:[#allocation6_spill] sm:$0xff]  ;;  %v9836_v18 = vld [vmem:[#allocation16_spill] sm:$0xff] }
 0x25d   : > { %v1544_v3 = vadd.f32 %v1480_v45, %v1408_v55  ;;  %4566 = vtanh.f32 %v3493_v25  ;;  %v3494_v7 = vmul.f32 0.7978846, %v3430_v4  ;;  %v9829_v1 = vrot.slane %v7592_v12, 7  ;;  %v9830_v45 = vld [vmem:[#allocation34_spill] sm:$0xff] }
 0x25e   : > { %v2007_v34 = vsel %vm4871_vm8, %v2005_v48, %v2006_v37  ;;  %v2943_v31 = vadd.f32 %v2777_v29, %v2448_v56  ;;  %v3247_v21 = vmul.f32 0.044715, %v9830_v45  ;;  %v1008_v55 = vmul.f32 %v9832_v63, %v9831_v14  ;;  %v9835_v4 = vld [vmem:[#allocation154_spill] sm:$0xff] }
 0x25f   : > { %v1680_v52 = vadd.f32 %v1616_v27, %v1544_v3  ;;  %v2772_v35 = vrot.slane %v9829_v1, 2  ;;  %4568 = vtanh.f32 %v3494_v7  ;;  %v844_v23 = vmul.f32 %v9833_v28, %v9679_v39  ;;  %v9837_v1 = vld [vmem:[#allocation111_spill] sm:$0xff]  ;;  %v9838_v7 = vld [vmem:[#allocation25_spill] sm:$0xff] }
 0x260   : > { %v9834_v48 = vrot.slane %v7617_v11, 7  ;;  %v3079_v25 = vadd.f32 %v3015_v5, %v2943_v31  ;;  %v3014_v29 = vmul.f32 %v9835_v4, %v9817_v2  ;;  %v3311_v12 = vmul.f32 %v3247_v21, %v9830_v45 }
 0x261   : > { %v2175_v37 = vadd.f32 %v2007_v34, %v1680_v52  ;;  %v1245_v3 = vrot.slane %v1008_v55, 7  ;;  %v1482_v47 = vmul.f32 %v9836_v18, %v9831_v14  ;;  %v7723_v34 = vmul.f32 %v9838_v7, %v9837_v1 }
 0x262   : > { %v1244_v27 = vrot.slane %v9834_v48, 2  ;;  %v9839_v39 = vrot.slane %v7631_v0, 7  ;;  %v7728_v11 = vadd.f32 %v9813_v24, %v3079_v25  ;;  %v2774_v5 = vsel %vm4871_vm8, %v2772_v35, %v2773_v9  ;;  %v9841_v48 = vld [vmem:[#allocation21_spill] sm:$0xff]  ;;  %v9842_v25 = vld [vmem:[#allocation27_spill] sm:$0xff] }
 0x263   : > { %v2311_v56 = vadd.f32 %v2247_v17, %v2175_v37  ;;  %v3375_v31 = vmul.f32 %v3311_v12, %v9830_v45  ;;  %v4567_v21 = vpop.eup %4566  ;;  %v1618_v50 = vmul.f32 %v9841_v48, %v9683_v61  ;;  %v2012_v0 = vrot.slane %v7723_v34, 7  ;;  %v9843_v34 = vld [vmem:[#allocation124_spill] sm:$0xff] }
 0x264   : > { %v2011_v52 = vrot.slane %v9839_v39, 2  ;;  %9840 = vst [vmem:[#allocation54_spill] sm:$0xff] %v7728_v11  ;;  %v1246_v17 = vsel %vm4871_vm8, %v1244_v27, %v1245_v3  ;;  %v7739_v39 = vmul.f32 %v3628_v13, %v7596_v44  ;;  %3902 = vrot.lane.b32.xlu0 %v7728_v11, %s4732_s14  ;;  %v3621_v9 = vadd.f32 1.0, %v4567_v21  ;;  %v9845_v11 = vld [vmem:[#allocation121_spill] sm:$0xff] }
 0x265   : > { %v2447_v55 = vadd.f32 %v2383_v6, %v2311_v56  ;;  %v1410_v37 = vadd.f32 %v1246_v17, %v844_v23  ;;  %v3439_v35 = vadd.f32 %v3375_v31, %v9830_v45  ;;  %v2249_v27 = vmul.f32 %v9842_v25, %v9837_v1  ;;  %v4569_v12 = vpop.eup %4568  ;;  %v3815_v6 = vpop.permute.xlu0 %3814 }
 0x266   : > { %v2013_v17 = vsel %vm4871_vm8, %v2011_v52, %v2012_v0  ;;  %v2542_v44 = vmul.f32 %v9844_v42, %v9843_v34  ;;  %v3685_v13 = vmul.f32 %v3621_v9, %v3173_v51  ;;  %v3622_v2 = vadd.f32 1.0, %v4569_v12  ;;  %v3817_v31 = vpop.permute.xlu1 %3816  ;;  %v9847_v51 = vld [vmem:[#allocation142_spill] sm:$0xff] }
 0x267   : > { %v2942_v23 = vadd.f32 %v2774_v5, %v2447_v55  ;;  %v1546_v56 = vadd.f32 %v1482_v47, %v1410_v37  ;;  %v3503_v43 = vmul.f32 0.7978846, %v3439_v35  ;;  %v3018_v21 = vmul.f32 %v9835_v4, %v9845_v11  ;;  %v7756_v55 = vpop.permute.xlu2 %3828 }
 0x268   : > { %v2385_v25 = vmul.f32 %v9716_v62, %v9818_v19  ;;  %v9846_v47 = vrot.slane %v7654_v36, 7  ;;  %v4005_v52 = vmul.f32 %v3815_v6, %v3685_v13  ;;  %v3686_v37 = vmul.f32 %v3622_v2, %v3174_v22  ;;  %v9851_v6 = vld [vmem:[#allocation39_spill] sm:$0xff] }
 0x269   : > { %v3078_v61 = vadd.f32 %v3014_v29, %v2942_v23  ;;  %v1682_v24 = vadd.f32 %v1618_v50, %v1546_v56  ;;  %4570 = vtanh.f32 %v3503_v43  ;;  %v3082_v9 = vadd.f32 %v3018_v21, %v9847_v51  ;;  %v9849_v29 = vld [vmem:[#allocation82_spill] sm:$0xff]  ;;  %v9853_v22 = vld [vmem:[#allocation11_spill] sm:$0xff] }
 0x26a   : > { %v2778_v5 = vrot.slane %v9846_v47, 2  ;;  %v3016_v50 = vmul.f32 %v9724_v57, %v9843_v34  ;;  %v3239_v12 = vmul.f32 0.044715, %v9849_v29  ;;  %4136 = vst [vmem:[#allocation1 + $0x1] ss:$4 sm:$0xff] %v4005_v52  ;;  %v4006_v23 = vmul.f32 %v3817_v31, %v3686_v37  ;;  %v9854_v37 = vld [vmem:[#allocation112_spill] sm:$0xff] }
 0x26b   : > { %v7760_v35 = vadd.f32 %v9792_v53, %v3078_v61  ;;  %v2177_v4 = vadd.f32 %v2013_v17, %v1682_v24  ;;  %v2779_v36 = vrot.slane %v2542_v44, 7  ;;  %v7766_v56 = vadd.f32 %v9792_v53, %v3082_v9  ;;  %v9852_v24 = vld [vmem:[#allocation73_spill] sm:$0xff] }
 0x26c   : > { %v3242_v2 = vmul.f32 0.044715, %v9851_v6  ;;  %v3303_v61 = vmul.f32 %v3239_v12, %v9849_v29  ;;  %v1009_v17 = vmul.f32 %v9853_v22, %v9852_v24  ;;  %v1247_v13 = vrot.slane %v1245_v3, 2  ;;  %4138 = vst [vmem:[#allocation1 + $0x2] ss:$4 sm:$0xff] %v4006_v23  ;;  %v9855_v3 = vld [vmem:[#allocation28_spill] sm:$0xff] }
 0x26d   : > { %9848 = vst [vmem:[#allocation151_spill] sm:$0xff] %v7760_v35  ;;  %3900 = vrot.lane.b32.xlu2 %v7760_v35, %s4732_s14  ;;  %v2313_v43 = vadd.f32 %v2249_v27, %v2177_v4  ;;  %v3183_v21 = vmul.f32 0.5, %v9830_v45  ;;  %v2780_v44 = vsel %vm4871_vm8, %v2778_v5, %v2779_v36  ;;  %3908 = vrot.lane.b32.xlu0 %v7766_v56, %s4732_s14  ;;  %v2014_v4 = vrot.slane %v2012_v0, 2  ;;  %v9856_v12 = vld [vmem:[#allocation125_spill] sm:$0xff]  ;;  %v9857_v23 = vld [vmem:[#allocation52_spill] sm:$0xff] }
 0x26e   : > { %9850 = vst [vmem:[#allocation63_spill] sm:$0xff] %v7766_v56  ;;  %v3306_v53 = vmul.f32 %v3242_v2, %v9851_v6  ;;  %v845_v27 = vmul.f32 %v9800_v26, %v9831_v14  ;;  %v3367_v47 = vmul.f32 %v3303_v61, %v9849_v29  ;;  %v1248_v52 = vrot.slane %v1009_v17, 7 }
 0x26f   : > { %v2449_v31 = vadd.f32 %v2385_v25, %v2313_v43  ;;  %v1776_v51 = vmul.f32 %v9855_v3, %v9854_v37  ;;  %v4571_v9 = vpop.eup %4570  ;;  %v1483_v5 = vmul.f32 %v9806_v41, %v9852_v24  ;;  %v2543_v2 = vmul.f32 %v9857_v23, %v9856_v12 }
 0x270   : > { %v3370_v45 = vmul.f32 %v3306_v53, %v9851_v6  ;;  %v3631_v22 = vadd.f32 1.0, %v4571_v9  ;;  %v3431_v14 = vadd.f32 %v3367_v47, %v9849_v29  ;;  %v1249_v25 = vsel %vm4871_vm8, %v1247_v13, %v1248_v52  ;;  %v3835_v9 = vpop.permute.xlu2 %3834 }
 0x271   : > { %v2944_v56 = vadd.f32 %v2780_v44, %v2449_v31  ;;  %v1411_v61 = vadd.f32 %v1249_v25, %v845_v27  ;;  %v1619_v17 = vmul.f32 %v9809_v16, %v9837_v1  ;;  %v2015_v53 = vrot.slane %v1776_v51, 7  ;;  %v9861_v25 = vld [vmem:[#allocation20_spill] sm:$0xff] }
 0x272   : > { %v3434_v43 = vadd.f32 %v3370_v45, %v9851_v6  ;;  %v3175_v0 = vmul.f32 0.5, %v9849_v29  ;;  %v3495_v24 = vmul.f32 0.7978846, %v3431_v14  ;;  %v3178_v23 = vmul.f32 0.5, %v9851_v6 }
 0x273   : > { %v3080_v3 = vadd.f32 %v3016_v50, %v2944_v56  ;;  %v3695_v44 = vmul.f32 %v3631_v22, %v3183_v21  ;;  %v1547_v47 = vadd.f32 %v1483_v5, %v1411_v61  ;;  %v2781_v35 = vrot.slane %v2779_v36, 2  ;;  %v9859_v56 = vld [vmem:[#allocation106_spill] sm:$0xff] }
 0x274   : > { %v3498_v31 = vmul.f32 0.7978846, %v3434_v43  ;;  %4572 = vtanh.f32 %v3495_v24  ;;  %v2016_v27 = vsel %vm4871_vm8, %v2014_v4, %v2015_v53  ;;  %v2782_v52 = vrot.slane %v2543_v2, 7 }
 0x275   : > { %v7799_v13 = vadd.f32 %v9709_v58, %v3080_v3  ;;  %v1683_v50 = vadd.f32 %v1619_v17, %v1547_v47  ;;  %v2250_v29 = vmul.f32 %v9714_v38, %v9854_v37  ;;  %v3250_v6 = vmul.f32 0.044715, %v9859_v56  ;;  %v9863_v3 = vld [vmem:[#allocation45_spill] sm:$0xff]  ;;  %v9866_v47 = vld [vmem:[#allocation46_spill] sm:$0xff] }
 0x276   : > { %4574 = vtanh.f32 %v3498_v31  ;;  %v7806_v51 = vmul.f32 %v3835_v9, %v3695_v44  ;;  %v2386_v36 = vmul.f32 %v9717_v32, %v9843_v34  ;;  %v3017_v21 = vmul.f32 %v9727_v33, %v9856_v12  ;;  %v9860_v12 = vld [vmem:[#allocation41_spill] sm:$0xff]  ;;  %v9865_v31 = vld [vmem:[#allocation126_spill] sm:$0xff] }
 0x277   : > { %9858 = vst [vmem:[#allocation130_spill] sm:$0xff] %v7799_v13  ;;  %3904 = vrot.lane.b32.xlu1 %v7799_v13, %s4732_s14  ;;  %v7816_v45 = vmul.f32 %v9776_v59, %v9676_v10  ;;  %v2178_v5 = vadd.f32 %v2016_v27, %v1683_v50  ;;  %v3314_v37 = vmul.f32 %v3250_v6, %v9859_v56  ;;  %v9869_v6 = vld [vmem:[#allocation102_spill] sm:$0xff] }
 0x278   : > { %v847_v4 = vmul.f32 %v9788_v40, %v9668_v8  ;;  %v7823_v2 = vmul.f32 %v9782_v49, %v9783_v15  ;;  %v2783_v22 = vsel %vm4871_vm8, %v2781_v35, %v2782_v52  ;;  %v1485_v33 = vmul.f32 %v9789_v46, %v9676_v10  ;;  %v9862_v8 = vld [vmem:[#allocation22_spill] sm:$0xff]  ;;  %v9864_v35 = vld [vmem:[#allocation128_spill] sm:$0xff]  ;;  %v3825_v40 = vpop.permute.xlu0 %3824 }
 0x279   : > { %v9148_v14 = vrot.slane %v7816_v45, 7  ;;  %v1621_v43 = vmul.f32 %v9861_v25, %v9860_v12  ;;  %v2314_v61 = vadd.f32 %v2250_v29, %v2178_v5  ;;  %v3378_v17 = vmul.f32 %v3314_v37, %v9859_v56  ;;  %v9867_v52 = vld [vmem:[#allocation90_spill] sm:$0xff] }
 0x27a   : > { %v2252_v53 = vmul.f32 %v9862_v8, %v9783_v15  ;;  %v2388_v24 = vmul.f32 %v9863_v3, %v9845_v11  ;;  %v4573_v9 = vpop.eup %4572  ;;  %v7844_v27 = vmul.f32 %v9866_v47, %v9865_v31  ;;  %v9868_v50 = vrot.slane %v9867_v52, 7  ;;  %v3819_v11 = vpop.permute.xlu1 %3818 }
 0x27b   : > { %v1256_v44 = vsel %vm4871_vm8, %v9864_v35, %v9148_v14  ;;  %v7850_v5 = vmul.f32 %v9832_v63, %v9869_v6  ;;  %v3623_v12 = vadd.f32 1.0, %v4573_v9  ;;  %v2450_v13 = vadd.f32 %v2386_v36, %v2314_v61  ;;  %v9870_v14 = vld [vmem:[#allocation50_spill] sm:$0xff] }
 0x27c   : > { %v2788_v29 = vrot.slane %v9868_v50, 2  ;;  %v4575_v37 = vpop.eup %4574  ;;  %v1413_v3 = vadd.f32 %v1256_v44, %v847_v4  ;;  %v2022_v8 = vrot.slane %v7823_v2, 7  ;;  %v3442_v35 = vadd.f32 %v3378_v17, %v9859_v56  ;;  %v9871_v4 = vld [vmem:[#allocation99_spill] sm:$0xff] }
 0x27d   : > { %v3626_v25 = vadd.f32 1.0, %v4575_v37  ;;  %v7856_v46 = vmul.f32 %v9870_v14, %v9865_v31  ;;  %v1258_v52 = vrot.slane %v7850_v5, 7  ;;  %v3687_v50 = vmul.f32 %v3623_v12, %v3175_v0 }
 0x27e   : > { %v2945_v63 = vadd.f32 %v2783_v22, %v2450_v13  ;;  %v1549_v34 = vadd.f32 %v1485_v33, %v1413_v3  ;;  %v849_v9 = vmul.f32 %v9800_v26, %v9869_v6  ;;  %v2023_v61 = vsel %vm4871_vm8, %v9871_v4, %v2022_v8  ;;  %v9872_v33 = vld [vmem:[#allocation134_spill] sm:$0xff] }
 0x27f   : > { %v3690_v36 = vmul.f32 %v3626_v25, %v3178_v23  ;;  %v2789_v17 = vrot.slane %v7844_v27, 7  ;;  %v1260_v44 = vrot.slane %v1258_v52, 2  ;;  %v4007_v37 = vmul.f32 %v3819_v11, %v3687_v50  ;;  %v9874_v25 = vld [vmem:[#allocation119_spill] sm:$0xff]  ;;  %v4069_v11 = vld [vmem:[%s8635_s4 + $0x8] sm:$0x3] }
 0x280   : > { %v3081_v14 = vadd.f32 %v3017_v21, %v2945_v63  ;;  %v1685_v5 = vadd.f32 %v1621_v43, %v1549_v34  ;;  %v1487_v0 = vmul.f32 %v9806_v41, %v9804_v20  ;;  %v3506_v22 = vmul.f32 0.7978846, %v3442_v35  ;;  %v9875_v43 = vld [vmem:[#allocation127_spill] sm:$0xff]  ;;  %4491 = vmatpush.msk.msra.mxu1 %vm4254_vm9, %v4069_v11  ;;  %4512 = vmatpush.msk.msrb.mxu3 %vm4254_vm9, %v4069_v11  ;;  %v7921_v11 = vpop.permute.xlu0 %3830 }
 0x281   : > { %v4010_v13 = vmul.f32 %v3825_v40, %v3690_v36  ;;  %v9873_v26 = vrot.slane %v9872_v33, 7  ;;  %v7875_v3 = vmul.f32 %v9838_v7, %v9874_v25  ;;  %4140 = vst [vmem:[#allocation1 + $0x3] ss:$4 sm:$0xff] %v4007_v37  ;;  %v1623_v41 = vmul.f32 %v9809_v16, %v9874_v25  ;;  %v9877_v36 = vld [vmem:[#allocation91_spill] sm:$0xff] }
 0x282   : > { %v7881_v34 = vadd.f32 %v9824_v30, %v3081_v14  ;;  %v2180_v20 = vadd.f32 %v2023_v61, %v1685_v5  ;;  %v2790_v7 = vsel %vm4871_vm8, %v2788_v29, %v2789_v17  ;;  %v7892_v12 = vmul.f32 %v9844_v42, %v9875_v43  ;;  %v4068_v14 = vld [vmem:[%s8635_s4] sm:$0xff]  ;;  %v9876_v29 = vld [vmem:[#allocation86_spill] sm:$0xff]  ;;  %v7906_v5 = vpop.permute.xlu1 %3826 }
 0x283   : > { %v1262_v23 = vsel %vm4871_vm8, %v1260_v44, %v9873_v26  ;;  %4146 = vst [vmem:[#allocation1 + $0x22] ss:$4 sm:$0xff] %v4010_v13  ;;  %v2025_v21 = vrot.slane %v7875_v3, 7  ;;  %v2254_v50 = vmul.f32 %v9714_v38, %v9807_v54  ;;  %v3243_v63 = vmul.f32 0.044715, %v9876_v29  ;;  %4273 = vmatpush.msra.mxu1 %v4068_v14  ;;  %4513 = vmatpush.msrb.mxu3 %v4068_v14  ;;  %v7929_v14 = vpop.permute.xlu2 %3840 }
 0x284   : > { %v1415_v40 = vadd.f32 %v1262_v23, %v849_v9  ;;  %3906 = vrot.lane.b32.xlu2 %v7881_v34, %s4732_s14  ;;  %v2316_v16 = vadd.f32 %v2252_v53, %v2180_v20  ;;  %v2792_v42 = vrot.slane %v7892_v12, 7  ;;  %v3245_v4 = vmul.f32 0.044715, %v9877_v36 }
 0x285   : > { %v2027_v9 = vrot.slane %v2025_v21, 2  ;;  %v848_v61 = vmul.f32 %v9833_v28, %v9676_v10  ;;  %v3307_v53 = vmul.f32 %v3243_v63, %v9876_v29  ;;  %v9878_v38 = vrot.slane %v7816_v45, 7 }
 0x286   : > { %v1551_v35 = vadd.f32 %v1487_v0, %v1415_v40  ;;  %v2452_v44 = vadd.f32 %v2388_v24, %v2316_v16  ;;  %v9879_v0 = vld [vmem:[#allocation137_spill] sm:$0xff]  ;;  %v2390_v26 = vmul.f32 %v9717_v32, %v9875_v43  ;;  %v2794_v10 = vrot.slane %v2792_v42, 2 }
 0x287   : > { %v1257_v54 = vrot.slane %v9878_v38, 2  ;;  %v9880_v13 = vrot.slane %v9879_v0, 7  ;;  %v3309_v24 = vmul.f32 %v3245_v4, %v9877_v36  ;;  %v3371_v45 = vmul.f32 %v3307_v53, %v9876_v29  ;;  %v9885_v53 = vld [vmem:[#allocation43_spill] sm:$0xff] }
 0x288   : > { %v1687_v37 = vadd.f32 %v1623_v41, %v1551_v35  ;;  %v2947_v23 = vadd.f32 %v2790_v7, %v2452_v44  ;;  %v4012_v40 = vmul.f32 %v7756_v55, %v7739_v39  ;;  %v4149_v41 = vld.sshfl [vmem:[#allocation1] sm:$0xff pattern:$0x73625140]  ;;  %4576 = vtanh.f32 %v3506_v22 }
 0x289   : > { %v2029_v33 = vsel %vm4871_vm8, %v2027_v9, %v9880_v13  ;;  %v1259_v20 = vsel %vm4871_vm8, %v1257_v54, %v1258_v52  ;;  %v3373_v32 = vmul.f32 %v3309_v24, %v9877_v36  ;;  %4154 = vst [vmem:[#allocation1 + $0x3] ss:$4 sm:$0xff] %v7806_v51  ;;  %v3435_v63 = vadd.f32 %v3371_v45, %v9876_v29  ;;  %v9881_v9 = vld [vmem:[#allocation148_spill] sm:$0xff]  ;;  %v9886_v13 = vld [vmem:[#allocation27_spill] sm:$0xff] }
 0x28a   : > { %v2182_v3 = vadd.f32 %v2029_v33, %v1687_v37  ;;  %v1414_v16 = vadd.f32 %v1259_v20, %v848_v61  ;;  %v3083_v7 = vadd.f32 %v7856_v46, %v2947_v23  ;;  %v1486_v52 = vmul.f32 %v9836_v18, %v9869_v6  ;;  %4151 = vst [vmem:[#allocation1] ss:$4 sm:$0xff] %v4012_v40  ;;  %v9884_v37 = vld [vmem:[#allocation80_spill] sm:$0xff]  ;;  %v9888_v24 = vld [vmem:[#allocation95_spill] sm:$0xff] }
 0x28b   : > { %v9882_v39 = vrot.slane %v9881_v9, 7  ;;  %v3437_v22 = vadd.f32 %v3373_v32, %v9877_v36  ;;  %v1622_v51 = vmul.f32 %v9841_v48, %v9783_v15  ;;  %v2024_v46 = vrot.slane %v2022_v8, 2  ;;  %4492 = vmatmul.msk.f32.vlgmr.msra.gmra.mxu1 %vm4221_vm10, %v4149_v41  ;;  %v9895_v9 = vld [vmem:[#allocation78_spill] sm:$0xff]  ;;  %v7989_v41 = vpop.permute.xlu0 %3836 }
 0x28c   : > { %v2318_v35 = vadd.f32 %v2254_v50, %v2182_v3  ;;  %v9883_v50 = vld [vmem:[#allocation60_spill] sm:$0xff]  ;;  %v3499_v44 = vmul.f32 0.7978846, %v3435_v63  ;;  %v1550_v6 = vadd.f32 %v1486_v52, %v1414_v16  ;;  %v7949_v38 = vadd.f32 %v9885_v53, %v9884_v37  ;;  %v7968_v16 = vpop.permute.xlu1 %3832  ;;  %v9893_v63 = vld [vmem:[#allocation161_spill] sm:$0xff] }
 0x28d   : > { %v2796_v55 = vsel %vm4871_vm8, %v2794_v10, %v9882_v39  ;;  %v7945_v4 = vadd.f32 %v9883_v50, %v3083_v7  ;;  %v3501_v54 = vmul.f32 0.7978846, %v3437_v22  ;;  %v2026_v0 = vsel %vm4871_vm8, %v2024_v46, %v2025_v21  ;;  %v9887_v10 = vld [vmem:[#allocation149_spill] sm:$0xff]  ;;  %v9889_v21 = vld [vmem:[#allocation83_spill] sm:$0xff] }
 0x28e   : > { %v2454_v61 = vadd.f32 %v2390_v26, %v2318_v35  ;;  %v2253_v15 = vmul.f32 %v9886_v13, %v9874_v25  ;;  %4578 = vtanh.f32 %v3499_v44  ;;  %v1686_v8 = vadd.f32 %v1622_v51, %v1550_v6  ;;  %v4577_v26 = vpop.eup %4576  ;;  %v9890_v25 = vld [vmem:[#allocation150_spill] sm:$0xff]  ;;  %v9891_v7 = vld [vmem:[#allocation143_spill] sm:$0xff]  ;;  %v9897_v6 = vld [vmem:[#allocation33_spill] sm:$0xff] }
 0x28f   : > { %3910 = vrot.lane.b32.xlu1 %v7945_v4, %s4732_s14  ;;  %v2791_v33 = vrot.slane %v2789_v17, 2  ;;  %v7961_v23 = vadd.f32 %v9888_v24, %v9887_v10  ;;  %v3179_v3 = vmul.f32 0.5, %v9876_v29  ;;  %4580 = vtanh.f32 %v3501_v54  ;;  %v9892_v29 = vld [vmem:[#allocation44_spill] sm:$0xff]  ;;  %v9899_v10 = vld [vmem:[#allocation158_spill] sm:$0xff] }
 0x290   : > { %v2949_v2 = vadd.f32 %v2796_v55, %v2454_v61  ;;  %v3256_v45 = vmul.f32 0.044715, %v9889_v21  ;;  %v2181_v40 = vadd.f32 %v2026_v0, %v1686_v8  ;;  %v2389_v32 = vmul.f32 %v9716_v62, %v9865_v31  ;;  %v9896_v61 = vld [vmem:[#allocation132_spill] sm:$0xff]  ;;  %v7999_v0 = vpop.permute.xlu2 %3852 }
 0x291   : > { %v3181_v27 = vmul.f32 0.5, %v9877_v36  ;;  %v7975_v35 = vmul.f32 %v9892_v29, %v9891_v7  ;;  %v9894_v52 = vrot.slane %v9893_v63, 7  ;;  %v3634_v31 = vadd.f32 1.0, %v4577_v26 }
 0x292   : > { %v3085_v20 = vadd.f32 %v9890_v25, %v2949_v2  ;;  %v3320_v17 = vmul.f32 %v3256_v45, %v9889_v21  ;;  %v2317_v22 = vadd.f32 %v2253_v15, %v2181_v40  ;;  %v2793_v36 = vsel %vm4871_vm8, %v2791_v33, %v2792_v42  ;;  %v4690_v42 = vld [vmem:[%s8633_s2 + $0x8] ss:$0 sm:$0xff]  ;;  %v9898_v2 = vld [vmem:[#allocation36_spill] sm:$0xff] }
 0x293   : > { %v2815_v39 = vsel %vm4871_vm8, %v9895_v9, %v9894_v52  ;;  %v9152_v46 = vrot.slane %v7975_v35, 7  ;;  %v3246_v37 = vmul.f32 0.044715, %v9897_v6  ;;  %v3020_v12 = vmul.f32 %v9724_v57, %v9875_v43  ;;  %v9900_v45 = vld [vmem:[#allocation160_spill] sm:$0xff]  ;;  %v9904_v52 = vld [vmem:[#allocation162_spill] sm:$0xff] }
 0x294   : > { %v7983_v55 = vadd.f32 %v9824_v30, %v3085_v20  ;;  %v3384_v51 = vmul.f32 %v3320_v17, %v9889_v21  ;;  %v2955_v44 = vadd.f32 %v2815_v39, %v9896_v61  ;;  %v4579_v53 = vpop.eup %4578  ;;  %v2453_v54 = vadd.f32 %v2389_v32, %v2317_v22  ;;  %v9902_v20 = vld [vmem:[#allocation157_spill] sm:$0xff]  ;;  %v9905_v22 = vld [vmem:[#allocation146_spill] sm:$0xff] }
 0x295   : > { %v3022_v15 = vmul.f32 %v4690_v42, %v9891_v7  ;;  %v3248_v8 = vmul.f32 0.044715, %v9898_v2  ;;  %v4581_v33 = vpop.eup %4580  ;;  %v3627_v26 = vadd.f32 1.0, %v4579_v53  ;;  %v2799_v24 = vsel %vm4871_vm8, %v9899_v10, %v9152_v46 }
 0x296   : > { %3914 = vrot.lane.b32.xlu0 %v7983_v55, %s4732_s14  ;;  %v3310_v43 = vmul.f32 %v3246_v37, %v9897_v6  ;;  %v9901_v25 = vrot.slane %v9900_v45, 7  ;;  %v9903_v40 = vrot.slane %v9902_v20, 9  ;;  %v3629_v17 = vadd.f32 1.0, %v4581_v33  ;;  %v9906_v20 = vld [vmem:[#allocation163_spill] sm:$0xff] }
 0x297   : > { %v2948_v29 = vadd.f32 %v2793_v36, %v2453_v54  ;;  %v3448_v63 = vadd.f32 %v3384_v51, %v9889_v21  ;;  %v2950_v9 = vadd.f32 %v2799_v24, %v9904_v52  ;;  %v3691_v39 = vmul.f32 %v3627_v26, %v3179_v3  ;;  %v9907_v24 = vld [vmem:[#allocation84_spill] sm:$0xff] }
 0x298   : > { %v2812_v32 = vsel %vm4871_vm8, %v9903_v40, %v9901_v25  ;;  %v3091_v61 = vadd.f32 %v9905_v22, %v2955_v44  ;;  %v3374_v53 = vmul.f32 %v3310_v43, %v9897_v6  ;;  %v3312_v37 = vmul.f32 %v3248_v8, %v9898_v2  ;;  %v9908_v43 = vld [vmem:[#allocation117_spill] sm:$0xff] }
 0x299   : > { %v3693_v42 = vmul.f32 %v3629_v17, %v3181_v27  ;;  %v3084_v10 = vadd.f32 %v3020_v12, %v2948_v29  ;;  %v3086_v45 = vadd.f32 %v3022_v15, %v2950_v9  ;;  %v2954_v46 = vadd.f32 %v2812_v32, %v9906_v20  ;;  %v8035_v27 = vld [vmem:[%s8634_s3] ss:$0 sm:$0xff]  ;;  %v8056_v32 = vpop.permute.xlu0 %3842  ;;  %v9909_v29 = vld [vmem:[#allocation110_spill] sm:$0xff]  ;;  %v8064_v9 = vpop.permute.xlu2 %3858 }
 0x29a   : > { %v3186_v25 = vmul.f32 0.5, %v9859_v56  ;;  %v4011_v36 = vmul.f32 %v7906_v5, %v3691_v39  ;;  %v3438_v51 = vadd.f32 %v3374_v53, %v9897_v6  ;;  %v3376_v54 = vmul.f32 %v3312_v37, %v9898_v2  ;;  %v8040_v56 = vpop.permute.xlu1 %3838  ;;  %v9912_v53 = vld [vmem:[#allocation144_spill] sm:$0xff] }
 0x29b   : > { %v4013_v3 = vmul.f32 %v7921_v11, %v3693_v42  ;;  %v8030_v44 = vadd.f32 %v9709_v58, %v3084_v10  ;;  %v3512_v33 = vmul.f32 0.7978846, %v3448_v63  ;;  %v8038_v12 = vadd.f32 %v8035_v27, %v3086_v45 }
 0x29c   : > { %v3698_v5 = vmul.f32 %v3634_v31, %v3186_v25  ;;  %4148 = vst [vmem:[#allocation1 + $0x23] ss:$4 sm:$0xff] %v4011_v36  ;;  %v8043_v15 = vadd.f32 %v9883_v50, %v3091_v61  ;;  %v3502_v11 = vmul.f32 0.7978846, %v3438_v51  ;;  %v3440_v8 = vadd.f32 %v3376_v54, %v9898_v2  ;;  %v9913_v25 = vld [vmem:[#allocation32_spill] sm:$0xff] }
 0x29d   : > { %v8048_v26 = vadd.f32 %v9824_v30, %v7961_v23  ;;  %4152 = vst [vmem:[#allocation1 + $0x1] ss:$4 sm:$0xff] %v4013_v3  ;;  %3912 = vrot.lane.b32.xlu2 %v8030_v44, %s4732_s14  ;;  %3916 = vrot.lane.b32.xlu1 %v8038_v12, %s4732_s14  ;;  %v3090_v31 = vadd.f32 %v9907_v24, %v2954_v46  ;;  %v3259_v40 = vmul.f32 0.044715, %v9908_v43  ;;  %v3182_v52 = vmul.f32 0.5, %v9897_v6  ;;  %v9917_v24 = vld [vmem:[#allocation124_spill] sm:$0xff] }
 0x29e   : > { %v4018_v17 = vmul.f32 %v7929_v14, %v3698_v5  ;;  %3926 = vrot.lane.b32.xlu0 %v8043_v15, %s4732_s14  ;;  %4582 = vtanh.f32 %v3502_v11  ;;  %v3504_v23 = vmul.f32 0.7978846, %v3440_v8  ;;  %v1016_v63 = vmul.f32 %v9776_v59, %v9909_v29  ;;  %v9910_v14 = vld [vmem:[#allocation104_spill] sm:$0xff] }
 0x29f   : > { %4584 = vtanh.f32 %v3512_v33  ;;  %v3323_v46 = vmul.f32 %v3259_v40, %v9908_v43  ;;  %v8069_v39 = vmul.f32 %v9782_v49, %v9818_v19  ;;  %v8073_v22 = vadd.f32 %v9824_v30, %v9910_v14 }
 0x2a0   : > { %4586 = vtanh.f32 %v3504_v23  ;;  %v1267_v61 = vrot.slane %v1016_v63, 7  ;;  %v8077_v59 = vmul.f32 %v9866_v47, %v9912_v53  ;;  %v8080_v6 = vadd.f32 %v8035_v27, %v3090_v31 }
 0x2a1   : > { %9911 = vst [vmem:[#allocation47_spill] sm:$0xff] %v8073_v22  ;;  %v3387_v37 = vmul.f32 %v3323_v46, %v9908_v43  ;;  %v852_v42 = vmul.f32 %v9833_v28, %v9909_v29  ;;  %v9154_v49 = vrot.slane %v8069_v39, 7  ;;  %v1490_v45 = vmul.f32 %v9836_v18, %v9837_v1  ;;  %v9914_v28 = vld [vmem:[#allocation40_spill] sm:$0xff] }
 0x2a2   : > { %v1269_v10 = vrot.slane %v1267_v61, 2  ;;  %v9153_v20 = vrot.slane %v8077_v59, 7  ;;  %v3251_v36 = vmul.f32 0.044715, %v9913_v25  ;;  %v1626_v54 = vmul.f32 %v9841_v48, %v9818_v19  ;;  %v9915_v18 = vld [vmem:[#allocation152_spill] sm:$0xff]  ;;  %v8111_v46 = vpop.permute.xlu1 %3844 }
 0x2a3   : > { %v4150_v47 = vld.sshfl [vmem:[#allocation1 + $0x20] sm:$0xff pattern:$0x73625140]  ;;  %v3451_v51 = vadd.f32 %v3387_v37, %v9908_v43  ;;  %v2036_v3 = vrot.slane %v9154_v49, 2  ;;  %v3249_v33 = vmul.f32 0.044715, %v9914_v28  ;;  %v2257_v31 = vmul.f32 %v9886_v13, %v9917_v24  ;;  %v8123_v24 = vpop.permute.xlu0 %3854 }
 0x2a4   : > { %v4583_v5 = vpop.eup %4582  ;;  %4157 = vst [vmem:[#allocation1 + $0x22] ss:$4 sm:$0xff] %v4018_v17  ;;  %v3184_v11 = vmul.f32 0.5, %v9898_v2  ;;  %4493 = vmatmul.msk.f32.gmra.mxu1 %vm4221_vm10, %v4150_v47  ;;  %v9916_v1 = vrot.slane %v9915_v18, 7  ;;  %v3315_v48 = vmul.f32 %v3251_v36, %v9913_v25  ;;  %v2393_v63 = vmul.f32 %v9716_v62, %v9912_v53  ;;  %v9918_v36 = vld [vmem:[#allocation107_spill] sm:$0xff]  ;;  %v9919_v47 = vld [vmem:[#allocation5_spill] sm:$0xff] }
 0x2a5   : > { %v4585_v40 = vpop.eup %4584  ;;  %v3630_v23 = vadd.f32 1.0, %v4583_v5  ;;  %3924 = vrot.lane.b32.xlu2 %v8080_v6, %s4732_s14  ;;  %v3515_v17 = vmul.f32 0.7978846, %v3451_v51  ;;  %3922 = vrot.lane.b32.xlu1 %v8073_v22, %s4732_s14  ;;  %v2803_v13 = vrot.slane %v9153_v20, 2  ;;  %v851_v51 = vmul.f32 %v9919_v47, %v9918_v36  ;;  %v9922_v49 = vld [vmem:[#allocation135_spill] sm:$0xff] }
 0x2a6   : > { %v1271_v8 = vsel %vm4871_vm8, %v1269_v10, %v9916_v1  ;;  %v4587_v14 = vpop.eup %4586  ;;  %v3379_v37 = vmul.f32 %v3315_v48, %v9913_v25  ;;  %v3313_v10 = vmul.f32 %v3249_v33, %v9914_v28  ;;  %v9923_v33 = vrot.slane %v9922_v49, 7 }
 0x2a7   : > { %v1418_v2 = vadd.f32 %v1271_v8, %v852_v42  ;;  %v3694_v5 = vmul.f32 %v3630_v23, %v3182_v52  ;;  %v3632_v18 = vadd.f32 1.0, %v4587_v14  ;;  %v9920_v42 = vld [vmem:[#allocation153_spill] sm:$0xff]  ;;  %4588 = vtanh.f32 %v3515_v17  ;;  %v8132_v14 = vpop.permute.xlu2 %3846 }
 0x2a8   : > { %v9921_v8 = vrot.slane %v9920_v42, 7  ;;  %v3443_v20 = vadd.f32 %v3379_v37, %v9913_v25  ;;  %v3377_v48 = vmul.f32 %v3313_v10, %v9914_v28  ;;  %v1266_v22 = vrot.slane %v9923_v33, 2  ;;  %v9925_v37 = vld [vmem:[#allocation138_spill] sm:$0xff] }
 0x2a9   : > { %v1554_v1 = vadd.f32 %v1490_v45, %v1418_v2  ;;  %v4014_v36 = vmul.f32 %v7968_v16, %v3694_v5  ;;  %v3696_v52 = vmul.f32 %v3632_v18, %v3184_v11  ;;  %v9924_v45 = vld [vmem:[#allocation13_spill] sm:$0xff]  ;;  %v9926_v10 = vrot.slane %v9925_v37, 7  ;;  %v9928_v5 = vld [vmem:[#allocation20_spill] sm:$0xff] }
 0x2aa   : > { %v2038_v62 = vsel %vm4871_vm8, %v2036_v3, %v9921_v8  ;;  %v1489_v2 = vmul.f32 %v9924_v45, %v9909_v29  ;;  %v3507_v3 = vmul.f32 0.7978846, %v3443_v20  ;;  %v3441_v47 = vadd.f32 %v3377_v48, %v9914_v28  ;;  %v9929_v48 = vld [vmem:[#allocation145_spill] sm:$0xff] }
 0x2ab   : > { %v1690_v23 = vadd.f32 %v1626_v54, %v1554_v1  ;;  %v1268_v17 = vsel %vm4871_vm8, %v1266_v22, %v1267_v61  ;;  %v2033_v42 = vrot.slane %v9926_v10, 2  ;;  %4153 = vst [vmem:[#allocation1 + $0x2] ss:$4 sm:$0xff] %v4014_v36  ;;  %v4016_v49 = vmul.f32 %v7989_v41, %v3696_v52  ;;  %v9927_v54 = vld [vmem:[#allocation115_spill] sm:$0xff]  ;;  %v9930_v41 = vld [vmem:[#allocation77_spill] sm:$0xff] }
 0x2ac   : > { %v1417_v11 = vadd.f32 %v1268_v17, %v851_v51  ;;  %v1625_v18 = vmul.f32 %v9928_v5, %v9927_v54  ;;  %v3192_v29 = vmul.f32 0.5, %v9889_v21  ;;  %v3640_v1 = vadd.f32 1.0, %v4585_v40  ;;  %v8148_v51 = vpop.permute.xlu1 %3856  ;;  %v9931_v36 = vld [vmem:[#allocation155_spill] sm:$0xff]  ;;  %v9934_v40 = vld [vmem:[#allocation133_spill] sm:$0xff] }
 0x2ad   : > { %v2185_v16 = vadd.f32 %v2038_v62, %v1690_v23  ;;  %4590 = vtanh.f32 %v3507_v3  ;;  %v3505_v20 = vmul.f32 0.7978846, %v3441_v47  ;;  %4155 = vst [vmem:[#allocation1 + $0x20] ss:$4 sm:$0xff] %v4016_v49  ;;  %v3024_v22 = vmul.f32 %v9724_v57, %v9929_v48  ;;  %3928 = vrot.lane.b32.xlu1 %v9930_v41, %s4732_s14  ;;  %v4589_v62 = vpop.eup %4588  ;;  %v9935_v3 = vld [vmem:[#allocation22_spill] sm:$0xff]  ;;  %v9937_v49 = vld [vmem:[#allocation108_spill] sm:$0xff] }
 0x2ae   : > { %v3187_v61 = vmul.f32 0.5, %v9913_v25  ;;  %v1553_v33 = vadd.f32 %v1489_v2, %v1417_v11  ;;  %v9932_v52 = vrot.slane %v9931_v36, 7  ;;  %v3253_v25 = vmul.f32 0.044715, %v9934_v40 }
 0x2af   : > { %v2321_v8 = vadd.f32 %v2257_v31, %v2185_v16  ;;  %4592 = vtanh.f32 %v3505_v20  ;;  %v9933_v31 = vrot.slane %v8069_v39, 7  ;;  %v3185_v45 = vmul.f32 0.5, %v9914_v28  ;;  %v8169_v28 = vpop.permute.xlu0 %3848 }
 0x2b0   : > { %v2805_v21 = vsel %vm4871_vm8, %v2803_v13, %v9932_v52  ;;  %v1689_v2 = vadd.f32 %v1625_v18, %v1553_v33  ;;  %v2256_v47 = vmul.f32 %v9935_v3, %v9818_v19  ;;  %v3704_v17 = vmul.f32 %v3640_v1, %v3192_v29  ;;  %v9940_v29 = vld [vmem:[#allocation50_spill] sm:$0xff]  ;;  %v8177_v52 = vpop.permute.xlu2 %3870 }
 0x2b1   : > { %v2035_v57 = vsel %vm4871_vm8, %v2033_v42, %v9933_v31  ;;  %v2457_v23 = vadd.f32 %v2393_v63, %v2321_v8  ;;  %v9936_v37 = vrot.slane %v7975_v35, 7  ;;  %v3317_v13 = vmul.f32 %v3253_v25, %v9934_v40  ;;  %v9938_v42 = vld [vmem:[#allocation45_spill] sm:$0xff]  ;;  %v9939_v63 = vld [vmem:[#allocation38_spill] sm:$0xff]  ;;  %v9942_v25 = vld [vmem:[#allocation159_spill] sm:$0xff] }
 0x2b2   : > { %v3252_v39 = vmul.f32 0.044715, %v9937_v49  ;;  %v2184_v11 = vadd.f32 %v2035_v57, %v1689_v2  ;;  %v2392_v54 = vmul.f32 %v9938_v42, %v9891_v7  ;;  %v3257_v5 = vmul.f32 0.044715, %v9939_v63  ;;  %v9943_v42 = vld [vmem:[#allocation75_spill] sm:$0xff] }
 0x2b3   : > { %v2800_v10 = vrot.slane %v9936_v37, 2  ;;  %v2952_v16 = vadd.f32 %v2805_v21, %v2457_v23  ;;  %v4591_v18 = vpop.eup %4590  ;;  %v4159_v20 = vld.sshfl [vmem:[#allocation1] sm:$0xff pattern:$0x73625140]  ;;  %v3643_v19 = vadd.f32 1.0, %v4589_v62  ;;  %v3023_v35 = vmul.f32 %v9940_v29, %v9912_v53 }
 0x2b4   : > { %v3381_v1 = vmul.f32 %v3317_v13, %v9934_v40  ;;  %v3316_v8 = vmul.f32 %v3252_v39, %v9937_v49  ;;  %v3635_v33 = vadd.f32 1.0, %v4591_v18  ;;  %v2320_v36 = vadd.f32 %v2256_v47, %v2184_v11  ;;  %4494 = vmatmul.msk.f32.gmra.mxu1 %vm4221_vm10, %v4159_v20  ;;  %v8189_v37 = vpop.permute.xlu1 %3850 }
 0x2b5   : > { %v3088_v48 = vadd.f32 %v3024_v22, %v2952_v16  ;;  %v3321_v7 = vmul.f32 %v3257_v5, %v9939_v63  ;;  %v4593_v21 = vpop.eup %4592  ;;  %v9941_v31 = vrot.slane %v8077_v59, 7  ;;  %v3265_v22 = vmul.f32 0.044715, %v9942_v25 }
 0x2b6   : > { %v3445_v53 = vadd.f32 %v3381_v1, %v9934_v40  ;;  %v3380_v57 = vmul.f32 %v3316_v8, %v9937_v49  ;;  %v3699_v2 = vmul.f32 %v3635_v33, %v3187_v61  ;;  %v3633_v3 = vadd.f32 1.0, %v4593_v21 }
 0x2b7   : > { %v2802_v62 = vsel %vm4871_vm8, %v2800_v10, %v9941_v31  ;;  %v8187_v23 = vadd.f32 %v9709_v58, %v3088_v48  ;;  %v2456_v47 = vadd.f32 %v2392_v54, %v2320_v36  ;;  %v3385_v60 = vmul.f32 %v3321_v7, %v9939_v63  ;;  %v8219_v31 = vpop.permute.xlu0 %3860 }
 0x2b8   : > { %v3509_v13 = vmul.f32 0.7978846, %v3445_v53  ;;  %v3444_v59 = vadd.f32 %v3380_v57, %v9937_v49  ;;  %v3329_v10 = vmul.f32 %v3265_v22, %v9942_v25  ;;  %v4019_v39 = vmul.f32 %v8056_v32, %v3699_v2  ;;  %v9944_v32 = vld [vmem:[#allocation114_spill] sm:$0xff]  ;;  %v8228_v57 = vpop.permute.xlu2 %3864  ;;  %v9948_v22 = vld [vmem:[#allocation123_spill] sm:$0xff] }
 0x2b9   : > { %3920 = vrot.lane.b32.xlu0 %v8187_v23, %s4732_s14  ;;  %v3697_v16 = vmul.f32 %v3633_v3, %v3185_v45  ;;  %v2951_v11 = vadd.f32 %v2802_v62, %v2456_v47  ;;  %v8199_v61 = vadd.f32 %v9883_v50, %v9943_v42  ;;  %v3449_v5 = vadd.f32 %v3385_v60, %v9939_v63  ;;  %v9949_v60 = vld [vmem:[#allocation118_spill] sm:$0xff] }
 0x2ba   : > { %4594 = vtanh.f32 %v3509_v13  ;;  %v3508_v54 = vmul.f32 0.7978846, %v3444_v59  ;;  %v3393_v18 = vmul.f32 %v3329_v10, %v9942_v25  ;;  %v3195_v20 = vmul.f32 0.5, %v9908_v43  ;;  %4158 = vst [vmem:[#allocation1 + $0x23] ss:$4 sm:$0xff] %v4019_v39  ;;  %v9945_v43 = vld [vmem:[#allocation81_spill] sm:$0xff] }
 0x2bb   : > { %v4017_v29 = vmul.f32 %v8040_v56, %v3697_v16  ;;  %v3087_v1 = vadd.f32 %v3023_v35, %v2951_v11  ;;  %3934 = vrot.lane.b32.xlu1 %v8199_v61, %s4732_s14  ;;  %v3258_v45 = vmul.f32 0.044715, %v9944_v32  ;;  %v4024_v8 = vmul.f32 %v7999_v0, %v3704_v17  ;;  %v9946_v35 = vld [vmem:[#allocation69_spill] sm:$0xff] }
 0x2bc   : > { %v3189_v48 = vmul.f32 0.5, %v9934_v40  ;;  %4596 = vtanh.f32 %v3508_v54  ;;  %v3513_v33 = vmul.f32 0.7978846, %v3449_v5  ;;  %v8215_v7 = vadd.f32 %v8035_v27, %v9945_v43  ;;  %v9947_v40 = vld [vmem:[#allocation93_spill] sm:$0xff]  ;;  %v8231_v3 = vpop.permute.xlu1 %3868  ;;  %v9950_v5 = vld [vmem:[#allocation68_spill] sm:$0xff] }
 0x2bd   : > { %4156 = vst [vmem:[#allocation1 + $0x21] ss:$4 sm:$0xff] %v4017_v29  ;;  %v8211_v36 = vadd.f32 %v9883_v50, %v3087_v1  ;;  %v3322_v56 = vmul.f32 %v3258_v45, %v9944_v32  ;;  %v3254_v21 = vmul.f32 0.044715, %v9946_v35  ;;  %v3707_v62 = vmul.f32 %v3643_v19, %v3195_v20 }
 0x2be   : > { %4598 = vtanh.f32 %v3513_v33  ;;  %v3457_v0 = vadd.f32 %v3393_v18, %v9942_v25  ;;  %v3262_v17 = vmul.f32 0.044715, %v9947_v40  ;;  %v3188_v50 = vmul.f32 0.5, %v9937_v49 }
 0x2bf   : > { %3918 = vrot.lane.b32.xlu2 %v8211_v36, %s4732_s14  ;;  %v3386_v27 = vmul.f32 %v3322_v56, %v9944_v32  ;;  %v3318_v53 = vmul.f32 %v3254_v21, %v9946_v35  ;;  %v3255_v2 = vmul.f32 0.044715, %v9948_v22  ;;  %v4027_v47 = vmul.f32 %v8064_v9, %v3707_v62  ;;  %v9951_v56 = vld [vmem:[#allocation89_spill] sm:$0xff] }
 0x2c0   : > { %v4595_v19 = vpop.eup %4594  ;;  %v3193_v13 = vmul.f32 0.5, %v9939_v63  ;;  %v3326_v59 = vmul.f32 %v3262_v17, %v9947_v40  ;;  %v3260_v10 = vmul.f32 0.044715, %v9949_v60  ;;  %v3521_v54 = vmul.f32 0.7978846, %v3457_v0 }
 0x2c1   : > { %v3637_v49 = vadd.f32 1.0, %v4595_v19  ;;  %3932 = vrot.lane.b32.xlu0 %v8215_v7, %s4732_s14  ;;  %v3450_v39 = vadd.f32 %v3386_v27, %v9944_v32  ;;  %v3382_v16 = vmul.f32 %v3318_v53, %v9946_v35  ;;  %v3319_v11 = vmul.f32 %v3255_v2, %v9948_v22 }
 0x2c2   : > { %v4597_v42 = vpop.eup %4596  ;;  %v3390_v9 = vmul.f32 %v3326_v59, %v9947_v40  ;;  %v3324_v63 = vmul.f32 %v3260_v10, %v9949_v60  ;;  %v3268_v18 = vmul.f32 0.044715, %v9950_v5  ;;  %v8248_v21 = vadd.f32 %v9824_v30, %v9951_v56 }
 0x2c3   : > { %v3701_v20 = vmul.f32 %v3637_v49, %v3189_v48  ;;  %v3636_v29 = vadd.f32 1.0, %v4597_v42  ;;  %v3514_v1 = vmul.f32 0.7978846, %v3450_v39  ;;  %v3446_v45 = vadd.f32 %v3382_v16, %v9946_v35  ;;  %v9952_v16 = vld [vmem:[#allocation139_spill] sm:$0xff] }
 0x2c4   : > { %v4599_v33 = vpop.eup %4598  ;;  %v4160_v43 = vld.sshfl [vmem:[#allocation1 + $0x20] sm:$0xff pattern:$0x73625140]  ;;  %v3454_v62 = vadd.f32 %v3390_v9, %v9947_v40  ;;  %v3383_v0 = vmul.f32 %v3319_v11, %v9948_v22  ;;  %v3388_v17 = vmul.f32 %v3324_v63, %v9949_v60  ;;  %v3264_v11 = vmul.f32 0.044715, %v9952_v16  ;;  %v9953_v9 = vld [vmem:[#allocation147_spill] sm:$0xff] }
 0x2c5   : > { %4165 = vst [vmem:[#allocation1 + $0x20] ss:$4 sm:$0xff] %v4024_v8  ;;  %v4021_v27 = vmul.f32 %v8132_v14, %v3701_v20  ;;  %v3700_v48 = vmul.f32 %v3636_v29, %v3188_v50  ;;  %v3641_v53 = vadd.f32 1.0, %v4599_v33  ;;  %4495 = vmatmul.msk.f32.gmra.mxu1 %vm4221_vm10, %v4160_v43  ;;  %4600 = vtanh.f32 %v3514_v1  ;;  %v8261_v8 = vpop.permute.xlu0 %3872  ;;  %v8263_v50 = vpop.permute.xlu1 %3874 }
 0x2c6   : > { %4168 = vst [vmem:[#allocation1 + $0x23] ss:$4 sm:$0xff] %v4027_v47  ;;  %v3510_v2 = vmul.f32 0.7978846, %v3446_v45  ;;  %v3518_v19 = vmul.f32 0.7978846, %v3454_v62  ;;  %v3447_v30 = vadd.f32 %v3383_v0, %v9948_v22  ;;  %v3452_v59 = vadd.f32 %v3388_v17, %v9949_v60 }
 0x2c7   : > { %4162 = vst [vmem:[#allocation1 + $0x1] ss:$4 sm:$0xff] %v4021_v27  ;;  %v4020_v10 = vmul.f32 %v8111_v46, %v3700_v48  ;;  %v3705_v49 = vmul.f32 %v3641_v53, %v3193_v13  ;;  %3930 = vrot.lane.b32.xlu2 %v8248_v21, %s4732_s14  ;;  %4602 = vtanh.f32 %v3521_v54  ;;  %v3332_v14 = vmul.f32 %v3268_v18, %v9950_v5  ;;  %v8269_v46 = vpop.permute.xlu2 %3876 }
 0x2c8   : > { %4604 = vtanh.f32 %v3510_v2  ;;  %v3511_v47 = vmul.f32 0.7978846, %v3447_v30  ;;  %v3516_v39 = vmul.f32 0.7978846, %v3452_v59  ;;  %v8273_v13 = vadd.f32 %v9709_v58, %v7949_v38  ;;  %v9954_v38 = vld [vmem:[#allocation92_spill] sm:$0xff] }
 0x2c9   : > { %4161 = vst [vmem:[#allocation1] ss:$4 sm:$0xff] %v4020_v10  ;;  %v4025_v42 = vmul.f32 %v8123_v24, %v3705_v49  ;;  %3938 = vrot.lane.b32.xlu0 %v8048_v26, %s4732_s14  ;;  %4606 = vtanh.f32 %v3518_v19  ;;  %v3328_v54 = vmul.f32 %v3264_v11, %v9952_v16  ;;  %v3266_v63 = vmul.f32 0.044715, %v9953_v9 }
 0x2ca   : > { %4608 = vtanh.f32 %v3511_v47  ;;  %v3201_v20 = vmul.f32 0.5, %v9942_v25  ;;  %v3194_v24 = vmul.f32 0.5, %v9944_v32  ;;  %v3396_v29 = vmul.f32 %v3332_v14, %v9950_v5  ;;  %v9955_v25 = vld [vmem:[#allocation131_spill] sm:$0xff] }
 0x2cb   : > { %v4601_v18 = vpop.eup %4600  ;;  %4166 = vst [vmem:[#allocation1 + $0x21] ss:$4 sm:$0xff] %v4025_v42  ;;  %4610 = vtanh.f32 %v3516_v39  ;;  %v3392_v45 = vmul.f32 %v3328_v54, %v9952_v16  ;;  %v3330_v58 = vmul.f32 %v3266_v63, %v9953_v9  ;;  %v3271_v33 = vmul.f32 0.044715, %v9954_v38 }
 0x2cc   : > { %v3642_v1 = vadd.f32 1.0, %v4601_v18  ;;  %v3190_v56 = vmul.f32 0.5, %v9946_v35  ;;  %v3198_v62 = vmul.f32 0.5, %v9947_v40  ;;  %v3191_v0 = vmul.f32 0.5, %v9948_v22 }
 0x2cd   : > { %v4603_v43 = vpop.eup %4602  ;;  %v3263_v17 = vmul.f32 0.044715, %v9955_v25  ;;  %v3456_v48 = vadd.f32 %v3392_v45, %v9952_v16  ;;  %v3394_v53 = vmul.f32 %v3330_v58, %v9953_v9  ;;  %v3335_v2 = vmul.f32 %v3271_v33, %v9954_v38  ;;  %v8295_v59 = vpop.permute.xlu1 %3862 }
 0x2ce   : > { %v4605_v32 = vpop.eup %4604  ;;  %v3706_v27 = vmul.f32 %v3642_v1, %v3194_v24  ;;  %v3196_v35 = vmul.f32 0.5, %v9949_v60  ;;  %v3460_v40 = vadd.f32 %v3396_v29, %v9950_v5  ;;  %v3649_v49 = vadd.f32 1.0, %v4603_v43  ;;  %v8300_v18 = vpop.permute.xlu0 %3866  ;;  %v9956_v60 = vld [vmem:[#allocation48_spill] sm:$0xff] }
 0x2cf   : > { %v4607_v19 = vpop.eup %4606  ;;  %v3638_v30 = vadd.f32 1.0, %v4605_v32  ;;  %3936 = vrot.lane.b32.xlu2 %v8273_v13, %s4732_s14  ;;  %v3327_v22 = vmul.f32 %v3263_v17, %v9955_v25  ;;  %v3520_v47 = vmul.f32 0.7978846, %v3456_v48  ;;  %v3458_v39 = vadd.f32 %v3394_v53, %v9953_v9  ;;  %v8305_v43 = vpop.permute.xlu2 %3882 }
 0x2d0   : > { %v4609_v10 = vpop.eup %4608  ;;  %v4026_v14 = vmul.f32 %v8148_v51, %v3706_v27  ;;  %v3267_v24 = vmul.f32 0.044715, %v9956_v60  ;;  %v3646_v29 = vadd.f32 1.0, %v4607_v19  ;;  %v3399_v45 = vmul.f32 %v3335_v2, %v9954_v38 }
 0x2d1   : > { %v4611_v11 = vpop.eup %4610  ;;  %v3702_v42 = vmul.f32 %v3638_v30, %v3190_v56  ;;  %v3639_v54 = vadd.f32 1.0, %v4609_v10  ;;  %v3391_v63 = vmul.f32 %v3327_v22, %v9955_v25  ;;  %4612 = vtanh.f32 %v3520_v47 }
 0x2d2   : > { %4167 = vst [vmem:[#allocation1 + $0x22] ss:$4 sm:$0xff] %v4026_v14  ;;  %v3522_v1 = vmul.f32 0.7978846, %v3458_v39  ;;  %v3524_v33 = vmul.f32 0.7978846, %v3460_v40  ;;  %v3713_v17 = vmul.f32 %v3649_v49, %v3201_v20  ;;  %v3331_v2 = vmul.f32 %v3267_v24, %v9956_v60 }
 0x2d3   : > { %v4022_v51 = vmul.f32 %v8169_v28, %v3702_v42  ;;  %v3703_v58 = vmul.f32 %v3639_v54, %v3191_v0  ;;  %v3455_v56 = vadd.f32 %v3391_v63, %v9955_v25  ;;  %v3200_v32 = vmul.f32 0.5, %v9952_v16  ;;  %v9957_v40 = vld [vmem:[#allocation71_spill] sm:$0xff]  ;;  %v9958_v20 = vld [vmem:[#allocation29_spill] sm:$0xff] }
 0x2d4   : > { %v3202_v27 = vmul.f32 0.5, %v9953_v9  ;;  %4614 = vtanh.f32 %v3522_v1  ;;  %v3644_v53 = vadd.f32 1.0, %v4611_v11  ;;  %v4033_v28 = vmul.f32 %v8177_v52, %v3713_v17  ;;  %v9959_v52 = vld [vmem:[#allocation70_spill] sm:$0xff]  ;;  %v9960_v1 = vld [vmem:[#allocation141_spill] sm:$0xff] }
 0x2d5   : > { %4163 = vst [vmem:[#allocation1 + $0x2] ss:$4 sm:$0xff] %v4022_v51  ;;  %v4023_v48 = vmul.f32 %v8189_v37, %v3703_v58  ;;  %v3519_v19 = vmul.f32 0.7978846, %v3455_v56  ;;  %v3710_v0 = vmul.f32 %v3646_v29, %v3198_v62  ;;  %v3463_v30 = vadd.f32 %v3399_v45, %v9954_v38  ;;  %v8325_v54 = vpop.permute.xlu1 %3886 }
 0x2d6   : > { %v3274_v22 = vmul.f32 0.044715, %v9957_v40  ;;  %4616 = vtanh.f32 %v3524_v33  ;;  %v3199_v16 = vmul.f32 0.5, %v9955_v25  ;;  %v3395_v9 = vmul.f32 %v3331_v2, %v9956_v60  ;;  %v8331_v56 = vpop.permute.xlu0 %3884 }
 0x2d7   : > { %4164 = vst [vmem:[#allocation1 + $0x3] ss:$4 sm:$0xff] %v4023_v48  ;;  %v3261_v10 = vmul.f32 0.044715, %v9958_v20  ;;  %v4613_v37 = vpop.eup %4612  ;;  %v4030_v49 = vmul.f32 %v8228_v57, %v3710_v0  ;;  %4618 = vtanh.f32 %v3519_v19  ;;  %v3272_v62 = vmul.f32 0.044715, %v9959_v52 }
 0x2d8   : > { %v3338_v14 = vmul.f32 %v3274_v22, %v9957_v40  ;;  %v3708_v47 = vmul.f32 %v3644_v53, %v3196_v35  ;;  %v3648_v39 = vadd.f32 1.0, %v4613_v37  ;;  %v3459_v11 = vadd.f32 %v3395_v9, %v9956_v60  ;;  %v9961_v19 = vld [vmem:[#allocation88_spill] sm:$0xff] }
 0x2d9   : > { %v8322_v42 = vld.sshfl [vmem:[#allocation1 + $0x20] sm:$0xff pattern:$0x73625140]  ;;  %v3325_v25 = vmul.f32 %v3261_v10, %v9958_v20  ;;  %v3527_v24 = vmul.f32 0.7978846, %v3463_v30  ;;  %v3336_v57 = vmul.f32 %v3272_v62, %v9959_v52 }
 0x2da   : > { %v4615_v63 = vpop.eup %4614  ;;  %v3402_v29 = vmul.f32 %v3338_v14, %v9957_v40  ;;  %4176 = vst [vmem:[#allocation1 + $0x21] ss:$4 sm:$0xff] %v4033_v28  ;;  %v3277_v45 = vmul.f32 0.044715, %v9960_v1  ;;  %v3712_v51 = vmul.f32 %v3648_v39, %v3200_v32  ;;  %v3523_v58 = vmul.f32 0.7978846, %v3459_v11  ;;  %v8338_v32 = vpop.permute.xlu2 %3888 }
 0x2db   : > { %v3650_v35 = vadd.f32 1.0, %v4615_v63  ;;  %v3389_v33 = vmul.f32 %v3325_v25, %v9958_v20  ;;  %v4028_v17 = vmul.f32 %v8219_v31, %v3708_v47  ;;  %v3400_v53 = vmul.f32 %v3336_v57, %v9959_v52  ;;  %v9962_v57 = vld [vmem:[#allocation64_spill] sm:$0xff] }
 0x2dc   : > { %v3466_v48 = vadd.f32 %v3402_v29, %v9957_v40  ;;  %v3269_v2 = vmul.f32 0.044715, %v9961_v19  ;;  %v4617_v28 = vpop.eup %4616  ;;  %v4032_v0 = vmul.f32 %v8231_v3, %v3712_v51  ;;  %4620 = vtanh.f32 %v3523_v58 }
 0x2dd   : > { %v3714_v30 = vmul.f32 %v3650_v35, %v3202_v27  ;;  %v3453_v22 = vadd.f32 %v3389_v33, %v9958_v20  ;;  %v4619_v9 = vpop.eup %4618  ;;  %4622 = vtanh.f32 %v3527_v24  ;;  %v3464_v31 = vadd.f32 %v3400_v53, %v9959_v52  ;;  %v8355_v33 = vpop.permute.xlu1 %3880 }
 0x2de   : > { %v4169_v10 = vld.sshfl [vmem:[#allocation1] sm:$0xff pattern:$0x73625140]  ;;  %v3530_v37 = vmul.f32 0.7978846, %v3466_v48  ;;  %v3341_v14 = vmul.f32 %v3277_v45, %v9960_v1  ;;  %v3647_v3 = vadd.f32 1.0, %v4619_v9  ;;  %v3333_v47 = vmul.f32 %v3269_v2, %v9961_v19 }
 0x2df   : > { %v4034_v62 = vmul.f32 %v8261_v8, %v3714_v30  ;;  %4496 = vmatmul.msk.f32.gmra.mxu1 %vm4221_vm10, %v4169_v10  ;;  %4171 = vst [vmem:[#allocation1] ss:$4 sm:$0xff] %v4028_v17  ;;  %v3517_v27 = vmul.f32 0.7978846, %v3453_v22  ;;  %v3204_v39 = vmul.f32 0.5, %v9950_v5  ;;  %v3652_v25 = vadd.f32 1.0, %v4617_v28 }
 0x2e0   : > { %4173 = vst [vmem:[#allocation1 + $0x2] ss:$4 sm:$0xff] %v4030_v49  ;;  %4624 = vtanh.f32 %v3530_v37  ;;  %v3528_v11 = vmul.f32 0.7978846, %v3464_v31  ;;  %v3711_v63 = vmul.f32 %v3647_v3, %v3199_v16  ;;  %v3397_v24 = vmul.f32 %v3333_v47, %v9961_v19  ;;  %v9963_v16 = vld [vmem:[#allocation151_spill] sm:$0xff]  ;;  %v9964_v30 = vld [vmem:[#allocation66_spill] sm:$0xff] }
 0x2e1   : > { %4175 = vst [vmem:[#allocation1 + $0x20] ss:$4 sm:$0xff] %v4032_v0  ;;  %4626 = vtanh.f32 %v3517_v27  ;;  %v3207_v8 = vmul.f32 0.5, %v9954_v38  ;;  %v3405_v29 = vmul.f32 %v3341_v14, %v9960_v1  ;;  %v3273_v45 = vmul.f32 0.044715, %v9962_v57 }
 0x2e2   : > { %4177 = vst [vmem:[#allocation1 + $0x22] ss:$4 sm:$0xff] %v4034_v62  ;;  %4628 = vtanh.f32 %v3528_v11  ;;  %v4621_v51 = vpop.eup %4620  ;;  %v4031_v5 = vmul.f32 %v8300_v18, %v3711_v63  ;;  %v3203_v49 = vmul.f32 0.5, %v9956_v60  ;;  %v3461_v35 = vadd.f32 %v3397_v24, %v9961_v19  ;;  %v8360_v18 = vpop.permute.xlu0 %3878 }
 0x2e3   : > { %v3280_v58 = vmul.f32 0.044715, %v9963_v16  ;;  %v4623_v17 = vpop.eup %4622  ;;  %v3651_v48 = vadd.f32 1.0, %v4621_v51  ;;  %v3210_v38 = vmul.f32 0.5, %v9957_v40  ;;  %v3197_v53 = vmul.f32 0.5, %v9958_v20  ;;  %v9965_v40 = vld [vmem:[#allocation87_spill] sm:$0xff]  ;;  %v8370_v3 = vpop.permute.xlu2 %3894 }
 0x2e4   : > { %v3337_v2 = vmul.f32 %v3273_v45, %v9962_v57  ;;  %v3716_v28 = vmul.f32 %v3652_v25, %v3204_v39  ;;  %4174 = vst [vmem:[#allocation1 + $0x3] ss:$4 sm:$0xff] %v4031_v5  ;;  %v3525_v0 = vmul.f32 0.7978846, %v3461_v35  ;;  %v3270_v22 = vmul.f32 0.044715, %v9964_v30 }
 0x2e5   : > { %v3344_v60 = vmul.f32 %v3280_v58, %v9963_v16  ;;  %v3715_v10 = vmul.f32 %v3651_v48, %v3203_v49  ;;  %v3469_v37 = vadd.f32 %v3405_v29, %v9960_v1  ;;  %v3275_v14 = vmul.f32 0.044715, %v9965_v40 }
 0x2e6   : > { %v4625_v9 = vpop.eup %4624  ;;  %v3401_v31 = vmul.f32 %v3337_v2, %v9962_v57  ;;  %v3208_v62 = vmul.f32 0.5, %v9959_v52  ;;  %4630 = vtanh.f32 %v3525_v0  ;;  %v3334_v47 = vmul.f32 %v3270_v22, %v9964_v30 }
 0x2e7   : > { %v4627_v20 = vpop.eup %4626  ;;  %4497 = vmatmul.msk.f32.gmra.mxu1 %vm4221_vm10, %v8322_v42  ;;  %v3408_v27 = vmul.f32 %v3344_v60, %v9963_v16  ;;  %v4035_v11 = vmul.f32 %v8263_v50, %v3715_v10  ;;  %v3339_v24 = vmul.f32 %v3275_v14, %v9965_v40  ;;  %v8378_v29 = vmul.f32 %v8269_v46, %v3716_v28  ;;  %v8392_v10 = vpop.permute.xlu1 %3892 }
 0x2e8   : > { %v4629_v39 = vpop.eup %4628  ;;  %v3645_v25 = vadd.f32 1.0, %v4627_v20  ;;  %v3465_v63 = vadd.f32 %v3401_v31, %v9962_v57  ;;  %v3655_v42 = vadd.f32 1.0, %v4623_v17  ;;  %v3398_v45 = vmul.f32 %v3334_v47, %v9964_v30  ;;  %v9967_v47 = vld [vmem:[#allocation164_spill] sm:$0xff] }
 0x2e9   : > { %v3656_v52 = vadd.f32 1.0, %v4629_v39  ;;  %4178 = vst [vmem:[#allocation1 + $0x23] ss:$4 sm:$0xff] %v4035_v11  ;;  %v3533_v5 = vmul.f32 0.7978846, %v3469_v37  ;;  %v3403_v35 = vmul.f32 %v3339_v24, %v9965_v40  ;;  %v3658_v58 = vadd.f32 1.0, %v4625_v9 }
 0x2ea   : > { %v3709_v51 = vmul.f32 %v3645_v25, %v3197_v53  ;;  %v3529_v49 = vmul.f32 0.7978846, %v3465_v63  ;;  %v8383_v48 = vmul.f32 0.5, %v9960_v1  ;;  %v3472_v2 = vadd.f32 %v3408_v27, %v9963_v16  ;;  %v8395_v14 = vpop.permute.xlu0 %3890 }
 0x2eb   : > { %v3720_v50 = vmul.f32 %v3656_v52, %v3208_v62  ;;  %v3462_v17 = vadd.f32 %v3398_v45, %v9964_v30  ;;  %v3467_v28 = vadd.f32 %v3403_v35, %v9965_v40  ;;  %v3719_v53 = vmul.f32 %v3655_v42, %v3207_v8  ;;  %v9966_v62 = vld [vmem:[#allocation156_spill] sm:$0xff]  ;;  %v8401_v25 = vpop.permute.xlu2 %3900 }
 0x2ec   : > { %v4029_v46 = vmul.f32 %v8295_v59, %v3709_v51  ;;  %4632 = vtanh.f32 %v3529_v49  ;;  %v4631_v0 = vpop.eup %4630  ;;  %v3205_v60 = vmul.f32 0.5, %v9961_v19  ;;  %v3209_v22 = vmul.f32 0.5, %v9962_v57  ;;  %v9968_v35 = vld [vmem:[#allocation140_spill] sm:$0xff] }
 0x2ed   : > { %v3283_v9 = vmul.f32 0.044715, %v7881_v34  ;;  %v4040_v1 = vmul.f32 %v8331_v56, %v3720_v50  ;;  %4634 = vtanh.f32 %v3533_v5  ;;  %v3653_v59 = vadd.f32 1.0, %v4631_v0 }
 0x2ee   : > { %4172 = vst [vmem:[#allocation1 + $0x1] ss:$4 sm:$0xff] %v4029_v46  ;;  %v3526_v37 = vmul.f32 0.7978846, %v3462_v17  ;;  %v3722_v31 = vmul.f32 %v3658_v58, %v3210_v38  ;;  %v3531_v20 = vmul.f32 0.7978846, %v3467_v28  ;;  %v4039_v42 = vmul.f32 %v8305_v43, %v3719_v53 }
 0x2ef   : > { %v3347_v8 = vmul.f32 %v3283_v9, %v7881_v34  ;;  %v3276_v19 = vmul.f32 0.044715, %v9966_v62  ;;  %v3717_v27 = vmul.f32 %v3653_v59, %v3205_v60  ;;  %v3536_v57 = vmul.f32 0.7978846, %v3472_v2  ;;  %v9969_v59 = vld [vmem:[#allocation54_spill] sm:$0xff] }
 0x2f0   : > { %4636 = vtanh.f32 %v3526_v37  ;;  %v3278_v39 = vmul.f32 0.044715, %v9967_v47  ;;  %v4042_v11 = vmul.f32 %v8338_v32, %v3722_v31  ;;  %v8404_v38 = vld.sshfl [vmem:[#allocation1 + $0x20] sm:$0xff pattern:$0x73625140]  ;;  %v3206_v2 = vmul.f32 0.5, %v9964_v30 }
 0x2f1   : > { %4638 = vtanh.f32 %v3531_v20  ;;  %v3411_v56 = vmul.f32 %v3347_v8, %v7881_v34  ;;  %v3340_v63 = vmul.f32 %v3276_v19, %v9966_v62  ;;  %v4037_v52 = vmul.f32 %v8360_v18, %v3717_v27  ;;  %4185 = vst [vmem:[#allocation1 + $0x20] ss:$4 sm:$0xff] %v4040_v1  ;;  %v8426_v27 = vpop.permute.xlu1 %3898 }
 0x2f2   : > { %v4633_v24 = vpop.eup %4632  ;;  %v3342_v45 = vmul.f32 %v3278_v39, %v9967_v47  ;;  %v3286_v51 = vmul.f32 0.044715, %v8030_v44  ;;  %4187 = vst [vmem:[#allocation1 + $0x22] ss:$4 sm:$0xff] %v4042_v11  ;;  %v3279_v58 = vmul.f32 0.044715, %v9968_v35  ;;  %4640 = vtanh.f32 %v3536_v57  ;;  %v8429_v11 = vpop.permute.xlu0 %3896 }
 0x2f3   : > { %v3657_v32 = vadd.f32 1.0, %v4633_v24  ;;  %v3475_v5 = vadd.f32 %v3411_v56, %v7881_v34  ;;  %v3404_v49 = vmul.f32 %v3340_v63, %v9966_v62  ;;  %v4635_v50 = vpop.eup %4634  ;;  %v3211_v9 = vmul.f32 0.5, %v9965_v40 }
 0x2f4   : > { %v3406_v43 = vmul.f32 %v3342_v45, %v9967_v47  ;;  %v3350_v18 = vmul.f32 %v3286_v51, %v8030_v44  ;;  %v3343_v53 = vmul.f32 %v3279_v58, %v9968_v35  ;;  %v3281_v37 = vmul.f32 0.044715, %v9969_v59  ;;  %v8437_v51 = vpop.permute.xlu2 %3906 }
 0x2f5   : > { %v3721_v46 = vmul.f32 %v3657_v32, %v3209_v22  ;;  %v4179_v17 = vld.sshfl [vmem:[#allocation1] sm:$0xff pattern:$0x73625140]  ;;  %v3539_v28 = vmul.f32 0.7978846, %v3475_v5  ;;  %v3468_v0 = vadd.f32 %v3404_v49, %v9966_v62  ;;  %v3661_v31 = vadd.f32 1.0, %v4635_v50 }
 0x2f6   : > { %v4637_v60 = vpop.eup %4636  ;;  %4498 = vmatmul.msk.f32.gmra.mxu1 %vm4221_vm10, %v4179_v17  ;;  %4181 = vst [vmem:[#allocation1] ss:$4 sm:$0xff] %v8378_v29  ;;  %v3470_v30 = vadd.f32 %v3406_v43, %v9967_v47  ;;  %v3414_v1 = vmul.f32 %v3350_v18, %v8030_v44  ;;  %v3407_v56 = vmul.f32 %v3343_v53, %v9968_v35  ;;  %v3216_v24 = vmul.f32 0.5, %v9963_v16  ;;  %v9970_v16 = vld [vmem:[#allocation130_spill] sm:$0xff]  ;;  %v9972_v17 = vld [vmem:[#allocation63_spill] sm:$0xff] }
 0x2f7   : > { %v4639_v22 = vpop.eup %4638  ;;  %v4041_v20 = vmul.f32 %v8325_v54, %v3721_v46  ;;  %4182 = vst [vmem:[#allocation1 + $0x1] ss:$4 sm:$0xff] %v4037_v52  ;;  %v3654_v8 = vadd.f32 1.0, %v4637_v60  ;;  %v3532_v19 = vmul.f32 0.7978846, %v3468_v0  ;;  %4642 = vtanh.f32 %v3539_v28 }
 0x2f8   : > { %4184 = vst [vmem:[#allocation1 + $0x3] ss:$4 sm:$0xff] %v4039_v42  ;;  %v3659_v29 = vadd.f32 1.0, %v4639_v22  ;;  %v3534_v40 = vmul.f32 0.7978846, %v3470_v30  ;;  %v3478_v57 = vadd.f32 %v3414_v1, %v8030_v44  ;;  %v3345_v54 = vmul.f32 %v3281_v37, %v9969_v59  ;;  %v4641_v63 = vpop.eup %4640 }
 0x2f9   : > { %v3718_v39 = vmul.f32 %v3654_v8, %v3206_v2  ;;  %4186 = vst [vmem:[#allocation1 + $0x21] ss:$4 sm:$0xff] %v4041_v20  ;;  %4644 = vtanh.f32 %v3532_v19  ;;  %v3725_v42 = vmul.f32 %v3661_v31, %v8383_v48  ;;  %v3471_v32 = vadd.f32 %v3407_v56, %v9968_v35  ;;  %v8462_v22 = vpop.permute.xlu1 %3904 }
 0x2fa   : > { %v3723_v52 = vmul.f32 %v3659_v29, %v3211_v9  ;;  %4646 = vtanh.f32 %v3534_v40  ;;  %v3409_v5 = vmul.f32 %v3345_v54, %v9969_v59  ;;  %v3219_v58 = vmul.f32 0.5, %v7881_v34 }
 0x2fb   : > { %v4038_v45 = vmul.f32 %v8355_v33, %v3718_v39  ;;  %v3542_v50 = vmul.f32 0.7978846, %v3478_v57  ;;  %v3282_v2 = vmul.f32 0.044715, %v9970_v16  ;;  %v4045_v43 = vmul.f32 %v8370_v3, %v3725_v42  ;;  %v3903_v39 = vpop.permute.xlu0 %3902 }
 0x2fc   : > { %v4043_v49 = vmul.f32 %v8395_v14, %v3723_v52  ;;  %v3212_v48 = vmul.f32 0.5, %v9966_v62  ;;  %v3535_v18 = vmul.f32 0.7978846, %v3471_v32  ;;  %v3473_v33 = vadd.f32 %v3409_v5, %v9969_v59 }
 0x2fd   : > { %4183 = vst [vmem:[#allocation1 + $0x2] ss:$4 sm:$0xff] %v4038_v45  ;;  %v4643_v46 = vpop.eup %4642  ;;  %v3664_v14 = vadd.f32 1.0, %v4641_v63  ;;  %v3214_v34 = vmul.f32 0.5, %v9967_v47  ;;  %v3346_v3 = vmul.f32 %v3282_v2, %v9970_v16  ;;  %v3284_v62 = vmul.f32 0.044715, %v9972_v17 }
 0x2fe   : > { %4499 = vmatmul.msk.f32.gmra.mxu1 %vm4221_vm10, %v8404_v38  ;;  %4188 = vst [vmem:[#allocation1 + $0x23] ss:$4 sm:$0xff] %v4043_v49  ;;  %4648 = vtanh.f32 %v3535_v18  ;;  %v3537_v0 = vmul.f32 0.7978846, %v3473_v33  ;;  %v3292_v53 = vmul.f32 0.044715, %v8080_v6 }
 0x2ff   : > { %v4645_v28 = vpop.eup %4644  ;;  %v3289_v60 = vmul.f32 0.044715, %v8211_v36  ;;  %4650 = vtanh.f32 %v3542_v50  ;;  %v3410_v38 = vmul.f32 %v3346_v3, %v9970_v16  ;;  %v3348_v47 = vmul.f32 %v3284_v62, %v9972_v17  ;;  %v8483_v50 = vpop.permute.xlu2 %3912 }
 0x300   : > { %v4647_v9 = vpop.eup %4646  ;;  %v3660_v30 = vadd.f32 1.0, %v4645_v28  ;;  %v3667_v1 = vadd.f32 1.0, %v4643_v46  ;;  %4652 = vtanh.f32 %v3537_v0  ;;  %v8466_v8 = vmul.f32 0.5, %v8030_v44 }
 0x301   : > { %v3662_v37 = vadd.f32 1.0, %v4647_v9  ;;  %v3353_v31 = vmul.f32 %v3289_v60, %v8211_v36  ;;  %v3474_v19 = vadd.f32 %v3410_v38, %v9970_v16  ;;  %v3412_v29 = vmul.f32 %v3348_v47, %v9972_v17 }
 0x302   : > { %v3724_v20 = vmul.f32 %v3660_v30, %v3212_v48  ;;  %v3215_v57 = vmul.f32 0.5, %v9968_v35  ;;  %v3356_v56 = vmul.f32 %v3292_v53, %v8080_v6  ;;  %v3728_v63 = vmul.f32 %v3664_v14, %v3216_v24  ;;  %v8504_v30 = vpop.permute.xlu1 %3910 }
 0x303   : > { %v3726_v40 = vmul.f32 %v3662_v37, %v3214_v34  ;;  %v3417_v54 = vmul.f32 %v3353_v31, %v8211_v36  ;;  %v3538_v42 = vmul.f32 0.7978846, %v3474_v19  ;;  %v3476_v45 = vadd.f32 %v3412_v29, %v9972_v17 }
 0x304   : > { %v4044_v44 = vmul.f32 %v8392_v10, %v3724_v20  ;;  %v4189_v52 = vld.sshfl [vmem:[#allocation1] sm:$0xff pattern:$0x73625140]  ;;  %v4649_v32 = vpop.eup %4648  ;;  %v3731_v5 = vmul.f32 %v3667_v1, %v3219_v58  ;;  %v3217_v35 = vmul.f32 0.5, %v9969_v59  ;;  %v4048_v10 = vmul.f32 %v8401_v25, %v3728_v63 }
 0x305   : > { %v4046_v49 = vmul.f32 %v8429_v11, %v3726_v40  ;;  %4192 = vst [vmem:[#allocation1 + $0x1] ss:$4 sm:$0xff] %v4045_v43  ;;  %v4190_v2 = vld.sshfl [vmem:[#allocation1 + $0x20] sm:$0xff pattern:$0x73625140]  ;;  %v3481_v24 = vadd.f32 %v3417_v54, %v8211_v36  ;;  %v4651_v48 = vpop.eup %4650  ;;  %v3663_v18 = vadd.f32 1.0, %v4649_v32  ;;  %4654 = vtanh.f32 %v3538_v42 }
 0x306   : > { %4500 = vmatmul.msk.f32.gmra.mxu1 %vm4221_vm10, %v4189_v52  ;;  %4191 = vst [vmem:[#allocation1] ss:$4 sm:$0xff] %v4044_v44  ;;  %v3540_v33 = vmul.f32 0.7978846, %v3476_v45  ;;  %v4653_v58 = vpop.eup %4652  ;;  %v4051_v11 = vmul.f32 %v8437_v51, %v3731_v5  ;;  %v3420_v59 = vmul.f32 %v3356_v56, %v8080_v6  ;;  %v3285_v46 = vmul.f32 0.044715, %v7945_v4 }
 0x307   : > { %4193 = vst [vmem:[#allocation1 + $0x2] ss:$4 sm:$0xff] %v4046_v49  ;;  %v3545_v43 = vmul.f32 0.7978846, %v3481_v24  ;;  %v3727_v14 = vmul.f32 %v3663_v18, %v3215_v57  ;;  %v3665_v34 = vadd.f32 1.0, %v4653_v58  ;;  %v3218_v3 = vmul.f32 0.5, %v9970_v16  ;;  %v8521_v42 = vpop.permute.xlu2 %3924 }
 0x308   : > { %4195 = vst [vmem:[#allocation1 + $0x20] ss:$4 sm:$0xff] %v4048_v10  ;;  %4656 = vtanh.f32 %v3540_v33  ;;  %v3287_v25 = vmul.f32 0.044715, %v7983_v55  ;;  %v3349_v62 = vmul.f32 %v3285_v46, %v7945_v4  ;;  %v3295_v51 = vmul.f32 0.044715, %v8248_v21  ;;  %v4275_v18 = vpop.f32.mrf.mxu1 }
 0x309   : > { %4198 = vst [vmem:[#allocation1 + $0x23] ss:$4 sm:$0xff] %v4051_v11  ;;  %4658 = vtanh.f32 %v3545_v43  ;;  %v3670_v28 = vadd.f32 1.0, %v4651_v48  ;;  %v4047_v0 = vmul.f32 %v8426_v27, %v3727_v14  ;;  %v3729_v53 = vmul.f32 %v3665_v34, %v3217_v35 }
 0x30a   : > { %v3351_v60 = vmul.f32 %v3287_v25, %v7983_v55  ;;  %v3220_v9 = vmul.f32 0.5, %v9972_v17  ;;  %v3413_v16 = vmul.f32 %v3349_v62, %v7945_v4  ;;  %v3359_v38 = vmul.f32 %v3295_v51, %v8248_v21  ;;  %v3909_v17 = vpop.permute.xlu0 %3908  ;;  %4323 = vst.msk [vmem:[%s8527_s26] sm:$0xff] %vm494_vm1, %v4275_v18  ;;  %v9973_v62 = vld [vmem:[#allocation47_spill] sm:$0xff] }
 0x30b   : > { %v3288_v47 = vmul.f32 0.044715, %v8038_v12  ;;  %v4655_v1 = vpop.eup %4654  ;;  %4194 = vst [vmem:[#allocation1 + $0x3] ss:$4 sm:$0xff] %v4047_v0  ;;  %v4049_v37 = vmul.f32 %v3903_v39, %v3729_v53  ;;  %v3484_v31 = vadd.f32 %v3420_v59, %v8080_v6  ;;  %v3293_v20 = vmul.f32 0.044715, %v8043_v15 }
 0x30c   : > { %v3415_v27 = vmul.f32 %v3351_v60, %v7983_v55  ;;  %v3666_v19 = vadd.f32 1.0, %v4655_v1  ;;  %v3477_v29 = vadd.f32 %v3413_v16, %v7945_v4  ;;  %v3423_v40 = vmul.f32 %v3359_v38, %v8248_v21 }
 0x30d   : > { %v3352_v57 = vmul.f32 %v3288_v47, %v8038_v12  ;;  %v3734_v54 = vmul.f32 %v3670_v28, %v8466_v8  ;;  %4196 = vst [vmem:[#allocation1 + $0x21] ss:$4 sm:$0xff] %v4049_v37  ;;  %v3225_v39 = vmul.f32 0.5, %v8211_v36  ;;  %v3357_v44 = vmul.f32 %v3293_v20, %v8043_v15 }
 0x30e   : > { %v4657_v56 = vpop.eup %4656  ;;  %4501 = vmatmul.msk.f32.gmra.mxu1 %vm4221_vm10, %v4190_v2  ;;  %v3479_v63 = vadd.f32 %v3415_v27, %v7983_v55  ;;  %v3730_v45 = vmul.f32 %v3666_v19, %v3218_v3  ;;  %v3541_v5 = vmul.f32 0.7978846, %v3477_v29  ;;  %v3487_v49 = vadd.f32 %v3423_v40, %v8248_v21 }
 0x30f   : > { %v4659_v52 = vpop.eup %4658  ;;  %v3668_v32 = vadd.f32 1.0, %v4657_v56  ;;  %v4054_v36 = vmul.f32 %v8483_v50, %v3734_v54  ;;  %v3548_v8 = vmul.f32 0.7978846, %v3484_v31  ;;  %v3416_v2 = vmul.f32 %v3352_v57, %v8038_v12  ;;  %v3917_v3 = vpop.permute.xlu1 %3916 }
 0x310   : > { %v3543_v35 = vmul.f32 0.7978846, %v3479_v63  ;;  %v4050_v24 = vmul.f32 %v8462_v22, %v3730_v45  ;;  %v3673_v10 = vadd.f32 1.0, %v4659_v52  ;;  %4660 = vtanh.f32 %v3541_v5 }
 0x311   : > { %v3732_v48 = vmul.f32 %v3668_v32, %v3220_v9  ;;  %v3551_v33 = vmul.f32 0.7978846, %v3487_v49  ;;  %v3480_v58 = vadd.f32 %v3416_v2, %v8038_v12  ;;  %v3421_v11 = vmul.f32 %v3357_v44, %v8043_v15 }
 0x312   : > { %4662 = vtanh.f32 %v3543_v35  ;;  %4197 = vst [vmem:[#allocation1 + $0x22] ss:$4 sm:$0xff] %v4050_v24  ;;  %v4199_v59 = vld.sshfl [vmem:[#allocation1] sm:$0xff pattern:$0x73625140]  ;;  %v3221_v43 = vmul.f32 0.5, %v7945_v4  ;;  %v3737_v34 = vmul.f32 %v3673_v10, %v3225_v39  ;;  %v3915_v60 = vpop.permute.xlu0 %3914 }
 0x313   : > { %v4052_v50 = vmul.f32 %v3909_v17, %v3732_v48  ;;  %4502 = vmatmul.msk.f32.vlgmr.msrb.gmra.mxu3 %vm4221_vm10, %v4199_v59  ;;  %4203 = vst [vmem:[#allocation1 + $0x2] ss:$4 sm:$0xff] %v4054_v36  ;;  %v3544_v22 = vmul.f32 0.7978846, %v3480_v58  ;;  %v3485_v46 = vadd.f32 %v3421_v11, %v8043_v15  ;;  %v3298_v14 = vmul.f32 0.044715, %v8273_v13 }
 0x314   : > { %4664 = vtanh.f32 %v3548_v8  ;;  %v3223_v25 = vmul.f32 0.5, %v7983_v55  ;;  %v3291_v51 = vmul.f32 0.044715, %v9973_v62  ;;  %v3290_v0 = vmul.f32 0.044715, %v8187_v23 }
 0x315   : > { %4201 = vst [vmem:[#allocation1] ss:$4 sm:$0xff] %v4052_v50  ;;  %4666 = vtanh.f32 %v3544_v22  ;;  %v3549_v28 = vmul.f32 0.7978846, %v3485_v46  ;;  %v3362_v4 = vmul.f32 %v3298_v14, %v8273_v13  ;;  %v3294_v16 = vmul.f32 0.044715, %v9930_v41 }
 0x316   : > { %v4661_v53 = vpop.eup %4660  ;;  %4668 = vtanh.f32 %v3551_v33  ;;  %v3355_v9 = vmul.f32 %v3291_v51, %v9973_v62  ;;  %v3296_v38 = vmul.f32 0.044715, %v8215_v7  ;;  %v3354_v37 = vmul.f32 %v3290_v0, %v8187_v23 }
 0x317   : > { %v3669_v55 = vadd.f32 1.0, %v4661_v53  ;;  %4670 = vtanh.f32 %v3549_v28  ;;  %v3426_v1 = vmul.f32 %v3362_v4, %v8273_v13  ;;  %v3358_v19 = vmul.f32 %v3294_v16, %v9930_v41  ;;  %v3923_v11 = vpop.permute.xlu1 %3922 }
 0x318   : > { %v4663_v47 = vpop.eup %4662  ;;  %v3419_v20 = vmul.f32 %v3355_v9, %v9973_v62  ;;  %v3360_v17 = vmul.f32 %v3296_v38, %v8215_v7  ;;  %v3228_v29 = vmul.f32 0.5, %v8080_v6  ;;  %v3418_v44 = vmul.f32 %v3354_v37, %v8187_v23 }
 0x319   : > { %v3919_v31 = vpop.permute.xlu2 %3918  ;;  %v3671_v27 = vadd.f32 1.0, %v4663_v47  ;;  %v3733_v57 = vmul.f32 %v3669_v55, %v3221_v43  ;;  %v4200_v56 = vld.sshfl [vmem:[#allocation1 + $0x20] sm:$0xff pattern:$0x73625140]  ;;  %v3422_v52 = vmul.f32 %v3358_v19, %v9930_v41  ;;  %v3224_v5 = vmul.f32 0.5, %v8038_v12 }
 0x31a   : > { %v4057_v40 = vmul.f32 %v3919_v31, %v3737_v34  ;;  %v4665_v54 = vpop.eup %4664  ;;  %v3483_v63 = vadd.f32 %v3419_v20, %v9973_v62  ;;  %v3490_v6 = vadd.f32 %v3426_v1, %v8273_v13  ;;  %v3424_v49 = vmul.f32 %v3360_v17, %v8215_v7  ;;  %v3927_v34 = vpop.permute.xlu0 %3926 }
 0x31b   : > { %v3735_v39 = vmul.f32 %v3671_v27, %v3223_v25  ;;  %v4667_v45 = vpop.eup %4666  ;;  %v4053_v32 = vmul.f32 %v8504_v30, %v3733_v57  ;;  %4503 = vmatmul.msk.f32.gmra.mxu3 %vm4221_vm10, %v4200_v56  ;;  %v3482_v24 = vadd.f32 %v3418_v44, %v8187_v23  ;;  %v3676_v10 = vadd.f32 1.0, %v4665_v54 }
 0x31c   : > { %4206 = vst [vmem:[#allocation1 + $0x21] ss:$4 sm:$0xff] %v4057_v40  ;;  %v4669_v36 = vpop.eup %4668  ;;  %v3672_v35 = vadd.f32 1.0, %v4667_v45  ;;  %v3547_v2 = vmul.f32 0.7978846, %v3483_v63  ;;  %v3229_v30 = vmul.f32 0.5, %v8043_v15  ;;  %v3486_v18 = vadd.f32 %v3422_v52, %v9930_v41 }
 0x31d   : > { %v4055_v8 = vmul.f32 %v3915_v60, %v3735_v39  ;;  %v4671_v48 = vpop.eup %4670  ;;  %4202 = vst [vmem:[#allocation1 + $0x1] ss:$4 sm:$0xff] %v4053_v32  ;;  %v3488_v33 = vadd.f32 %v3424_v49, %v8215_v7  ;;  %v3546_v50 = vmul.f32 0.7978846, %v3482_v24  ;;  %v3231_v59 = vmul.f32 0.5, %v8248_v21 }
 0x31e   : > { %v3736_v12 = vmul.f32 %v3672_v35, %v3224_v5  ;;  %v3677_v58 = vadd.f32 1.0, %v4671_v48  ;;  %4672 = vtanh.f32 %v3547_v2  ;;  %v3679_v43 = vadd.f32 1.0, %v4669_v36 }
 0x31f   : > { %4204 = vst [vmem:[#allocation1 + $0x3] ss:$4 sm:$0xff] %v4055_v8  ;;  %v3550_v22 = vmul.f32 0.7978846, %v3486_v18  ;;  %v3297_v46 = vmul.f32 0.044715, %v8199_v61  ;;  %4674 = vtanh.f32 %v3546_v50  ;;  %v3740_v0 = vmul.f32 %v3676_v10, %v3228_v29  ;;  %v3929_v56 = vpop.permute.xlu1 %3928 }
 0x320   : > { %v4056_v14 = vmul.f32 %v3917_v3, %v3736_v12  ;;  %v3554_v15 = vmul.f32 0.7978846, %v3490_v6  ;;  %v3552_v25 = vmul.f32 0.7978846, %v3488_v33  ;;  %v3741_v51 = vmul.f32 %v3677_v58, %v3229_v30 }
 0x321   : > { %4676 = vtanh.f32 %v3550_v22  ;;  %v3361_v28 = vmul.f32 %v3297_v46, %v8199_v61  ;;  %v3299_v4 = vmul.f32 0.044715, %v8048_v26  ;;  %v4278_v53 = vpop.f32.mrf.mxu1  ;;  %v3931_v21 = vpop.permute.xlu2 %3930  ;;  %v3227_v9 = vmul.f32 0.5, %v9973_v62 }
 0x322   : > { %4205 = vst [vmem:[#allocation1 + $0x20] ss:$4 sm:$0xff] %v4056_v14  ;;  %v4061_v60 = vmul.f32 %v3927_v34, %v3741_v51  ;;  %v4060_v47 = vmul.f32 %v8521_v42, %v3740_v0  ;;  %v3743_v55 = vmul.f32 %v3679_v43, %v3231_v59  ;;  %v3226_v1 = vmul.f32 0.5, %v8187_v23 }
 0x323   : > { %4324 = vst.msk [vmem:[%s8527_s26 + $0x8] sm:$0xff] %vm494_vm1, %v4278_v53  ;;  %v3425_v3 = vmul.f32 %v3361_v28, %v8199_v61  ;;  %v3363_v16 = vmul.f32 %v3299_v4, %v8048_v26  ;;  %4678 = vtanh.f32 %v3552_v25  ;;  %v3230_v17 = vmul.f32 0.5, %v9930_v41 }
 0x324   : > { %v4673_v38 = vpop.eup %4672  ;;  %4680 = vtanh.f32 %v3554_v15  ;;  %v4063_v19 = vmul.f32 %v3931_v21, %v3743_v55  ;;  %v3232_v49 = vmul.f32 0.5, %v8215_v7  ;;  %v3234_v8 = vmul.f32 0.5, %v8273_v13 }
 0x325   : > { %v3675_v31 = vadd.f32 1.0, %v4673_v38  ;;  %v3489_v27 = vadd.f32 %v3425_v3, %v8199_v61  ;;  %v3427_v62 = vmul.f32 %v3363_v16, %v8048_v26  ;;  %v4675_v20 = vpop.eup %4674  ;;  %v3233_v2 = vmul.f32 0.5, %v8199_v61 }
 0x326   : > { %v4209_v37 = vld.sshfl [vmem:[#allocation1] sm:$0xff pattern:$0x73625140]  ;;  %v3674_v40 = vadd.f32 1.0, %v4675_v20  ;;  %v3235_v43 = vmul.f32 0.5, %v8048_v26 }
 0x327   : > { %4504 = vmatmul.msk.f32.gmra.mxu3 %vm4221_vm10, %v4209_v37  ;;  %4211 = vst [vmem:[#allocation1] ss:$4 sm:$0xff] %v4060_v47  ;;  %v4677_v29 = vpop.eup %4676  ;;  %v3739_v42 = vmul.f32 %v3675_v31, %v3227_v9  ;;  %v3553_v23 = vmul.f32 0.7978846, %v3489_v27  ;;  %v3491_v57 = vadd.f32 %v3427_v62, %v8048_v26 }
 0x328   : > { %4212 = vst [vmem:[#allocation1 + $0x1] ss:$4 sm:$0xff] %v4061_v60  ;;  %v3678_v54 = vadd.f32 1.0, %v4677_v29  ;;  %v3738_v63 = vmul.f32 %v3674_v40, %v3226_v1 }
 0x329   : > { %4214 = vst [vmem:[#allocation1 + $0x3] ss:$4 sm:$0xff] %v4063_v19  ;;  %v4059_v39 = vmul.f32 %v3923_v11, %v3739_v42  ;;  %v4679_v44 = vpop.eup %4678  ;;  %4682 = vtanh.f32 %v3553_v23  ;;  %v3555_v32 = vmul.f32 0.7978846, %v3491_v57  ;;  %v3937_v48 = vpop.permute.xlu2 %3936 }
 0x32a   : > { %v3742_v45 = vmul.f32 %v3678_v54, %v3230_v17  ;;  %v4681_v5 = vpop.eup %4680  ;;  %v3680_v36 = vadd.f32 1.0, %v4679_v44 }
 0x32b   : > { %v3921_v52 = vpop.permute.xlu0 %3920  ;;  %4208 = vst [vmem:[#allocation1 + $0x23] ss:$4 sm:$0xff] %v4059_v39  ;;  %4684 = vtanh.f32 %v3555_v32  ;;  %v3682_v35 = vadd.f32 1.0, %v4681_v5 }
 0x32c   : > { %v4058_v41 = vmul.f32 %v3921_v52, %v3738_v63  ;;  %v4062_v6 = vmul.f32 %v3929_v56, %v3742_v45  ;;  %v3744_v10 = vmul.f32 %v3680_v36, %v3232_v49 }
 0x32d   : > { %v3746_v12 = vmul.f32 %v3682_v35, %v3234_v8  ;;  %v3935_v11 = vpop.permute.xlu1 %3934 }
 0x32e   : > { %4207 = vst [vmem:[#allocation1 + $0x22] ss:$4 sm:$0xff] %v4058_v41 }
 0x32f   : > { %4213 = vst [vmem:[#allocation1 + $0x2] ss:$4 sm:$0xff] %v4062_v6  ;;  %v4683_v24 = vpop.eup %4682  ;;  %v4066_v59 = vmul.f32 %v3937_v48, %v3746_v12 }
 0x330   : > { %v3681_v30 = vadd.f32 1.0, %v4683_v24 }
 0x331   : > { %v4281_v18 = vpop.f32.mrf.mxu1  ;;  %v4685_v33 = vpop.eup %4684 }
 0x332   : > { %4325 = vst.msk [vmem:[%s8527_s26 + $0x10] sm:$0xff] %vm494_vm1, %v4281_v18  ;;  %v3745_v7 = vmul.f32 %v3681_v30, %v3233_v2  ;;  %v3683_v22 = vadd.f32 1.0, %v4685_v33 }
 0x333   : > { %v3933_v58 = vpop.permute.xlu0 %3932 }
 0x334   : > { %v4064_v50 = vmul.f32 %v3933_v58, %v3744_v10  ;;  %v4065_v61 = vmul.f32 %v3935_v11, %v3745_v7  ;;  %v3747_v46 = vmul.f32 %v3683_v22, %v3235_v43 }
 0x335   : > { %v4210_v13 = vld.sshfl [vmem:[#allocation1 + $0x20] sm:$0xff pattern:$0x73625140] }
 0x336   : > { %4505 = vmatmul.msk.f32.gmra.mxu3 %vm4221_vm10, %v4210_v13  ;;  %4215 = vst [vmem:[#allocation1 + $0x20] ss:$4 sm:$0xff] %v4064_v50  ;;  %v4219_v34 = vld.sshfl [vmem:[#allocation1] sm:$0xff pattern:$0x73625140] }
 0x337   : > { %4217 = vst [vmem:[#allocation1 + $0x22] ss:$4 sm:$0xff] %v4066_v59 }
 0x338   : > { %4216 = vst [vmem:[#allocation1 + $0x21] ss:$4 sm:$0xff] %v4065_v61 }
 0x33b   : > { %v3939_v14 = vpop.permute.xlu0 %3938 }
 0x33c   : > { %v4067_v15 = vmul.f32 %v3939_v14, %v3747_v46 }
 0x33e   : > { %4218 = vst [vmem:[#allocation1 + $0x23] ss:$4 sm:$0xff] %v4067_v15  ;;  %4506 = vmatmul.msk.f32.gmra.mxu3 %vm4221_vm10, %v4219_v34 }
 0x342   : > { %v4284_v25 = vpop.f32.mrf.mxu1 }
 0x343   : > { %4326 = vst.msk [vmem:[%s8527_s26 + $0x18] sm:$0xff] %vm494_vm1, %v4284_v25 }
 0x345   : > { %v4220_v26 = vld.sshfl [vmem:[#allocation1 + $0x20] sm:$0xff pattern:$0x73625140] }
 0x346   : > { %4507 = vmatmul.msk.f32.gmra.mxu3 %vm4221_vm10, %v4220_v26 }
 0x35c   : > { %v4287_v51 = vpop.f32.mrf.mxu1 }
 0x35d   : > { %4327 = vst.msk [vmem:[%s8527_s26 + $0x20] sm:$0xff] %vm494_vm1, %v4287_v51 }
 0x364   : > { %v4290_v28 = vpop.f32.mrf.mxu1 }
 0x365   : > { %4328 = vst.msk [vmem:[%s8527_s26 + $0x28] sm:$0xff] %vm494_vm1, %v4290_v28 }
 0x373   : > { %v4293_v4 = vpop.f32.mrf.mxu1 }
 0x374   : > { %4329 = vst.msk [vmem:[%s8527_s26 + $0x30] sm:$0xff] %vm494_vm1, %v4293_v4 }
 0x37b   : > { %v4296_v0 = vpop.f32.mrf.mxu1 }
 0x37c   : > { %4330 = vst.msk [vmem:[%s8527_s26 + $0x38] sm:$0xff] %vm494_vm1, %v4296_v0 }
 0x383   : > { %v4299_v53 = vpop.f32.mrf.mxu1 }
 0x384   : > { %4331 = vst.msk [vmem:[%s8527_s26 + $0x40] sm:$0xff] %vm494_vm1, %v4299_v53 }
 0x38b   : > { %v4302_v21 = vpop.f32.mrf.mxu1 }
 0x38c   : > { %4332 = vst.msk [vmem:[%s8527_s26 + $0x48] sm:$0xff] %vm494_vm1, %v4302_v21 }
 0x396   : > { %v4305_v60 = vpop.f32.mrf.mxu3 }
 0x397   : > { %4333 = vst.msk [vmem:[%s8527_s26 + $0x50] sm:$0xff] %vm494_vm1, %v4305_v60 }
 0x39e   : > { %v4308_v9 = vpop.f32.mrf.mxu3 }
 0x39f   : > { %4334 = vst.msk [vmem:[%s8527_s26 + $0x58] sm:$0xff] %vm494_vm1, %v4308_v9 }
 0x3aa   : > { %v4311_v3 = vpop.f32.mrf.mxu3 }
 0x3ab   : > { %4335 = vst.msk [vmem:[%s8527_s26 + $0x60] sm:$0xff] %vm494_vm1, %v4311_v3 }
 0x3b9   : > { %v4314_v16 = vpop.f32.mrf.mxu3 }
 0x3ba   : > { %4336 = vst.msk [vmem:[%s8527_s26 + $0x68] sm:$0xff] %vm494_vm1, %v4314_v16 }
 0x3c1   : > { %v4317_v38 = vpop.f32.mrf.mxu3 }
 0x3c2   : > { %4337 = vst.msk [vmem:[%s8527_s26 + $0x70] sm:$0xff] %vm494_vm1, %v4317_v38 }
 0x3c9   : > { %v4320_v47 = vpop.f32.mrf.mxu3 }
 0x3ca   : > { %4338 = vst.msk [vmem:[%s8527_s26 + $0x78] sm:$0xff] %vm494_vm1, %v4320_v47 }
 0x3cb PF: > { %s15_s22 = sadd.s32 1, %s4730_s22   ;;  %s9974_s18 = smov %s4722_s20 }
 0x3cc   : > { %p12_p7 = scmp.ge.s32.totalorder %s15_s22, 6   ;;  %s9975_s19 = smov %s4726_s21 }
 0x3cd   : > { %s9976_s20 = smov %s9979_s23  ;;  %s9977_s21 = smov %s9983_s24 }
 0x3ce   :  { %14 = sbr.rel (!%p12_p7) target bundleno = 3 (0x3), region = 85 }

</bundles_post_ra>
